<compile_context>
chip_gen: v7x
topology: tpu7x:2x2x1
jax: 0.10.0
libtpu: 0.0.40
codegen_flags: <defaults>
</compile_context>

<pallas_src>
import math
from functools import partial

import numpy as np
import jax
import jax.numpy as jnp
from jax.experimental import pallas as pl
from jax.experimental.pallas import tpu as pltpu


def _pick_group(batch: int, sample_bytes: int, kk: int,
                vmem_budget: int = 12 << 20, max_group: int = 64) -> int:
    """Samples per grid step.

    Per-step VMEM ~ (2x in + 2x out double buffers + kk*patch scratch +
    kk*tiled mask) ~= (4 + 2*kk) * block_bytes; keep that under a budget that
    is conservative even for v7x (64 MiB VMEM, 32 MiB scoped default).
    Tiny batches run as a single grid step (no point paying per-step
    overhead for 16 KiB blocks)."""
    per_sample = max(1, sample_bytes * (4 + 2 * kk))
    limit = max(1, min(max_group, vmem_budget // per_sample))
    if batch <= limit:
        return batch
    best = 1
    for g in range(1, limit + 1):
        if batch % g == 0:
            best = g
    return best


def _border_masks(E: int, k: int) -> np.ndarray:
    """(k*k, E*E) f32 masks: 1 where tap (dy, dx) stays inside the image."""
    p = k // 2
    f = np.arange(E * E)
    xc, yc = f % E, f // E
    rows = []
    for dy in range(k):
        for dx in range(k):
            oy, ox = dy - p, dx - p
            rows.append(((xc + ox >= 0) & (xc + ox < E) &
                         (yc + oy >= 0) & (yc + oy < E)).astype(np.float32))
    return np.stack(rows)


def _conv_gelu_ln_residual(x, w, b, gamma, beta, mask, patch_ref,
                           *, shifts, S, EE, G, eps, matmul_dtype):
    """One Convolution block (x + LN(GELU(conv(x)))) on a (S, G*EE) slab."""
    GEE = G * EE
    inv_n = 1.0 / float(S * EE)
    inv_sqrt2 = 1.0 / math.sqrt(2.0)

    # In-VMEM im2col: one lane rotation per tap, stored into the patch
    # scratch rows [tap*S, tap*S+S); then ONE dense mask multiply.
    for t, d in enumerate(shifts):
        rolled = x if d == 0 else pltpu.roll(x, shift=(-d) % GEE, axis=1)
        patch_ref[t * S:(t + 1) * S, :] = rolled
    patches = patch_ref[...] * mask                      # (kk*S, G*EE)

    # Single fused MXU matmul for all taps / channels / samples (f32 acc).
    y = jnp.dot(w.astype(matmul_dtype), patches.astype(matmul_dtype),
                preferred_element_type=jnp.float32)
    y = y + b                                            # (S,1) bias broadcast

    # Exact GELU (torch.nn.GELU(approximate='none')).
    y = 0.5 * y * (1.0 + jax.lax.erf(y * inv_sqrt2))
    ysq = y * y

    # Per-sample LayerNorm over (S, E, E) + affine + residual.  Statistics
    # use per-sample lane-segment reductions (static 256-lane slices); the
    # heavy elementwise work above stays batched over the whole slab.
    segs = []
    for g in range(G):
        lo = g * EE
        y_g = y[:, lo:lo + EE]
        s1 = jnp.sum(y_g)
        s2 = jnp.sum(ysq[:, lo:lo + EE])
        mean = s1 * inv_n
        var = s2 * inv_n - mean * mean
        istd = jax.lax.rsqrt(var + eps)
        segs.append(x[:, lo:lo + EE] + ((y_g - mean) * istd) * gamma + beta)
    return jnp.concatenate(segs, axis=1) if G > 1 else segs[0]


def _convblock_kernel(x_ref, m_ref, w1_ref, b1_ref, g1_ref, bb1_ref,
                      w2_ref, b2_ref, g2_ref, bb2_ref, o_ref, patch_ref,
                      *, E, k, G, eps, matmul_dtype):
    S, EE = g1_ref.shape
    p = k // 2
    # Flat lane shift per tap: window[f] = x[f + d] (borders masked to 0).
    shifts = [(dy - p) * E + (dx - p) for dy in range(k) for dx in range(k)]
    kw = dict(shifts=shifts, S=S, EE=EE, G=G, eps=eps, matmul_dtype=matmul_dtype)

    xs = x_ref[0]                                        # (S, G*EE)
    mask = m_ref[...]                                    # (kk*S, G*EE)
    h = _conv_gelu_ln_residual(xs, w1_ref[...], b1_ref[...], g1_ref[...],
                               bb1_ref[...], mask, patch_ref, **kw)
    o_ref[0] = _conv_gelu_ln_residual(h, w2_ref[...], b2_ref[...], g2_ref[...],
                                      bb2_ref[...], mask, patch_ref, **kw)


def conv_block_forward(x, params, *, eps=1e-5, group_size=None,
                       matmul_dtype=jnp.float32):
    """ConvBlock forward: both Convolution blocks fused in one pallas_call."""
    (w1, b1, g1, bb1), (w2, b2, g2, bb2) = params
    B, S, E, E2 = x.shape
    assert E == E2
    k = w1.shape[-1]
    assert k % 2 == 1, "'same' padding roll+mask path needs odd kernel size"
    EE, kk = E * E, k * k

    G = _pick_group(B, S * EE * 4, kk) if group_size is None else group_size
    assert B % G == 0
    nsteps, GEE = B // G, G * EE

    def prep_w(w):
        # (C_out, C_in, k, k) -> (S, kk*S), columns ordered (dy*k + dx)*S + c_in.
        return jnp.transpose(w, (0, 2, 3, 1)).reshape(S, kk * S).astype(jnp.float32)

    w1f, w2f = prep_w(w1), prep_w(w2)
    b1c = b1.reshape(S, 1).astype(jnp.float32)
    b2c = b2.reshape(S, 1).astype(jnp.float32)
    g1r = g1.reshape(S, EE).astype(jnp.float32)
    bb1r = bb1.reshape(S, EE).astype(jnp.float32)
    g2r = g2.reshape(S, EE).astype(jnp.float32)
    bb2r = bb2.reshape(S, EE).astype(jnp.float32)

    # Border masks: per tap, repeated over in-channels (rows, matching the
    # patch-row order) and over the G samples of a grid step (lanes).
    mask_np = np.tile(np.repeat(_border_masks(E, k), S, axis=0), (1, G))
    mask_tiled = jnp.asarray(mask_np, dtype=jnp.float32)          # (kk*S, G*EE)

    # Lane-batch the samples of each grid step: (B,S,E,E) -> (nsteps, S, G*EE).
    xr = (x.astype(jnp.float32).reshape(nsteps, G, S, EE)
          .transpose(0, 2, 1, 3).reshape(nsteps, S, GEE))

    out = pl.pallas_call(
        partial(_convblock_kernel, E=E, k=k, G=G, eps=eps,
                matmul_dtype=matmul_dtype),
        out_shape=jax.ShapeDtypeStruct((nsteps, S, GEE), jnp.float32),
        grid=(nsteps,),
        in_specs=[
            pl.BlockSpec((1, S, GEE), lambda i: (i, 0, 0)),       # x (lane-batched)
            pl.BlockSpec((kk * S, GEE), lambda i: (0, 0)),        # border masks
            pl.BlockSpec((S, kk * S), lambda i: (0, 0)),          # conv1 weight
            pl.BlockSpec((S, 1), lambda i: (0, 0)),               # conv1 bias
            pl.BlockSpec((S, EE), lambda i: (0, 0)),              # ln1 gamma
            pl.BlockSpec((S, EE), lambda i: (0, 0)),              # ln1 beta
            pl.BlockSpec((S, kk * S), lambda i: (0, 0)),          # conv2 weight
            pl.BlockSpec((S, 1), lambda i: (0, 0)),               # conv2 bias
            pl.BlockSpec((S, EE), lambda i: (0, 0)),              # ln2 gamma
            pl.BlockSpec((S, EE), lambda i: (0, 0)),              # ln2 beta
        ],
        out_specs=pl.BlockSpec((1, S, GEE), lambda i: (i, 0, 0)),
        scratch_shapes=[pltpu.VMEM((kk * S, GEE), jnp.float32)],  # patch matrix
        compiler_params=pltpu.CompilerParams(
            dimension_semantics=("parallel",)),
    )(xr, mask_tiled, w1f, b1c, g1r, bb1r, w2f, b2c, g2r, bb2r)

    return (out.reshape(nsteps, S, G, EE).transpose(0, 2, 1, 3)
            .reshape(B, S, E, E))


def _reference(x, params, eps=1e-5):
    """Pure-JAX reference matching the PyTorch forward."""
    for (w, b, g, bb) in params:
        y = jax.lax.conv_general_dilated(
            x, w, window_strides=(1, 1), padding="SAME",
            dimension_numbers=("NCHW", "OIHW", "NCHW"))
        y = y + b[None, :, None, None]
        y = 0.5 * y * (1.0 + jax.lax.erf(y / jnp.sqrt(2.0)))
        mean = jnp.mean(y, axis=(1, 2, 3), keepdims=True)
        var = jnp.mean((y - mean) ** 2, axis=(1, 2, 3), keepdims=True)
        yn = (y - mean) * jax.lax.rsqrt(var + eps)
        x = x + yn * g[None] + bb[None]
    return x


if __name__ == "__main__":
    # batch=4, input_sequence_length=4, embedding_dim=16, kernel_size=3
    B, S, E, K = 4, 4, 16, 3
    key = jax.random.PRNGKey(0)
    x_key, *p_keys = jax.random.split(key, 1 + 8)
    x = jax.random.normal(x_key, (B, S, E, E), dtype=jnp.float32)

    params = []
    bound = 1.0 / math.sqrt(S * K * K)  # PyTorch Conv2d default init bound
    for i in range(2):
        kw, kb, kg, kbb = p_keys[4 * i: 4 * i + 4]
        w = jax.random.uniform(kw, (S, S, K, K), jnp.float32, -bound, bound)
        b = jax.random.uniform(kb, (S,), jnp.float32, -bound, bound)
        # torch LN defaults weight=1, bias=0; perturb so the affine path is real
        g = 1.0 + 0.05 * jax.random.normal(kg, (S, E, E), dtype=jnp.float32)
        bb = 0.05 * jax.random.normal(kbb, (S, E, E), dtype=jnp.float32)
        params.append((w, b, g, bb))

    out = jax.block_until_ready(conv_block_forward(x, params))
    ref = jax.block_until_ready(_reference(x, params))
    assert out.shape == x.shape and out.dtype == jnp.float32
    max_err = float(jnp.max(jnp.abs(out - ref)))
    assert jnp.allclose(out, ref, atol=2e-3, rtol=2e-3), max_err
    print("KERNEL_OK")
</pallas_src>

<mosaic_0001>
module attributes {stable_mosaic.version = 11 : i64} {
  func.func @_convblock_kernel(%arg0: i32, %arg1: memref<1x4x1024xf32, #tpu.memory_space<vmem>>, %arg2: memref<36x1024xf32, #tpu.memory_space<vmem>>, %arg3: memref<4x36xf32, #tpu.memory_space<vmem>>, %arg4: memref<4x1xf32, #tpu.memory_space<vmem>>, %arg5: memref<4x256xf32, #tpu.memory_space<vmem>>, %arg6: memref<4x256xf32, #tpu.memory_space<vmem>>, %arg7: memref<4x36xf32, #tpu.memory_space<vmem>>, %arg8: memref<4x1xf32, #tpu.memory_space<vmem>>, %arg9: memref<4x256xf32, #tpu.memory_space<vmem>>, %arg10: memref<4x256xf32, #tpu.memory_space<vmem>>, %arg11: memref<1x4x1024xf32, #tpu.memory_space<vmem>>, %arg12: memref<36x1024xf32, #tpu.memory_space<vmem>>) attributes {dimension_semantics = [#tpu.dimension_semantics<parallel>], iteration_bounds = array<i64: 1>, scalar_prefetch = 0 : i64, scratch_operands = 1 : i64, tpu.core_type = #tpu.core_type<tc>, window_params = [{transform_indices = @transform_0, window_bounds = array<i64: 1, 4, 1024>}, {pipeline_mode = #tpu.pipeline_mode<synchronous>, transform_indices = @transform_1, window_bounds = array<i64: 36, 1024>}, {pipeline_mode = #tpu.pipeline_mode<synchronous>, transform_indices = @transform_2, window_bounds = array<i64: 4, 36>}, {pipeline_mode = #tpu.pipeline_mode<synchronous>, transform_indices = @transform_3, window_bounds = array<i64: 4, 1>}, {pipeline_mode = #tpu.pipeline_mode<synchronous>, transform_indices = @transform_4, window_bounds = array<i64: 4, 256>}, {pipeline_mode = #tpu.pipeline_mode<synchronous>, transform_indices = @transform_5, window_bounds = array<i64: 4, 256>}, {pipeline_mode = #tpu.pipeline_mode<synchronous>, transform_indices = @transform_6, window_bounds = array<i64: 4, 36>}, {pipeline_mode = #tpu.pipeline_mode<synchronous>, transform_indices = @transform_7, window_bounds = array<i64: 4, 1>}, {pipeline_mode = #tpu.pipeline_mode<synchronous>, transform_indices = @transform_8, window_bounds = array<i64: 4, 256>}, {pipeline_mode = #tpu.pipeline_mode<synchronous>, transform_indices = @transform_9, window_bounds = array<i64: 4, 256>}, {transform_indices = @transform_10, window_bounds = array<i64: 1, 4, 1024>}]} {
    %c0 = arith.constant 0 : index
    %c0_0 = arith.constant 0 : index
    %c0_1 = arith.constant 0 : index
    %0 = vector.load %arg1[%c0, %c0_0, %c0_1] : memref<1x4x1024xf32, #tpu.memory_space<vmem>>, vector<1x4x1024xf32>
    %1 = vector.shape_cast %0 : vector<1x4x1024xf32> to vector<4x1024xf32>
    %c0_2 = arith.constant 0 : index
    %c0_3 = arith.constant 0 : index
    %2 = vector.load %arg2[%c0_2, %c0_3] : memref<36x1024xf32, #tpu.memory_space<vmem>>, vector<36x1024xf32>
    %c0_4 = arith.constant 0 : index
    %c0_5 = arith.constant 0 : index
    %3 = vector.load %arg3[%c0_4, %c0_5] : memref<4x36xf32, #tpu.memory_space<vmem>>, vector<4x36xf32>
    %c0_6 = arith.constant 0 : index
    %c0_7 = arith.constant 0 : index
    %4 = vector.load %arg4[%c0_6, %c0_7] : memref<4x1xf32, #tpu.memory_space<vmem>>, vector<4x1xf32>
    %c0_8 = arith.constant 0 : index
    %c0_9 = arith.constant 0 : index
    %5 = vector.load %arg5[%c0_8, %c0_9] : memref<4x256xf32, #tpu.memory_space<vmem>>, vector<4x256xf32>
    %c0_10 = arith.constant 0 : index
    %c0_11 = arith.constant 0 : index
    %6 = vector.load %arg6[%c0_10, %c0_11] : memref<4x256xf32, #tpu.memory_space<vmem>>, vector<4x256xf32>
    %c17_i32 = arith.constant 17 : i32
    %7 = tpu.dynamic_rotate %1 by %c17_i32 dim 1 : vector<4x1024xf32>, i32 -> vector<4x1024xf32>
    %c0_12 = arith.constant 0 : index
    %c0_13 = arith.constant 0 : index
    %8 = vector.load %arg12[%c0_12, %c0_13] : memref<36x1024xf32, #tpu.memory_space<vmem>>, vector<4x1024xf32>
    tpu.vector_store %arg12[%c0_12, %c0_13], %7 {strides = array<i32>} : memref<36x1024xf32, #tpu.memory_space<vmem>>, vector<4x1024xf32>,
    %c16_i32 = arith.constant 16 : i32
    %9 = tpu.dynamic_rotate %1 by %c16_i32 dim 1 : vector<4x1024xf32>, i32 -> vector<4x1024xf32>
    %c4 = arith.constant 4 : index
    %c0_14 = arith.constant 0 : index
    %10 = vector.load %arg12[%c4, %c0_14] : memref<36x1024xf32, #tpu.memory_space<vmem>>, vector<4x1024xf32>
    tpu.vector_store %arg12[%c4, %c0_14], %9 {strides = array<i32>} : memref<36x1024xf32, #tpu.memory_space<vmem>>, vector<4x1024xf32>,
    %c15_i32 = arith.constant 15 : i32
    %11 = tpu.dynamic_rotate %1 by %c15_i32 dim 1 : vector<4x1024xf32>, i32 -> vector<4x1024xf32>
    %c8 = arith.constant 8 : index
    %c0_15 = arith.constant 0 : index
    %12 = vector.load %arg12[%c8, %c0_15] : memref<36x1024xf32, #tpu.memory_space<vmem>>, vector<4x1024xf32>
    tpu.vector_store %arg12[%c8, %c0_15], %11 {strides = array<i32>} : memref<36x1024xf32, #tpu.memory_space<vmem>>, vector<4x1024xf32>,
    %c1_i32 = arith.constant 1 : i32
    %13 = tpu.dynamic_rotate %1 by %c1_i32 dim 1 : vector<4x1024xf32>, i32 -> vector<4x1024xf32>
    %c12 = arith.constant 12 : index
    %c0_16 = arith.constant 0 : index
    %14 = vector.load %arg12[%c12, %c0_16] : memref<36x1024xf32, #tpu.memory_space<vmem>>, vector<4x1024xf32>
    tpu.vector_store %arg12[%c12, %c0_16], %13 {strides = array<i32>} : memref<36x1024xf32, #tpu.memory_space<vmem>>, vector<4x1024xf32>,
    %c16 = arith.constant 16 : index
    %c0_17 = arith.constant 0 : index
    %15 = vector.load %arg12[%c16, %c0_17] : memref<36x1024xf32, #tpu.memory_space<vmem>>, vector<4x1024xf32>
    tpu.vector_store %arg12[%c16, %c0_17], %1 {strides = array<i32>} : memref<36x1024xf32, #tpu.memory_space<vmem>>, vector<4x1024xf32>,
    %c1023_i32 = arith.constant 1023 : i32
    %16 = tpu.dynamic_rotate %1 by %c1023_i32 dim 1 : vector<4x1024xf32>, i32 -> vector<4x1024xf32>
    %c20 = arith.constant 20 : index
    %c0_18 = arith.constant 0 : index
    %17 = vector.load %arg12[%c20, %c0_18] : memref<36x1024xf32, #tpu.memory_space<vmem>>, vector<4x1024xf32>
    tpu.vector_store %arg12[%c20, %c0_18], %16 {strides = array<i32>} : memref<36x1024xf32, #tpu.memory_space<vmem>>, vector<4x1024xf32>,
    %c1009_i32 = arith.constant 1009 : i32
    %18 = tpu.dynamic_rotate %1 by %c1009_i32 dim 1 : vector<4x1024xf32>, i32 -> vector<4x1024xf32>
    %c24 = arith.constant 24 : index
    %c0_19 = arith.constant 0 : index
    %19 = vector.load %arg12[%c24, %c0_19] : memref<36x1024xf32, #tpu.memory_space<vmem>>, vector<4x1024xf32>
    tpu.vector_store %arg12[%c24, %c0_19], %18 {strides = array<i32>} : memref<36x1024xf32, #tpu.memory_space<vmem>>, vector<4x1024xf32>,
    %c1008_i32 = arith.constant 1008 : i32
    %20 = tpu.dynamic_rotate %1 by %c1008_i32 dim 1 : vector<4x1024xf32>, i32 -> vector<4x1024xf32>
    %c28 = arith.constant 28 : index
    %c0_20 = arith.constant 0 : index
    %21 = vector.load %arg12[%c28, %c0_20] : memref<36x1024xf32, #tpu.memory_space<vmem>>, vector<4x1024xf32>
    tpu.vector_store %arg12[%c28, %c0_20], %20 {strides = array<i32>} : memref<36x1024xf32, #tpu.memory_space<vmem>>, vector<4x1024xf32>,
    %c1007_i32 = arith.constant 1007 : i32
    %22 = tpu.dynamic_rotate %1 by %c1007_i32 dim 1 : vector<4x1024xf32>, i32 -> vector<4x1024xf32>
    %c32 = arith.constant 32 : index
    %c0_21 = arith.constant 0 : index
    %23 = vector.load %arg12[%c32, %c0_21] : memref<36x1024xf32, #tpu.memory_space<vmem>>, vector<4x1024xf32>
    tpu.vector_store %arg12[%c32, %c0_21], %22 {strides = array<i32>} : memref<36x1024xf32, #tpu.memory_space<vmem>>, vector<4x1024xf32>,
    %c0_22 = arith.constant 0 : index
    %c0_23 = arith.constant 0 : index
    %24 = vector.load %arg12[%c0_22, %c0_23] : memref<36x1024xf32, #tpu.memory_space<vmem>>, vector<36x1024xf32>
    %25 = arith.mulf %24, %2 : vector<36x1024xf32>
    %cst = arith.constant dense<0.000000e+00> : vector<4x1024xf32>
    %26 = tpu.matmul %3, %25, %cst {dimension_numbers = #tpu.dot_dimension_numbers<[1], [0], [0], [1], [0, 0, 1, 1], [], []>} : vector<4x36xf32>, vector<36x1024xf32>, vector<4x1024xf32> -> vector<4x1024xf32>
    %27 = vector.broadcast %4 : vector<4x1xf32> to vector<4x1024xf32>
    %28 = arith.addf %26, %27 : vector<4x1024xf32>
    %cst_24 = arith.constant 5.000000e-01 : f32
    %29 = vector.broadcast %cst_24 : f32 to vector<4x1024xf32>
    %30 = arith.mulf %29, %28 : vector<4x1024xf32>
    %cst_25 = arith.constant 0.707106769 : f32
    %31 = vector.broadcast %cst_25 : f32 to vector<4x1024xf32>
    %32 = arith.mulf %28, %31 : vector<4x1024xf32>
    %33 = math.erf %32 : vector<4x1024xf32>
    %cst_26 = arith.constant 1.000000e+00 : f32
    %34 = vector.broadcast %cst_26 : f32 to vector<4x1024xf32>
    %35 = arith.addf %34, %33 : vector<4x1024xf32>
    %36 = arith.mulf %30, %35 : vector<4x1024xf32>
    %37 = arith.mulf %36, %36 : vector<4x1024xf32>
    %38 = vector.extract_strided_slice %36 {offsets = [0, 0], sizes = [4, 256], strides = [1, 1]} : vector<4x1024xf32> to vector<4x256xf32>
    %39 = vector.shape_cast %38 : vector<4x256xf32> to vector<1x4x256xf32>
    %cst_27 = arith.constant dense<0.000000e+00> : vector<1xf32>
    %40 = vector.multi_reduction <add>, %39, %cst_27 [1, 2] : vector<1x4x256xf32> to vector<1xf32>
    %41 = vector.shape_cast %40 : vector<1xf32> to vector<1x1x1xf32>
    %42 = vector.extract %41[0, 0, 0] : f32 from vector<1x1x1xf32>
    %43 = vector.extract_strided_slice %37 {offsets = [0, 0], sizes = [4, 256], strides = [1, 1]} : vector<4x1024xf32> to vector<4x256xf32>
    %44 = vector.shape_cast %43 : vector<4x256xf32> to vector<1x4x256xf32>
    %cst_28 = arith.constant dense<0.000000e+00> : vector<1xf32>
    %45 = vector.multi_reduction <add>, %44, %cst_28 [1, 2] : vector<1x4x256xf32> to vector<1xf32>
    %46 = vector.shape_cast %45 : vector<1xf32> to vector<1x1x1xf32>
    %47 = vector.extract %46[0, 0, 0] : f32 from vector<1x1x1xf32>
    %cst_29 = arith.constant 9.765625E-4 : f32
    %48 = arith.mulf %42, %cst_29 : f32
    %cst_30 = arith.constant 9.765625E-4 : f32
    %49 = arith.mulf %47, %cst_30 : f32
    %50 = arith.mulf %48, %48 : f32
    %51 = arith.subf %49, %50 : f32
    %cst_31 = arith.constant 9.99999974E-6 : f32
    %52 = arith.addf %51, %cst_31 : f32
    %53 = math.rsqrt %52 : f32
    %54 = vector.extract_strided_slice %1 {offsets = [0, 0], sizes = [4, 256], strides = [1, 1]} : vector<4x1024xf32> to vector<4x256xf32>
    %55 = vector.broadcast %48 : f32 to vector<4x256xf32>
    %56 = arith.subf %38, %55 : vector<4x256xf32>
    %57 = vector.broadcast %53 : f32 to vector<4x256xf32>
    %58 = arith.mulf %56, %57 : vector<4x256xf32>
    %59 = arith.mulf %58, %5 : vector<4x256xf32>
    %60 = arith.addf %54, %59 : vector<4x256xf32>
    %61 = arith.addf %60, %6 : vector<4x256xf32>
    %62 = vector.extract_strided_slice %36 {offsets = [0, 256], sizes = [4, 256], strides = [1, 1]} : vector<4x1024xf32> to vector<4x256xf32>
    %63 = vector.shape_cast %62 : vector<4x256xf32> to vector<1x4x256xf32>
    %cst_32 = arith.constant dense<0.000000e+00> : vector<1xf32>
    %64 = vector.multi_reduction <add>, %63, %cst_32 [1, 2] : vector<1x4x256xf32> to vector<1xf32>
    %65 = vector.shape_cast %64 : vector<1xf32> to vector<1x1x1xf32>
    %66 = vector.extract %65[0, 0, 0] : f32 from vector<1x1x1xf32>
    %67 = vector.extract_strided_slice %37 {offsets = [0, 256], sizes = [4, 256], strides = [1, 1]} : vector<4x1024xf32> to vector<4x256xf32>
    %68 = vector.shape_cast %67 : vector<4x256xf32> to vector<1x4x256xf32>
    %cst_33 = arith.constant dense<0.000000e+00> : vector<1xf32>
    %69 = vector.multi_reduction <add>, %68, %cst_33 [1, 2] : vector<1x4x256xf32> to vector<1xf32>
    %70 = vector.shape_cast %69 : vector<1xf32> to vector<1x1x1xf32>
    %71 = vector.extract %70[0, 0, 0] : f32 from vector<1x1x1xf32>
    %cst_34 = arith.constant 9.765625E-4 : f32
    %72 = arith.mulf %66, %cst_34 : f32
    %cst_35 = arith.constant 9.765625E-4 : f32
    %73 = arith.mulf %71, %cst_35 : f32
    %74 = arith.mulf %72, %72 : f32
    %75 = arith.subf %73, %74 : f32
    %cst_36 = arith.constant 9.99999974E-6 : f32
    %76 = arith.addf %75, %cst_36 : f32
    %77 = math.rsqrt %76 : f32
    %78 = vector.extract_strided_slice %1 {offsets = [0, 256], sizes = [4, 256], strides = [1, 1]} : vector<4x1024xf32> to vector<4x256xf32>
    %79 = vector.broadcast %72 : f32 to vector<4x256xf32>
    %80 = arith.subf %62, %79 : vector<4x256xf32>
    %81 = vector.broadcast %77 : f32 to vector<4x256xf32>
    %82 = arith.mulf %80, %81 : vector<4x256xf32>
    %83 = arith.mulf %82, %5 : vector<4x256xf32>
    %84 = arith.addf %78, %83 : vector<4x256xf32>
    %85 = arith.addf %84, %6 : vector<4x256xf32>
    %86 = vector.extract_strided_slice %36 {offsets = [0, 512], sizes = [4, 256], strides = [1, 1]} : vector<4x1024xf32> to vector<4x256xf32>
    %87 = vector.shape_cast %86 : vector<4x256xf32> to vector<1x4x256xf32>
    %cst_37 = arith.constant dense<0.000000e+00> : vector<1xf32>
    %88 = vector.multi_reduction <add>, %87, %cst_37 [1, 2] : vector<1x4x256xf32> to vector<1xf32>
    %89 = vector.shape_cast %88 : vector<1xf32> to vector<1x1x1xf32>
    %90 = vector.extract %89[0, 0, 0] : f32 from vector<1x1x1xf32>
    %91 = vector.extract_strided_slice %37 {offsets = [0, 512], sizes = [4, 256], strides = [1, 1]} : vector<4x1024xf32> to vector<4x256xf32>
    %92 = vector.shape_cast %91 : vector<4x256xf32> to vector<1x4x256xf32>
    %cst_38 = arith.constant dense<0.000000e+00> : vector<1xf32>
    %93 = vector.multi_reduction <add>, %92, %cst_38 [1, 2] : vector<1x4x256xf32> to vector<1xf32>
    %94 = vector.shape_cast %93 : vector<1xf32> to vector<1x1x1xf32>
    %95 = vector.extract %94[0, 0, 0] : f32 from vector<1x1x1xf32>
    %cst_39 = arith.constant 9.765625E-4 : f32
    %96 = arith.mulf %90, %cst_39 : f32
    %cst_40 = arith.constant 9.765625E-4 : f32
    %97 = arith.mulf %95, %cst_40 : f32
    %98 = arith.mulf %96, %96 : f32
    %99 = arith.subf %97, %98 : f32
    %cst_41 = arith.constant 9.99999974E-6 : f32
    %100 = arith.addf %99, %cst_41 : f32
    %101 = math.rsqrt %100 : f32
    %102 = vector.extract_strided_slice %1 {offsets = [0, 512], sizes = [4, 256], strides = [1, 1]} : vector<4x1024xf32> to vector<4x256xf32>
    %103 = vector.broadcast %96 : f32 to vector<4x256xf32>
    %104 = arith.subf %86, %103 : vector<4x256xf32>
    %105 = vector.broadcast %101 : f32 to vector<4x256xf32>
    %106 = arith.mulf %104, %105 : vector<4x256xf32>
    %107 = arith.mulf %106, %5 : vector<4x256xf32>
    %108 = arith.addf %102, %107 : vector<4x256xf32>
    %109 = arith.addf %108, %6 : vector<4x256xf32>
    %110 = vector.extract_strided_slice %36 {offsets = [0, 768], sizes = [4, 256], strides = [1, 1]} : vector<4x1024xf32> to vector<4x256xf32>
    %111 = vector.shape_cast %110 : vector<4x256xf32> to vector<1x4x256xf32>
    %cst_42 = arith.constant dense<0.000000e+00> : vector<1xf32>
    %112 = vector.multi_reduction <add>, %111, %cst_42 [1, 2] : vector<1x4x256xf32> to vector<1xf32>
    %113 = vector.shape_cast %112 : vector<1xf32> to vector<1x1x1xf32>
    %114 = vector.extract %113[0, 0, 0] : f32 from vector<1x1x1xf32>
    %115 = vector.extract_strided_slice %37 {offsets = [0, 768], sizes = [4, 256], strides = [1, 1]} : vector<4x1024xf32> to vector<4x256xf32>
    %116 = vector.shape_cast %115 : vector<4x256xf32> to vector<1x4x256xf32>
    %cst_43 = arith.constant dense<0.000000e+00> : vector<1xf32>
    %117 = vector.multi_reduction <add>, %116, %cst_43 [1, 2] : vector<1x4x256xf32> to vector<1xf32>
    %118 = vector.shape_cast %117 : vector<1xf32> to vector<1x1x1xf32>
    %119 = vector.extract %118[0, 0, 0] : f32 from vector<1x1x1xf32>
    %cst_44 = arith.constant 9.765625E-4 : f32
    %120 = arith.mulf %114, %cst_44 : f32
    %cst_45 = arith.constant 9.765625E-4 : f32
    %121 = arith.mulf %119, %cst_45 : f32
    %122 = arith.mulf %120, %120 : f32
    %123 = arith.subf %121, %122 : f32
    %cst_46 = arith.constant 9.99999974E-6 : f32
    %124 = arith.addf %123, %cst_46 : f32
    %125 = math.rsqrt %124 : f32
    %126 = vector.extract_strided_slice %1 {offsets = [0, 768], sizes = [4, 256], strides = [1, 1]} : vector<4x1024xf32> to vector<4x256xf32>
    %127 = vector.broadcast %120 : f32 to vector<4x256xf32>
    %128 = arith.subf %110, %127 : vector<4x256xf32>
    %129 = vector.broadcast %125 : f32 to vector<4x256xf32>
    %130 = arith.mulf %128, %129 : vector<4x256xf32>
    %131 = arith.mulf %130, %5 : vector<4x256xf32>
    %132 = arith.addf %126, %131 : vector<4x256xf32>
    %133 = arith.addf %132, %6 : vector<4x256xf32>
    %134 = tpu.concatenate %61, %85, %109, %133 in 1 : vector<4x256xf32>, vector<4x256xf32>, vector<4x256xf32>, vector<4x256xf32> -> vector<4x1024xf32>
    %c0_47 = arith.constant 0 : index
    %c0_48 = arith.constant 0 : index
    %135 = vector.load %arg7[%c0_47, %c0_48] : memref<4x36xf32, #tpu.memory_space<vmem>>, vector<4x36xf32>
    %c0_49 = arith.constant 0 : index
    %c0_50 = arith.constant 0 : index
    %136 = vector.load %arg8[%c0_49, %c0_50] : memref<4x1xf32, #tpu.memory_space<vmem>>, vector<4x1xf32>
    %c0_51 = arith.constant 0 : index
    %c0_52 = arith.constant 0 : index
    %137 = vector.load %arg9[%c0_51, %c0_52] : memref<4x256xf32, #tpu.memory_space<vmem>>, vector<4x256xf32>
    %c0_53 = arith.constant 0 : index
    %c0_54 = arith.constant 0 : index
    %138 = vector.load %arg10[%c0_53, %c0_54] : memref<4x256xf32, #tpu.memory_space<vmem>>, vector<4x256xf32>
    %c17_i32_55 = arith.constant 17 : i32
    %139 = tpu.dynamic_rotate %134 by %c17_i32_55 dim 1 : vector<4x1024xf32>, i32 -> vector<4x1024xf32>
    %c0_56 = arith.constant 0 : index
    %c0_57 = arith.constant 0 : index
    %140 = vector.load %arg12[%c0_56, %c0_57] : memref<36x1024xf32, #tpu.memory_space<vmem>>, vector<4x1024xf32>
    tpu.vector_store %arg12[%c0_56, %c0_57], %139 {strides = array<i32>} : memref<36x1024xf32, #tpu.memory_space<vmem>>, vector<4x1024xf32>,
    %c16_i32_58 = arith.constant 16 : i32
    %141 = tpu.dynamic_rotate %134 by %c16_i32_58 dim 1 : vector<4x1024xf32>, i32 -> vector<4x1024xf32>
    %c4_59 = arith.constant 4 : index
    %c0_60 = arith.constant 0 : index
    %142 = vector.load %arg12[%c4_59, %c0_60] : memref<36x1024xf32, #tpu.memory_space<vmem>>, vector<4x1024xf32>
    tpu.vector_store %arg12[%c4_59, %c0_60], %141 {strides = array<i32>} : memref<36x1024xf32, #tpu.memory_space<vmem>>, vector<4x1024xf32>,
    %c15_i32_61 = arith.constant 15 : i32
    %143 = tpu.dynamic_rotate %134 by %c15_i32_61 dim 1 : vector<4x1024xf32>, i32 -> vector<4x1024xf32>
    %c8_62 = arith.constant 8 : index
    %c0_63 = arith.constant 0 : index
    %144 = vector.load %arg12[%c8_62, %c0_63] : memref<36x1024xf32, #tpu.memory_space<vmem>>, vector<4x1024xf32>
    tpu.vector_store %arg12[%c8_62, %c0_63], %143 {strides = array<i32>} : memref<36x1024xf32, #tpu.memory_space<vmem>>, vector<4x1024xf32>,
    %c1_i32_64 = arith.constant 1 : i32
    %145 = tpu.dynamic_rotate %134 by %c1_i32_64 dim 1 : vector<4x1024xf32>, i32 -> vector<4x1024xf32>
    %c12_65 = arith.constant 12 : index
    %c0_66 = arith.constant 0 : index
    %146 = vector.load %arg12[%c12_65, %c0_66] : memref<36x1024xf32, #tpu.memory_space<vmem>>, vector<4x1024xf32>
    tpu.vector_store %arg12[%c12_65, %c0_66], %145 {strides = array<i32>} : memref<36x1024xf32, #tpu.memory_space<vmem>>, vector<4x1024xf32>,
    %c16_67 = arith.constant 16 : index
    %c0_68 = arith.constant 0 : index
    %147 = vector.load %arg12[%c16_67, %c0_68] : memref<36x1024xf32, #tpu.memory_space<vmem>>, vector<4x1024xf32>
    tpu.vector_store %arg12[%c16_67, %c0_68], %134 {strides = array<i32>} : memref<36x1024xf32, #tpu.memory_space<vmem>>, vector<4x1024xf32>,
    %c1023_i32_69 = arith.constant 1023 : i32
    %148 = tpu.dynamic_rotate %134 by %c1023_i32_69 dim 1 : vector<4x1024xf32>, i32 -> vector<4x1024xf32>
    %c20_70 = arith.constant 20 : index
    %c0_71 = arith.constant 0 : index
    %149 = vector.load %arg12[%c20_70, %c0_71] : memref<36x1024xf32, #tpu.memory_space<vmem>>, vector<4x1024xf32>
    tpu.vector_store %arg12[%c20_70, %c0_71], %148 {strides = array<i32>} : memref<36x1024xf32, #tpu.memory_space<vmem>>, vector<4x1024xf32>,
    %c1009_i32_72 = arith.constant 1009 : i32
    %150 = tpu.dynamic_rotate %134 by %c1009_i32_72 dim 1 : vector<4x1024xf32>, i32 -> vector<4x1024xf32>
    %c24_73 = arith.constant 24 : index
    %c0_74 = arith.constant 0 : index
    %151 = vector.load %arg12[%c24_73, %c0_74] : memref<36x1024xf32, #tpu.memory_space<vmem>>, vector<4x1024xf32>
    tpu.vector_store %arg12[%c24_73, %c0_74], %150 {strides = array<i32>} : memref<36x1024xf32, #tpu.memory_space<vmem>>, vector<4x1024xf32>,
    %c1008_i32_75 = arith.constant 1008 : i32
    %152 = tpu.dynamic_rotate %134 by %c1008_i32_75 dim 1 : vector<4x1024xf32>, i32 -> vector<4x1024xf32>
    %c28_76 = arith.constant 28 : index
    %c0_77 = arith.constant 0 : index
    %153 = vector.load %arg12[%c28_76, %c0_77] : memref<36x1024xf32, #tpu.memory_space<vmem>>, vector<4x1024xf32>
    tpu.vector_store %arg12[%c28_76, %c0_77], %152 {strides = array<i32>} : memref<36x1024xf32, #tpu.memory_space<vmem>>, vector<4x1024xf32>,
    %c1007_i32_78 = arith.constant 1007 : i32
    %154 = tpu.dynamic_rotate %134 by %c1007_i32_78 dim 1 : vector<4x1024xf32>, i32 -> vector<4x1024xf32>
    %c32_79 = arith.constant 32 : index
    %c0_80 = arith.constant 0 : index
    %155 = vector.load %arg12[%c32_79, %c0_80] : memref<36x1024xf32, #tpu.memory_space<vmem>>, vector<4x1024xf32>
    tpu.vector_store %arg12[%c32_79, %c0_80], %154 {strides = array<i32>} : memref<36x1024xf32, #tpu.memory_space<vmem>>, vector<4x1024xf32>,
    %c0_81 = arith.constant 0 : index
    %c0_82 = arith.constant 0 : index
    %156 = vector.load %arg12[%c0_81, %c0_82] : memref<36x1024xf32, #tpu.memory_space<vmem>>, vector<36x1024xf32>
    %157 = arith.mulf %156, %2 : vector<36x1024xf32>
    %cst_83 = arith.constant dense<0.000000e+00> : vector<4x1024xf32>
    %158 = tpu.matmul %135, %157, %cst_83 {dimension_numbers = #tpu.dot_dimension_numbers<[1], [0], [0], [1], [0, 0, 1, 1], [], []>} : vector<4x36xf32>, vector<36x1024xf32>, vector<4x1024xf32> -> vector<4x1024xf32>
    %159 = vector.broadcast %136 : vector<4x1xf32> to vector<4x1024xf32>
    %160 = arith.addf %158, %159 : vector<4x1024xf32>
    %cst_84 = arith.constant 5.000000e-01 : f32
    %161 = vector.broadcast %cst_84 : f32 to vector<4x1024xf32>
    %162 = arith.mulf %161, %160 : vector<4x1024xf32>
    %cst_85 = arith.constant 0.707106769 : f32
    %163 = vector.broadcast %cst_85 : f32 to vector<4x1024xf32>
    %164 = arith.mulf %160, %163 : vector<4x1024xf32>
    %165 = math.erf %164 : vector<4x1024xf32>
    %cst_86 = arith.constant 1.000000e+00 : f32
    %166 = vector.broadcast %cst_86 : f32 to vector<4x1024xf32>
    %167 = arith.addf %166, %165 : vector<4x1024xf32>
    %168 = arith.mulf %162, %167 : vector<4x1024xf32>
    %169 = arith.mulf %168, %168 : vector<4x1024xf32>
    %170 = vector.extract_strided_slice %168 {offsets = [0, 0], sizes = [4, 256], strides = [1, 1]} : vector<4x1024xf32> to vector<4x256xf32>
    %171 = vector.shape_cast %170 : vector<4x256xf32> to vector<1x4x256xf32>
    %cst_87 = arith.constant dense<0.000000e+00> : vector<1xf32>
    %172 = vector.multi_reduction <add>, %171, %cst_87 [1, 2] : vector<1x4x256xf32> to vector<1xf32>
    %173 = vector.shape_cast %172 : vector<1xf32> to vector<1x1x1xf32>
    %174 = vector.extract %173[0, 0, 0] : f32 from vector<1x1x1xf32>
    %175 = vector.extract_strided_slice %169 {offsets = [0, 0], sizes = [4, 256], strides = [1, 1]} : vector<4x1024xf32> to vector<4x256xf32>
    %176 = vector.shape_cast %175 : vector<4x256xf32> to vector<1x4x256xf32>
    %cst_88 = arith.constant dense<0.000000e+00> : vector<1xf32>
    %177 = vector.multi_reduction <add>, %176, %cst_88 [1, 2] : vector<1x4x256xf32> to vector<1xf32>
    %178 = vector.shape_cast %177 : vector<1xf32> to vector<1x1x1xf32>
    %179 = vector.extract %178[0, 0, 0] : f32 from vector<1x1x1xf32>
    %cst_89 = arith.constant 9.765625E-4 : f32
    %180 = arith.mulf %174, %cst_89 : f32
    %cst_90 = arith.constant 9.765625E-4 : f32
    %181 = arith.mulf %179, %cst_90 : f32
    %182 = arith.mulf %180, %180 : f32
    %183 = arith.subf %181, %182 : f32
    %cst_91 = arith.constant 9.99999974E-6 : f32
    %184 = arith.addf %183, %cst_91 : f32
    %185 = math.rsqrt %184 : f32
    %186 = vector.extract_strided_slice %134 {offsets = [0, 0], sizes = [4, 256], strides = [1, 1]} : vector<4x1024xf32> to vector<4x256xf32>
    %187 = vector.broadcast %180 : f32 to vector<4x256xf32>
    %188 = arith.subf %170, %187 : vector<4x256xf32>
    %189 = vector.broadcast %185 : f32 to vector<4x256xf32>
    %190 = arith.mulf %188, %189 : vector<4x256xf32>
    %191 = arith.mulf %190, %137 : vector<4x256xf32>
    %192 = arith.addf %186, %191 : vector<4x256xf32>
    %193 = arith.addf %192, %138 : vector<4x256xf32>
    %194 = vector.extract_strided_slice %168 {offsets = [0, 256], sizes = [4, 256], strides = [1, 1]} : vector<4x1024xf32> to vector<4x256xf32>
    %195 = vector.shape_cast %194 : vector<4x256xf32> to vector<1x4x256xf32>
    %cst_92 = arith.constant dense<0.000000e+00> : vector<1xf32>
    %196 = vector.multi_reduction <add>, %195, %cst_92 [1, 2] : vector<1x4x256xf32> to vector<1xf32>
    %197 = vector.shape_cast %196 : vector<1xf32> to vector<1x1x1xf32>
    %198 = vector.extract %197[0, 0, 0] : f32 from vector<1x1x1xf32>
    %199 = vector.extract_strided_slice %169 {offsets = [0, 256], sizes = [4, 256], strides = [1, 1]} : vector<4x1024xf32> to vector<4x256xf32>
    %200 = vector.shape_cast %199 : vector<4x256xf32> to vector<1x4x256xf32>
    %cst_93 = arith.constant dense<0.000000e+00> : vector<1xf32>
    %201 = vector.multi_reduction <add>, %200, %cst_93 [1, 2] : vector<1x4x256xf32> to vector<1xf32>
    %202 = vector.shape_cast %201 : vector<1xf32> to vector<1x1x1xf32>
    %203 = vector.extract %202[0, 0, 0] : f32 from vector<1x1x1xf32>
    %cst_94 = arith.constant 9.765625E-4 : f32
    %204 = arith.mulf %198, %cst_94 : f32
    %cst_95 = arith.constant 9.765625E-4 : f32
    %205 = arith.mulf %203, %cst_95 : f32
    %206 = arith.mulf %204, %204 : f32
    %207 = arith.subf %205, %206 : f32
    %cst_96 = arith.constant 9.99999974E-6 : f32
    %208 = arith.addf %207, %cst_96 : f32
    %209 = math.rsqrt %208 : f32
    %210 = vector.extract_strided_slice %134 {offsets = [0, 256], sizes = [4, 256], strides = [1, 1]} : vector<4x1024xf32> to vector<4x256xf32>
    %211 = vector.broadcast %204 : f32 to vector<4x256xf32>
    %212 = arith.subf %194, %211 : vector<4x256xf32>
    %213 = vector.broadcast %209 : f32 to vector<4x256xf32>
    %214 = arith.mulf %212, %213 : vector<4x256xf32>
    %215 = arith.mulf %214, %137 : vector<4x256xf32>
    %216 = arith.addf %210, %215 : vector<4x256xf32>
    %217 = arith.addf %216, %138 : vector<4x256xf32>
    %218 = vector.extract_strided_slice %168 {offsets = [0, 512], sizes = [4, 256], strides = [1, 1]} : vector<4x1024xf32> to vector<4x256xf32>
    %219 = vector.shape_cast %218 : vector<4x256xf32> to vector<1x4x256xf32>
    %cst_97 = arith.constant dense<0.000000e+00> : vector<1xf32>
    %220 = vector.multi_reduction <add>, %219, %cst_97 [1, 2] : vector<1x4x256xf32> to vector<1xf32>
    %221 = vector.shape_cast %220 : vector<1xf32> to vector<1x1x1xf32>
    %222 = vector.extract %221[0, 0, 0] : f32 from vector<1x1x1xf32>
    %223 = vector.extract_strided_slice %169 {offsets = [0, 512], sizes = [4, 256], strides = [1, 1]} : vector<4x1024xf32> to vector<4x256xf32>
    %224 = vector.shape_cast %223 : vector<4x256xf32> to vector<1x4x256xf32>
    %cst_98 = arith.constant dense<0.000000e+00> : vector<1xf32>
    %225 = vector.multi_reduction <add>, %224, %cst_98 [1, 2] : vector<1x4x256xf32> to vector<1xf32>
    %226 = vector.shape_cast %225 : vector<1xf32> to vector<1x1x1xf32>
    %227 = vector.extract %226[0, 0, 0] : f32 from vector<1x1x1xf32>
    %cst_99 = arith.constant 9.765625E-4 : f32
    %228 = arith.mulf %222, %cst_99 : f32
    %cst_100 = arith.constant 9.765625E-4 : f32
    %229 = arith.mulf %227, %cst_100 : f32
    %230 = arith.mulf %228, %228 : f32
    %231 = arith.subf %229, %230 : f32
    %cst_101 = arith.constant 9.99999974E-6 : f32
    %232 = arith.addf %231, %cst_101 : f32
    %233 = math.rsqrt %232 : f32
    %234 = vector.extract_strided_slice %134 {offsets = [0, 512], sizes = [4, 256], strides = [1, 1]} : vector<4x1024xf32> to vector<4x256xf32>
    %235 = vector.broadcast %228 : f32 to vector<4x256xf32>
    %236 = arith.subf %218, %235 : vector<4x256xf32>
    %237 = vector.broadcast %233 : f32 to vector<4x256xf32>
    %238 = arith.mulf %236, %237 : vector<4x256xf32>
    %239 = arith.mulf %238, %137 : vector<4x256xf32>
    %240 = arith.addf %234, %239 : vector<4x256xf32>
    %241 = arith.addf %240, %138 : vector<4x256xf32>
    %242 = vector.extract_strided_slice %168 {offsets = [0, 768], sizes = [4, 256], strides = [1, 1]} : vector<4x1024xf32> to vector<4x256xf32>
    %243 = vector.shape_cast %242 : vector<4x256xf32> to vector<1x4x256xf32>
    %cst_102 = arith.constant dense<0.000000e+00> : vector<1xf32>
    %244 = vector.multi_reduction <add>, %243, %cst_102 [1, 2] : vector<1x4x256xf32> to vector<1xf32>
    %245 = vector.shape_cast %244 : vector<1xf32> to vector<1x1x1xf32>
    %246 = vector.extract %245[0, 0, 0] : f32 from vector<1x1x1xf32>
    %247 = vector.extract_strided_slice %169 {offsets = [0, 768], sizes = [4, 256], strides = [1, 1]} : vector<4x1024xf32> to vector<4x256xf32>
    %248 = vector.shape_cast %247 : vector<4x256xf32> to vector<1x4x256xf32>
    %cst_103 = arith.constant dense<0.000000e+00> : vector<1xf32>
    %249 = vector.multi_reduction <add>, %248, %cst_103 [1, 2] : vector<1x4x256xf32> to vector<1xf32>
    %250 = vector.shape_cast %249 : vector<1xf32> to vector<1x1x1xf32>
    %251 = vector.extract %250[0, 0, 0] : f32 from vector<1x1x1xf32>
    %cst_104 = arith.constant 9.765625E-4 : f32
    %252 = arith.mulf %246, %cst_104 : f32
    %cst_105 = arith.constant 9.765625E-4 : f32
    %253 = arith.mulf %251, %cst_105 : f32
    %254 = arith.mulf %252, %252 : f32
    %255 = arith.subf %253, %254 : f32
    %cst_106 = arith.constant 9.99999974E-6 : f32
    %256 = arith.addf %255, %cst_106 : f32
    %257 = math.rsqrt %256 : f32
    %258 = vector.extract_strided_slice %134 {offsets = [0, 768], sizes = [4, 256], strides = [1, 1]} : vector<4x1024xf32> to vector<4x256xf32>
    %259 = vector.broadcast %252 : f32 to vector<4x256xf32>
    %260 = arith.subf %242, %259 : vector<4x256xf32>
    %261 = vector.broadcast %257 : f32 to vector<4x256xf32>
    %262 = arith.mulf %260, %261 : vector<4x256xf32>
    %263 = arith.mulf %262, %137 : vector<4x256xf32>
    %264 = arith.addf %258, %263 : vector<4x256xf32>
    %265 = arith.addf %264, %138 : vector<4x256xf32>
    %266 = tpu.concatenate %193, %217, %241, %265 in 1 : vector<4x256xf32>, vector<4x256xf32>, vector<4x256xf32>, vector<4x256xf32> -> vector<4x1024xf32>
    %c0_107 = arith.constant 0 : index
    %c0_108 = arith.constant 0 : index
    %c0_109 = arith.constant 0 : index
    %267 = vector.load %arg11[%c0_107, %c0_108, %c0_109] : memref<1x4x1024xf32, #tpu.memory_space<vmem>>, vector<1x4x1024xf32>
    %268 = vector.shape_cast %267 : vector<1x4x1024xf32> to vector<4x1024xf32>
    %269 = vector.shape_cast %266 : vector<4x1024xf32> to vector<1x4x1024xf32>
    tpu.vector_store %arg11[%c0_107, %c0_108, %c0_109], %269 {strides = array<i32>} : memref<1x4x1024xf32, #tpu.memory_space<vmem>>, vector<1x4x1024xf32>,
    return
  }
  func.func @transform_0(%arg0: i32) -> (i32, i32, i32) {
    %c0_i32 = arith.constant 0 : i32
    %c0_i32_0 = arith.constant 0 : i32
    %c0_i32_1 = arith.constant 0 : i32
    return %arg0, %c0_i32, %c0_i32_0 : i32, i32, i32
  }
  func.func @transform_1(%arg0: i32) -> (i32, i32) {
    %c0_i32 = arith.constant 0 : i32
    %c0_i32_0 = arith.constant 0 : i32
    %c0_i32_1 = arith.constant 0 : i32
    return %c0_i32, %c0_i32_0 : i32, i32
  }
  func.func @transform_2(%arg0: i32) -> (i32, i32) {
    %c0_i32 = arith.constant 0 : i32
    %c0_i32_0 = arith.constant 0 : i32
    %c0_i32_1 = arith.constant 0 : i32
    return %c0_i32, %c0_i32_0 : i32, i32
  }
  func.func @transform_3(%arg0: i32) -> (i32, i32) {
    %c0_i32 = arith.constant 0 : i32
    %c0_i32_0 = arith.constant 0 : i32
    %c0_i32_1 = arith.constant 0 : i32
    return %c0_i32, %c0_i32_0 : i32, i32
  }
  func.func @transform_4(%arg0: i32) -> (i32, i32) {
    %c0_i32 = arith.constant 0 : i32
    %c0_i32_0 = arith.constant 0 : i32
    %c0_i32_1 = arith.constant 0 : i32
    return %c0_i32, %c0_i32_0 : i32, i32
  }
  func.func @transform_5(%arg0: i32) -> (i32, i32) {
    %c0_i32 = arith.constant 0 : i32
    %c0_i32_0 = arith.constant 0 : i32
    %c0_i32_1 = arith.constant 0 : i32
    return %c0_i32, %c0_i32_0 : i32, i32
  }
  func.func @transform_6(%arg0: i32) -> (i32, i32) {
    %c0_i32 = arith.constant 0 : i32
    %c0_i32_0 = arith.constant 0 : i32
    %c0_i32_1 = arith.constant 0 : i32
    return %c0_i32, %c0_i32_0 : i32, i32
  }
  func.func @transform_7(%arg0: i32) -> (i32, i32) {
    %c0_i32 = arith.constant 0 : i32
    %c0_i32_0 = arith.constant 0 : i32
    %c0_i32_1 = arith.constant 0 : i32
    return %c0_i32, %c0_i32_0 : i32, i32
  }
  func.func @transform_8(%arg0: i32) -> (i32, i32) {
    %c0_i32 = arith.constant 0 : i32
    %c0_i32_0 = arith.constant 0 : i32
    %c0_i32_1 = arith.constant 0 : i32
    return %c0_i32, %c0_i32_0 : i32, i32
  }
  func.func @transform_9(%arg0: i32) -> (i32, i32) {
    %c0_i32 = arith.constant 0 : i32
    %c0_i32_0 = arith.constant 0 : i32
    %c0_i32_1 = arith.constant 0 : i32
    return %c0_i32, %c0_i32_0 : i32, i32
  }
  func.func @transform_10(%arg0: i32) -> (i32, i32, i32) {
    %c0_i32 = arith.constant 0 : i32
    %c0_i32_0 = arith.constant 0 : i32
    %c0_i32_1 = arith.constant 0 : i32
    return %arg0, %c0_i32, %c0_i32_0 : i32, i32, i32
  }
}

</mosaic_0001>

<bundles_post_ra>
// kernel: tpu_custom_call.1
= control target key start
LH: loop header
LB: loop body
LE: loop exit
PB: predicated region body
PF: predicated region fallthrough
CT: control target
= control target key end

     0   :  { %15 = vsyncpa [#allocation4], 0  ;;  %s3817_s0 = inlined_call_operand.hbm [shape: f32[1,4,1024], index: 0, kind: input, shape index: {}]   ;;  %s3818_s1 = inlined_call_operand.hbm [shape: f32[36,1024], index: 1, kind: input, shape index: {}]   ;;  %s3819_s2 = inlined_call_operand.hbm [shape: f32[4,36], index: 2, kind: input, shape index: {}]   ;;  %s3820_s3 = inlined_call_operand.vmem [shape: f32[4,1], index: 3, kind: input, shape index: {}]   ;;  %s3821_s4 = inlined_call_operand.vmem [shape: f32[4,256], index: 4, kind: input, shape index: {}]   ;;  %s3822_s5 = inlined_call_operand.vmem [shape: f32[4,256], index: 5, kind: input, shape index: {}]   ;;  %s3823_s6 = inlined_call_operand.hbm [shape: f32[4,36], index: 6, kind: input, shape index: {}]   ;;  %s3824_s7 = inlined_call_operand.vmem [shape: f32[4,1], index: 7, kind: input, shape index: {}]   ;;  %s3825_s8 = inlined_call_operand.vmem [shape: f32[4,256], index: 8, kind: input, shape index: {}]   ;;  %s3826_s9 = inlined_call_operand.vmem [shape: f32[4,256], index: 9, kind: input, shape index: {}]   ;;  %s3827_s10 = inlined_call_operand.hbm [shape: f32[1,4,1024], index: 10, kind: output, shape index: {}]  }
   0x1   :  { %16 = vsyncpa [#allocation7], 0 }
   0x2   :  { %17 = vsyncpa [#allocation10], 0 }
   0x3   :  { %18 = vsyncpa [#allocation5], 0  ;;  %s2554_s13 = smov [#allocation6]   ;;  %s2436_s17 = scalar_lea.hbm %s3818_s1, 5120 }
   0x4   :  { %s34_s14 = sshll.u32 %s2554_s13, 4  ;;  %p2437_p0 = scmp.ne.s32.totalorder %s3818_s1, %s2436_s17  ;;  %s35_s14 = int_to_ptr.vmem [resolvable:$true] %s34_s14 }
   0x5   :  { %p2440_p1 = scmp.lt.u32.totalorder %s2436_s17, %s3818_s1 }
   0x7   :  { %p2442_p2 = pnand %p2440_p1, %p2437_p0 }
   0x9   :  { %2445 = shalt.err (!%p2442_p2)
}
   0xa   :  { %s2446_s22 = scalar_lea.vmem %s35_s14, 5120  ;;  %p2451_p4 = scmp.lt.s32.totalorder %s35_s14, %s35_s14 }
   0xb   :  { %p2447_p3 = scmp.ne.s32.totalorder %s35_s14, %s2446_s22  ;;  %p2452_p5 = scmp.lt.s32.totalorder %s2446_s22, %s2446_s22 }
   0xd   :  { %p2453_p6 = por %p2452_p5, %p2451_p4 }
   0xf   :  { %p2454_p7 = pnand %p2453_p6, %p2447_p3 }
  0x11   :  { %2457 = shalt.err (!%p2454_p7)
}
  0x12   :  { %s2555_s23 = smov 1024   ;;  %s2556_s24 = smov 64  }
  0x13   :  { %40 = dma.hbm_to_vmem [thread:$0]  %s3818_s1, 5120, %s35_s14, [#allocation7], %s2555_s23, %s2555_s23, %s2556_s24  }
  0x14   :  { %s2557_s27 = smov [#allocation3]   ;;  %s2558_s29 = smov [#allocation8]  }
  0x15   :  { %s25_s28 = sshll.u32 %s2557_s27, 4  ;;  %s47_s30 = sshll.u32 %s2558_s29, 4  ;;  %s26_s28 = int_to_ptr.vmem [resolvable:$true] %s25_s28  ;;  %s48_s30 = int_to_ptr.vmem [resolvable:$true] %s47_s30 }
  0x16   :  { %s2458_s13 = scalar_lea.hbm %s3817_s0, 512 }
  0x17   :  { %p2459_p8 = scmp.ne.s32.totalorder %s3817_s0, %s2458_s13  ;;  %p2462_p9 = scmp.lt.u32.totalorder %s2458_s13, %s3817_s0 }
  0x19   :  { %p2464_p10 = pnand %p2462_p9, %p2459_p8 }
  0x1b   :  { %2467 = shalt.err (!%p2464_p10)
}
  0x1c   :  { %s2468_s1 = scalar_lea.vmem %s26_s28, 512  ;;  %p2473_p12 = scmp.lt.s32.totalorder %s26_s28, %s26_s28 }
  0x1d   :  { %p2469_p11 = scmp.ne.s32.totalorder %s26_s28, %s2468_s1  ;;  %p2474_p13 = scmp.lt.s32.totalorder %s2468_s1, %s2468_s1 }
  0x1f   :  { %p2475_p0 = por %p2474_p13, %p2473_p12 }
  0x21   :  { %p2476_p1 = pnand %p2475_p0, %p2469_p11 }
  0x23   :  { %2479 = shalt.err (!%p2476_p1)
}
  0x24   :  { %28 = dma.hbm_to_vmem [thread:$0]  %s3817_s0, 512, %s26_s28, [#allocation4]  }
  0x25   :  { %s2480_s22 = scalar_lea.hbm %s3819_s2, 64 }
  0x26   :  { %p2481_p2 = scmp.ne.s32.totalorder %s3819_s2, %s2480_s22  ;;  %p2484_p3 = scmp.lt.u32.totalorder %s2480_s22, %s3819_s2 }
  0x28   :  { %p2486_p4 = pnand %p2484_p3, %p2481_p2 }
  0x2a   :  { %2489 = shalt.err (!%p2486_p4)
}
  0x2b   :  { %s2490_s27 = scalar_lea.vmem %s48_s30, 64  ;;  %p2495_p6 = scmp.lt.s32.totalorder %s48_s30, %s48_s30 }
  0x2c   :  { %p2491_p5 = scmp.ne.s32.totalorder %s48_s30, %s2490_s27  ;;  %p2496_p7 = scmp.lt.s32.totalorder %s2490_s27, %s2490_s27 }
  0x2e   :  { %p2497_p8 = por %p2496_p7, %p2495_p6 }
  0x30   :  { %p2498_p9 = pnand %p2497_p8, %p2491_p5 }
  0x32   :  { %2501 = shalt.err (!%p2498_p9)
}
  0x33   :  { %50 = dma.hbm_to_vmem [thread:$0]  %s3819_s2, 64, %s48_s30, [#allocation7]  }
  0x34   :  { %s2559_s29 = smov [#allocation9]   ;;  %s2502_s15 = scalar_lea.hbm %s3823_s6, 64 }
  0x35   :  { %s63_s11 = sshll.u32 %s2559_s29, 4  ;;  %p2503_p10 = scmp.ne.s32.totalorder %s3823_s6, %s2502_s15  ;;  %s64_s11 = int_to_ptr.vmem [resolvable:$true] %s63_s11 }
  0x36   :  { %p2506_p11 = scmp.lt.u32.totalorder %s2502_s15, %s3823_s6 }
  0x38   :  { %p2508_p12 = pnand %p2506_p11, %p2503_p10 }
  0x3a   :  { %2511 = shalt.err (!%p2508_p12)
}
  0x3b   :  { %s2512_s14 = scalar_lea.vmem %s64_s11, 64  ;;  %p2517_p0 = scmp.lt.s32.totalorder %s64_s11, %s64_s11 }
  0x3c   :  { %p2513_p13 = scmp.ne.s32.totalorder %s64_s11, %s2512_s14  ;;  %p2518_p1 = scmp.lt.s32.totalorder %s2512_s14, %s2512_s14 }
  0x3e   :  { %p2519_p2 = por %p2518_p1, %p2517_p0 }
  0x40   :  { %p2520_p3 = pnand %p2519_p2, %p2513_p13 }
  0x42   :  { %2523 = shalt.err (!%p2520_p3)
}
  0x43   :  { %66 = dma.hbm_to_vmem [thread:$0]  %s3823_s6, 64, %s64_s11, [#allocation10]  }
  0x44   :  { %2546 = dma.done.wait [#allocation4], 512  }
  0x45   :  { %2547 = vsyncadd [#allocation4], 4294966784 }
  0x46   :  { %2548 = dma.done.wait [#allocation7], 5184  }
  0x47   :  { %2549 = vsyncadd [#allocation7], 4294962112 }
  0x48   :  { %2550 = dma.done.wait [#allocation10], 64  }
  0x49   :  { %2551 = vsyncadd [#allocation10], 4294967232  ;;  %v2674_v0 = vld [vmem:[#allocation3] sm:$0xff]  ;;  %v2676_v1 = vld [vmem:[#allocation3 + $0x18] sm:$0xff]  ;;  %s2560_s19 = smov 1   ;;  %s2561_s20 = smov 16   ;;  %v161_v9 = vlaneseq }
  0x4a   :  { %v2678_v2 = vld [vmem:[#allocation3 + $0x8] sm:$0xff]  ;;  %270 = vrot.lane.b32.xlu1 %v2674_v0, %s2560_s19  ;;  %327 = vst [vmem:[#allocation2 + $0x80] sm:$0xf] %v2674_v0  ;;  %180 = vrot.lane.b32.xlu0 %v2674_v0, %s2561_s20  ;;  %v137_v3 = vcombine.high %v2674_v0, %v2674_v0  ;;  %v2689_v4 = vcombine.high %v2676_v1, %v2676_v1  ;;  %333 = vst [vmem:[#allocation2 + $0xb0] sm:$0xf] %v2676_v1  ;;  %v2695_v6 = vld [vmem:[#allocation3 + $0x10] sm:$0xff] }
  0x4b   :  { %329 = vst [vmem:[#allocation2 + $0x90] sm:$0xf] %v2678_v2  ;;  %v138_v5 = vcombine.high %v2678_v2, %v2678_v2  ;;  %331 = vst [vmem:[#allocation2 + $0xa0] sm:$0xf] %v2695_v6  ;;  %v2700_v7 = vcombine.high %v2695_v6, %v2695_v6  ;;  %s2562_s6 = smov 17   ;;  %s2563_s21 = smov 15  }
  0x4c   :  { %328 = vst [vmem:[#allocation2 + $0x88] sm:$0xf] %v137_v3  ;;  %334 = vst [vmem:[#allocation2 + $0xb8] sm:$0xf] %v2689_v4  ;;  %s2564_s22 = smov 127   ;;  %s2565_s23 = smov 112  }
  0x4d   :  { %330 = vst [vmem:[#allocation2 + $0x98] sm:$0xf] %v138_v5  ;;  %332 = vst [vmem:[#allocation2 + $0xa8] sm:$0xf] %v2700_v7  ;;  %s2566_s24 = smov 113   ;;  %s2567_s25 = smov 111  }
  0x4e   :  { %272 = vrot.lane.b32.xlu1 %v137_v3, %s2560_s19  ;;  %182 = vrot.lane.b32.xlu0 %v137_v3, %s2561_s20  ;;  %v2568_v8 = vmov 0.0   ;;  %v2802_v10 = vand.u32 127, %v161_v9  ;;  %v130_v27 = vld [vmem:[%s3820_s3] sm:$0xf]  ;;  %v2569_v29 = vmov 0   ;;  %v90_v37 = vld [vmem:[#allocation6 + $0x8] sm:$0xff] }
  0x4f   :  { %693 = vmatprep.mubr.f32.mxu0 %v2568_v8  ;;  %764 = vmatprep.mubr.f32.mxu1 %v2568_v8  ;;  %v98_v38 = vld [vmem:[#allocation6 + $0x48] sm:$0xff]  ;;  %v89_v47 = vld [vmem:[#allocation6] sm:$0xff]  ;;  %vm604_vm8 = vcmask 1043456   ;;  %vm600_vm9 = vcmask 293888  }
  0x50   :  { %vm286_vm0 = vcmp.lt.s32.totalorder %v2802_v10, 1  ;;  %vm196_vm1 = vcmp.lt.s32.totalorder %v2802_v10, 16  ;;  %vm163_vm2 = vcmp.lt.s32.totalorder %v2802_v10, 17  ;;  %2340 = vset.pattern.permute.xlu0 %v2569_v29  ;;  %vm253_vm3 = vcmp.lt.s32.totalorder %v2802_v10, 15  ;;  %v97_v48 = vld [vmem:[#allocation6 + $0x40] sm:$0xff] }
  0x51   :  { %vm351_vm4 = vcmp.lt.s32.totalorder %v2802_v10, 127  ;;  %vm441_vm5 = vcmp.lt.s32.totalorder %v2802_v10, 112  ;;  %vm408_vm6 = vcmp.lt.s32.totalorder %v2802_v10, 113  ;;  %vm498_vm7 = vcmp.lt.s32.totalorder %v2802_v10, 111  ;;  %v113_v29 = vld [vmem:[#allocation6 + $0xc0] sm:$0xff] }
  0x52   :  { %284 = vrot.lane.b32.xlu1 %v2689_v4, %s2560_s19  ;;  %194 = vrot.lane.b32.xlu0 %v2689_v4, %s2561_s20 }
  0x56   :  { %147 = vrot.lane.b32.xlu1 %v137_v3, %s2562_s6  ;;  %145 = vrot.lane.b32.xlu0 %v2674_v0, %s2562_s6 }
  0x5a   :  { %239 = vrot.lane.b32.xlu1 %v137_v3, %s2563_s21  ;;  %237 = vrot.lane.b32.xlu0 %v2674_v0, %s2563_s21 }
  0x5e   :  { %251 = vrot.lane.b32.xlu1 %v2689_v4, %s2563_s21  ;;  %159 = vrot.lane.b32.xlu0 %v2689_v4, %s2562_s6 }
  0x62   :  { %339 = vrot.lane.b32.xlu1 %v2678_v2, %s2564_s22  ;;  %337 = vrot.lane.b32.xlu0 %v137_v3, %s2564_s22 }
  0x66   :  { %429 = vrot.lane.b32.xlu1 %v2678_v2, %s2565_s23  ;;  %427 = vrot.lane.b32.xlu0 %v137_v3, %s2565_s23 }
  0x6a   :  { %425 = vrot.lane.b32.xlu1 %v2674_v0, %s2565_s23  ;;  %335 = vrot.lane.b32.xlu0 %v2674_v0, %s2564_s22 }
  0x6e   :  { %396 = vrot.lane.b32.xlu1 %v2678_v2, %s2566_s24  ;;  %394 = vrot.lane.b32.xlu0 %v137_v3, %s2566_s24 }
  0x72   :  { %484 = vrot.lane.b32.xlu1 %v137_v3, %s2567_s25  ;;  %392 = vrot.lane.b32.xlu0 %v2674_v0, %s2566_s24 }
  0x76   :  { %482 = vrot.lane.b32.xlu1 %v2674_v0, %s2567_s25  ;;  %486 = vrot.lane.b32.xlu0 %v2678_v2, %s2567_s25 }
  0x7a   :  { %186 = vrot.lane.b32.xlu1 %v138_v5, %s2561_s20  ;;  %184 = vrot.lane.b32.xlu0 %v2678_v2, %s2561_s20 }
  0x7e   :  { %276 = vrot.lane.b32.xlu1 %v138_v5, %s2560_s19  ;;  %274 = vrot.lane.b32.xlu0 %v2678_v2, %s2560_s19 }
  0x82   :  { %151 = vrot.lane.b32.xlu1 %v138_v5, %s2562_s6  ;;  %149 = vrot.lane.b32.xlu0 %v2678_v2, %s2562_s6 }
  0x86   :  { %243 = vrot.lane.b32.xlu1 %v138_v5, %s2563_s21  ;;  %241 = vrot.lane.b32.xlu0 %v2678_v2, %s2563_s21 }
  0x8a   :  { %343 = vrot.lane.b32.xlu1 %v2695_v6, %s2564_s22  ;;  %341 = vrot.lane.b32.xlu0 %v138_v5, %s2564_s22 }
  0x8e   :  { %433 = vrot.lane.b32.xlu1 %v2695_v6, %s2565_s23  ;;  %431 = vrot.lane.b32.xlu0 %v138_v5, %s2565_s23 }
  0x92   :  { %400 = vrot.lane.b32.xlu1 %v2695_v6, %s2566_s24  ;;  %398 = vrot.lane.b32.xlu0 %v138_v5, %s2566_s24 }
  0x96   :  { %490 = vrot.lane.b32.xlu1 %v2695_v6, %s2567_s25  ;;  %488 = vrot.lane.b32.xlu0 %v138_v5, %s2567_s25 }
  0x9a   :  { %190 = vrot.lane.b32.xlu1 %v2700_v7, %s2561_s20  ;;  %188 = vrot.lane.b32.xlu0 %v2695_v6, %s2561_s20 }
  0x9e   :  { %280 = vrot.lane.b32.xlu1 %v2700_v7, %s2560_s19  ;;  %278 = vrot.lane.b32.xlu0 %v2695_v6, %s2560_s19 }
  0xa2   :  { %155 = vrot.lane.b32.xlu1 %v2700_v7, %s2562_s6  ;;  %153 = vrot.lane.b32.xlu0 %v2695_v6, %s2562_s6 }
  0xa6   :  { %247 = vrot.lane.b32.xlu1 %v2700_v7, %s2563_s21  ;;  %245 = vrot.lane.b32.xlu0 %v2695_v6, %s2563_s21 }
  0xaa   :  { %347 = vrot.lane.b32.xlu1 %v2676_v1, %s2564_s22  ;;  %345 = vrot.lane.b32.xlu0 %v2700_v7, %s2564_s22 }
  0xae   :  { %437 = vrot.lane.b32.xlu1 %v2676_v1, %s2565_s23  ;;  %435 = vrot.lane.b32.xlu0 %v2700_v7, %s2565_s23 }
  0xb2   :  { %404 = vrot.lane.b32.xlu1 %v2676_v1, %s2566_s24  ;;  %402 = vrot.lane.b32.xlu0 %v2700_v7, %s2566_s24 }
  0xb6   :  { %494 = vrot.lane.b32.xlu1 %v2676_v1, %s2567_s25  ;;  %492 = vrot.lane.b32.xlu0 %v2700_v7, %s2567_s25 }
  0xba   :  { %282 = vrot.lane.b32.xlu1 %v2676_v1, %s2560_s19  ;;  %192 = vrot.lane.b32.xlu0 %v2676_v1, %s2561_s20 }
  0xbc   :  { %v271_v11 = vpop.permute.xlu1 %270  ;;  %v181_v12 = vpop.permute.xlu0 %180 }
  0xbe   :  { %249 = vrot.lane.b32.xlu1 %v2676_v1, %s2563_s21  ;;  %157 = vrot.lane.b32.xlu0 %v2676_v1, %s2562_s6 }
  0xc0   :  { %v2810_v13 = vpop.permute.xlu1 %272  ;;  %v2812_v14 = vpop.permute.xlu0 %182 }
  0xc1   :  { %v293_v15 = vsel %vm286_vm0, %v271_v11, %v2810_v13  ;;  %v203_v16 = vsel %vm196_vm1, %v181_v12, %v2812_v14 }
  0xc2   :  { %v304_v17 = vrot.slane %v293_v15, 4  ;;  %v214_v18 = vrot.slane %v203_v16, 4  ;;  %439 = vrot.lane.b32.xlu1 %v2689_v4, %s2565_s23  ;;  %349 = vrot.lane.b32.xlu0 %v2689_v4, %s2564_s22  ;;  %v106_v15 = vld [vmem:[#allocation6 + $0x88] sm:$0xff] }
  0xc3   :  { %v114_v16 = vld [vmem:[#allocation6 + $0xc8] sm:$0xff] }
  0xc4   :  { %320 = vst [vmem:[#allocation2 + $0x48] sm:$0xf0] %v304_v17  ;;  %230 = vst [vmem:[#allocation2 + $0x8] sm:$0xf0] %v214_v18  ;;  %v2824_v19 = vpop.permute.xlu1 %284  ;;  %v2826_v20 = vpop.permute.xlu0 %194 }
  0xc5   :  { %v294_v21 = vsel %vm286_vm0, %v2824_v19, %v271_v11  ;;  %v204_v22 = vsel %vm196_vm1, %v2826_v20, %v181_v12 }
  0xc6   :  { %v303_v23 = vrot.slane %v294_v21, 4  ;;  %v213_v24 = vrot.slane %v204_v22, 4  ;;  %496 = vrot.lane.b32.xlu1 %v2689_v4, %s2567_s25  ;;  %406 = vrot.lane.b32.xlu0 %v2689_v4, %s2566_s24 }
  0xc8   :  { %319 = vst [vmem:[#allocation2 + $0x40] sm:$0xf0] %v303_v23  ;;  %229 = vst [vmem:[#allocation2] sm:$0xf0] %v213_v24  ;;  %v2839_v25 = vpop.permute.xlu1 %147  ;;  %v146_v26 = vpop.permute.xlu0 %145 }
  0xc9   :  { %v170_v28 = vsel %vm163_vm2, %v146_v26, %v2839_v25 }
  0xca   :  { %173 = vst [vmem:[#allocation2 + $0x8] sm:$0xf] %v170_v28  ;;  %597 = vperm.xlu0 %2340, %v130_v27   ;;  %v105_v28 = vld [vmem:[#allocation6 + $0x80] sm:$0xff] }
  0xcc   :  { %v2848_v30 = vpop.permute.xlu1 %239  ;;  %v238_v31 = vpop.permute.xlu0 %237 }
  0xcd   :  { %v260_v32 = vsel %vm253_vm3, %v238_v31, %v2848_v30 }
  0xce   :  { %263 = vst [vmem:[#allocation2 + $0x48] sm:$0xf] %v260_v32 }
  0xd0   :  { %v2853_v33 = vpop.permute.xlu1 %251  ;;  %v2855_v34 = vpop.permute.xlu0 %159 }
  0xd1   :  { %v261_v35 = vsel %vm253_vm3, %v2853_v33, %v238_v31  ;;  %v171_v36 = vsel %vm163_vm2, %v2855_v34, %v146_v26  ;;  %v516_v39 = vld [vmem:[#allocation2 + $0x8] sm:$0xff] }
  0xd2   :  { %262 = vst [vmem:[#allocation2 + $0x40] sm:$0xf] %v261_v35  ;;  %172 = vst [vmem:[#allocation2] sm:$0xf] %v171_v36  ;;  %v556_v45 = vmul.f32 %v516_v39, %v90_v37 }
  0xd4   :  { %v2864_v40 = vpop.permute.xlu1 %339  ;;  %v338_v41 = vpop.permute.xlu0 %337 }
  0xd5   :  { %v357_v42 = vsel %vm351_vm4, %v338_v41, %v2864_v40  ;;  %v524_v43 = vld [vmem:[#allocation2 + $0x48] sm:$0xff] }
  0xd6   :  { %v369_v44 = vrot.slane %v357_v42, 4  ;;  %v564_v46 = vmul.f32 %v524_v43, %v98_v38 }
  0xd8   :  { %385 = vst [vmem:[#allocation2 + $0x88] sm:$0xf0] %v369_v44  ;;  %v2870_v49 = vpop.permute.xlu1 %429  ;;  %v428_v50 = vpop.permute.xlu0 %427  ;;  %v2211_v51 = vpack.c.bf16 %v564_v46, %v556_v45  ;;  %v122_v45 = vld [vmem:[#allocation6 + $0x108] sm:$0xf] }
  0xd9   :  { %v447_v52 = vsel %vm441_vm5, %v428_v50, %v2870_v49  ;;  %v515_v53 = vld [vmem:[#allocation2] sm:$0xff] }
  0xda   :  { %v523_v54 = vld [vmem:[#allocation2 + $0x40] sm:$0xff]  ;;  %v459_v55 = vrot.slane %v447_v52, 4  ;;  %2212 = vmatprep.subr.bf16.mxu0 %v2211_v51  ;;  %v555_v56 = vmul.f32 %v515_v53, %v89_v47 }
  0xdb   :  { %v563_v57 = vmul.f32 %v523_v54, %v97_v48 }
  0xdc   :  { %475 = vst [vmem:[#allocation2 + $0xc8] sm:$0xf0] %v459_v55  ;;  %v2875_v58 = vpop.permute.xlu1 %425  ;;  %v2877_v59 = vpop.permute.xlu0 %335 }
  0xdd   :  { %v2213_v60 = vpack.c.bf16 %v563_v57, %v555_v56  ;;  %v448_v61 = vsel %vm441_vm5, %v2875_v58, %v428_v50  ;;  %v358_v62 = vsel %vm351_vm4, %v2877_v59, %v338_v41  ;;  %v121_v50 = vld [vmem:[#allocation6 + $0x100] sm:$0xf] }
  0xde   :  { %v458_v63 = vrot.slane %v448_v61, 4  ;;  %v368_v3 = vrot.slane %v358_v62, 4  ;;  %v2926_v62 = vld [vmem:[#allocation8] sm:$0xf] }
  0xdf   :  { %2214 = vmatpush1.bf16.msra.mxu0 %v2213_v60  ;;  %v532_v17 = vld [vmem:[#allocation2 + $0x88] sm:$0xff] }
  0xe0   :  { %474 = vst [vmem:[#allocation2 + $0xc0] sm:$0xf0] %v458_v63  ;;  %384 = vst [vmem:[#allocation2 + $0x80] sm:$0xf0] %v368_v3  ;;  %v2886_v4 = vpop.permute.xlu1 %396  ;;  %v395_v5 = vpop.permute.xlu0 %394  ;;  %v572_v26 = vmul.f32 %v532_v17, %v106_v15  ;;  %v92_v17 = vld [vmem:[#allocation6 + $0x18] sm:$0xff] }
  0xe1   :  { %v414_v7 = vsel %vm408_vm6, %v395_v5, %v2886_v4 }
  0xe2   :  { %418 = vst [vmem:[#allocation2 + $0xc8] sm:$0xf] %v414_v7 }
  0xe4   :  { %v485_v9 = vpop.permute.xlu1 %484  ;;  %v2891_v11 = vpop.permute.xlu0 %392 }
  0xe5   :  { %v415_v12 = vsel %vm408_vm6, %v2891_v11, %v395_v5 }
  0xe6   :  { %417 = vst [vmem:[#allocation2 + $0xc0] sm:$0xf] %v415_v12 }
  0xe7   :  { %v531_v31 = vld [vmem:[#allocation2 + $0x80] sm:$0xff] }
  0xe8   :  { %v2897_v18 = vpop.permute.xlu1 %482  ;;  %v2899_v21 = vpop.permute.xlu0 %486  ;;  %v571_v43 = vmul.f32 %v531_v31, %v105_v28  ;;  %v99_v28 = vld [vmem:[#allocation6 + $0x50] sm:$0xff] }
  0xe9   :  { %v505_v22 = vsel %vm498_vm7, %v2897_v18, %v485_v9  ;;  %v504_v23 = vsel %vm498_vm7, %v485_v9, %v2899_v21  ;;  %v540_v24 = vld [vmem:[#allocation2 + $0xc8] sm:$0xff] }
  0xea   :  { %507 = vst [vmem:[#allocation2 + $0x100] sm:$0xf] %v505_v22  ;;  %508 = vst [vmem:[#allocation2 + $0x108] sm:$0xf] %v504_v23  ;;  %v580_v27 = vmul.f32 %v540_v24, %v114_v16 }
  0xec   :  { %v2907_v32 = vpop.permute.xlu1 %186  ;;  %v185_v35 = vpop.permute.xlu0 %184  ;;  %v2215_v36 = vpack.c.bf16 %v580_v27, %v572_v26  ;;  %v91_v26 = vld [vmem:[#allocation6 + $0x10] sm:$0xff] }
  0xed   :  { %v201_v37 = vsel %vm196_vm1, %v185_v35, %v2907_v32  ;;  %v202_v38 = vsel %vm196_vm1, %v2812_v14, %v185_v35  ;;  %v539_v39 = vld [vmem:[#allocation2 + $0xc0] sm:$0xff] }
  0xee   :  { %v215_v41 = vrot.slane %v202_v38, 4  ;;  %v216_v42 = vrot.slane %v201_v37, 4  ;;  %2216 = vmatprep.subr.bf16.mxu0 %v2215_v36  ;;  %v579_v44 = vmul.f32 %v539_v39, %v113_v29 }
  0xf0   :  { %231 = vst [vmem:[#allocation2 + $0x10] sm:$0xf0] %v215_v41  ;;  %232 = vst [vmem:[#allocation2 + $0x18] sm:$0xf0] %v216_v42  ;;  %v2915_v46 = vpop.permute.xlu1 %276  ;;  %v275_v47 = vpop.permute.xlu0 %274  ;;  %v2217_v48 = vpack.c.bf16 %v579_v44, %v571_v43 }
  0xf1   :  { %v291_v51 = vsel %vm286_vm0, %v275_v47, %v2915_v46  ;;  %v292_v14 = vsel %vm286_vm0, %v2810_v13, %v275_v47  ;;  %v548_v52 = vld [vmem:[#allocation2 + $0x108] sm:$0xf]  ;;  %v547_v53 = vld [vmem:[#allocation2 + $0x100] sm:$0xf] }
  0xf2   :  { %v305_v54 = vrot.slane %v292_v14, 4  ;;  %v306_v55 = vrot.slane %v291_v51, 4  ;;  %2218 = vmatpush1.bf16.msra.mxu0 %v2217_v48  ;;  %v588_v56 = vmul.f32 %v548_v52, %v122_v45  ;;  %v587_v61 = vmul.f32 %v547_v53, %v121_v50 }
  0xf4   :  { %321 = vst [vmem:[#allocation2 + $0x50] sm:$0xf0] %v305_v54  ;;  %322 = vst [vmem:[#allocation2 + $0x58] sm:$0xf0] %v306_v55  ;;  %v2923_v57 = vpop.permute.xlu1 %151  ;;  %v150_v60 = vpop.permute.xlu0 %149  ;;  %2187 = vmatprep.subr.msk.mxu0 %vm604_vm8, %v588_v56  ;;  %v108_v55 = vld [vmem:[#allocation6 + $0x98] sm:$0xff] }
  0xf5   :  { %v168_v13 = vsel %vm163_vm2, %v150_v60, %v2923_v57  ;;  %v169_v63 = vsel %vm163_vm2, %v2839_v25, %v150_v60 }
  0xf6   :  { %174 = vst [vmem:[#allocation2 + $0x10] sm:$0xf] %v169_v63  ;;  %175 = vst [vmem:[#allocation2 + $0x18] sm:$0xf] %v168_v13  ;;  %2188 = vmatpush1.msk.msra.mxu0 %vm604_vm8, %v587_v61  ;;  %v116_v61 = vld [vmem:[#allocation6 + $0xd8] sm:$0xff]  ;;  %v115_v13 = vld [vmem:[#allocation6 + $0xd0] sm:$0xff] }
  0xf7   :  { %2189 = vmatmul.mubr.msk.f32.vlgmr.msra.gmra.mrb[0].mxu0 %vm600_vm9, %v2926_v62 }
  0xf8   :  { %v2937_v3 = vpop.permute.xlu1 %243  ;;  %v242_v5 = vpop.permute.xlu0 %241  ;;  %835 = vmatprep.mubr.f32.mxu0 %v2568_v8 }
  0xf9   :  { %v258_v7 = vsel %vm253_vm3, %v242_v5, %v2937_v3  ;;  %v259_v25 = vsel %vm253_vm3, %v2848_v30, %v242_v5  ;;  %v100_v30 = vld [vmem:[#allocation6 + $0x58] sm:$0xff] }
  0xfa   :  { %264 = vst [vmem:[#allocation2 + $0x50] sm:$0xf] %v259_v25  ;;  %265 = vst [vmem:[#allocation2 + $0x58] sm:$0xf] %v258_v7 }
  0xfc   :  { %v2946_v9 = vpop.permute.xlu1 %343  ;;  %v342_v12 = vpop.permute.xlu0 %341 }
  0xfd   :  { %v355_v15 = vsel %vm351_vm4, %v342_v12, %v2946_v9  ;;  %v356_v16 = vsel %vm351_vm4, %v2864_v40, %v342_v12  ;;  %v518_v22 = vld [vmem:[#allocation2 + $0x18] sm:$0xff]  ;;  %v517_v27 = vld [vmem:[#allocation2 + $0x10] sm:$0xff] }
  0xfe   :  { %v370_v23 = vrot.slane %v356_v16, 4  ;;  %v371_v24 = vrot.slane %v355_v15, 4  ;;  %v558_v35 = vmul.f32 %v518_v22, %v92_v17  ;;  %v557_v39 = vmul.f32 %v517_v27, %v91_v26  ;;  %v124_v26 = vld [vmem:[#allocation6 + $0x118] sm:$0xf] }
 0x100   :  { %386 = vst [vmem:[#allocation2 + $0x90] sm:$0xf0] %v370_v23  ;;  %387 = vst [vmem:[#allocation2 + $0x98] sm:$0xf0] %v371_v24  ;;  %v2954_v29 = vpop.permute.xlu1 %433  ;;  %v432_v31 = vpop.permute.xlu0 %431 }
 0x101   :  { %v445_v36 = vsel %vm441_vm5, %v432_v31, %v2954_v29  ;;  %v446_v40 = vsel %vm441_vm5, %v2870_v49, %v432_v31  ;;  %v526_v37 = vld [vmem:[#allocation2 + $0x58] sm:$0xff]  ;;  %v525_v38 = vld [vmem:[#allocation2 + $0x50] sm:$0xff] }
 0x102   :  { %v460_v41 = vrot.slane %v446_v40, 4  ;;  %v461_v42 = vrot.slane %v445_v36, 4  ;;  %v566_v43 = vmul.f32 %v526_v37, %v100_v30  ;;  %v565_v44 = vmul.f32 %v525_v38, %v99_v28 }
 0x104   :  { %476 = vst [vmem:[#allocation2 + $0xd0] sm:$0xf0] %v460_v41  ;;  %477 = vst [vmem:[#allocation2 + $0xd8] sm:$0xf0] %v461_v42  ;;  %v2962_v45 = vpop.permute.xlu1 %400  ;;  %v399_v47 = vpop.permute.xlu0 %398  ;;  %v2219_v48 = vpack.c.bf16 %v566_v43, %v558_v35  ;;  %v2221_v50 = vpack.c.bf16 %v565_v44, %v557_v39  ;;  %v123_v39 = vld [vmem:[#allocation6 + $0x110] sm:$0xf] }
 0x105   :  { %v412_v51 = vsel %vm408_vm6, %v399_v47, %v2962_v45  ;;  %v413_v49 = vsel %vm408_vm6, %v2886_v4, %v399_v47  ;;  %v107_v4 = vld [vmem:[#allocation6 + $0x90] sm:$0xff] }
 0x106   :  { %419 = vst [vmem:[#allocation2 + $0xd0] sm:$0xf] %v413_v49  ;;  %420 = vst [vmem:[#allocation2 + $0xd8] sm:$0xf] %v412_v51  ;;  %2220 = vmatprep.subr.bf16.mxu1 %v2219_v48 }
 0x107   :  { %2222 = vmatpush1.bf16.msra.mxu1 %v2221_v50  ;;  %v534_v56 = vld [vmem:[#allocation2 + $0x98] sm:$0xff]  ;;  %v533_v60 = vld [vmem:[#allocation2 + $0x90] sm:$0xff] }
 0x108   :  { %v2970_v14 = vpop.permute.xlu1 %490  ;;  %v489_v52 = vpop.permute.xlu0 %488  ;;  %v574_v7 = vmul.f32 %v534_v56, %v108_v55  ;;  %v573_v16 = vmul.f32 %v533_v60, %v107_v4  ;;  %v94_v55 = vld [vmem:[#allocation6 + $0x28] sm:$0xff] }
 0x109   :  { %v502_v53 = vsel %vm498_vm7, %v489_v52, %v2970_v14  ;;  %v503_v54 = vsel %vm498_vm7, %v2899_v21, %v489_v52 }
 0x10a   :  { %509 = vst [vmem:[#allocation2 + $0x110] sm:$0xf] %v503_v54  ;;  %510 = vst [vmem:[#allocation2 + $0x118] sm:$0xf] %v502_v53 }
 0x10c   :  { %v2978_v63 = vpop.permute.xlu1 %190  ;;  %v189_v5 = vpop.permute.xlu0 %188 }
 0x10d   :  { %v199_v25 = vsel %vm196_vm1, %v189_v5, %v2978_v63  ;;  %v200_v21 = vsel %vm196_vm1, %v2907_v32, %v189_v5  ;;  %v542_v12 = vld [vmem:[#allocation2 + $0xd8] sm:$0xff]  ;;  %v541_v15 = vld [vmem:[#allocation2 + $0xd0] sm:$0xff]  ;;  %v101_v5 = vld [vmem:[#allocation6 + $0x60] sm:$0xff] }
 0x10e   :  { %v217_v17 = vrot.slane %v200_v21, 4  ;;  %v218_v22 = vrot.slane %v199_v25, 4  ;;  %v582_v23 = vmul.f32 %v542_v12, %v116_v61  ;;  %v581_v24 = vmul.f32 %v541_v15, %v115_v13  ;;  %v102_v13 = vld [vmem:[#allocation6 + $0x68] sm:$0xff] }
 0x110   :  { %233 = vst [vmem:[#allocation2 + $0x20] sm:$0xf0] %v217_v17  ;;  %234 = vst [vmem:[#allocation2 + $0x28] sm:$0xf0] %v218_v22  ;;  %v2986_v27 = vpop.permute.xlu1 %280  ;;  %v279_v30 = vpop.permute.xlu0 %278  ;;  %v2223_v28 = vpack.c.bf16 %v582_v23, %v574_v7  ;;  %v2225_v31 = vpack.c.bf16 %v581_v24, %v573_v16 }
 0x111   :  { %v289_v35 = vsel %vm286_vm0, %v279_v30, %v2986_v27  ;;  %v290_v32 = vsel %vm286_vm0, %v2915_v46, %v279_v30  ;;  %v550_v36 = vld [vmem:[#allocation2 + $0x118] sm:$0xf]  ;;  %v549_v41 = vld [vmem:[#allocation2 + $0x110] sm:$0xf] }
 0x112   :  { %v307_v40 = vrot.slane %v290_v32, 4  ;;  %v308_v37 = vrot.slane %v289_v35, 4  ;;  %2224 = vmatprep.subr.bf16.mxu1 %v2223_v28  ;;  %v590_v38 = vmul.f32 %v550_v36, %v124_v26  ;;  %v589_v47 = vmul.f32 %v549_v41, %v123_v39 }
 0x113   :  { %2226 = vmatpush1.bf16.msra.mxu1 %v2225_v31 }
 0x114   :  { %323 = vst [vmem:[#allocation2 + $0x60] sm:$0xf0] %v307_v40  ;;  %324 = vst [vmem:[#allocation2 + $0x68] sm:$0xf0] %v308_v37  ;;  %v2994_v42 = vpop.permute.xlu1 %155  ;;  %v154_v43 = vpop.permute.xlu0 %153  ;;  %2190 = vmatprep.subr.msk.mxu1 %vm604_vm8, %v590_v38  ;;  %v110_v37 = vld [vmem:[#allocation6 + $0xa8] sm:$0xff] }
 0x115   :  { %v166_v44 = vsel %vm163_vm2, %v154_v43, %v2994_v42  ;;  %v167_v46 = vsel %vm163_vm2, %v2923_v57, %v154_v43  ;;  %v109_v43 = vld [vmem:[#allocation6 + $0xa0] sm:$0xff] }
 0x116   :  { %176 = vst [vmem:[#allocation2 + $0x20] sm:$0xf] %v167_v46  ;;  %177 = vst [vmem:[#allocation2 + $0x28] sm:$0xf] %v166_v44 }
 0x117   :  { %2191 = vmatpush1.msk.msra.mxu1 %vm604_vm8, %v589_v47  ;;  %v118_v47 = vld [vmem:[#allocation6 + $0xe8] sm:$0xff] }
 0x118   :  { %v3004_v48 = vpop.permute.xlu1 %247  ;;  %2192 = vmatmul.mubr.msk.f32.vlgmr.msra.gmra.mrb[0].mxu1 %vm600_vm9, %v2926_v62  ;;  %v246_v50 = vpop.permute.xlu0 %245 }
 0x119   :  { %v256_v51 = vsel %vm253_vm3, %v246_v50, %v3004_v48  ;;  %v257_v49 = vsel %vm253_vm3, %v2937_v3, %v246_v50  ;;  %906 = vmatprep.mubr.f32.mxu1 %v2568_v8  ;;  %v93_v3 = vld [vmem:[#allocation6 + $0x20] sm:$0xff] }
 0x11a   :  { %266 = vst [vmem:[#allocation2 + $0x60] sm:$0xf] %v257_v49  ;;  %267 = vst [vmem:[#allocation2 + $0x68] sm:$0xf] %v256_v51  ;;  %v117_v51 = vld [vmem:[#allocation6 + $0xe0] sm:$0xff] }
 0x11c   :  { %v3015_v57 = vpop.permute.xlu1 %347  ;;  %v346_v52 = vpop.permute.xlu0 %345 }
 0x11d   :  { %v353_v53 = vsel %vm351_vm4, %v346_v52, %v3015_v57  ;;  %v354_v54 = vsel %vm351_vm4, %v2946_v9, %v346_v52  ;;  %v520_v56 = vld [vmem:[#allocation2 + $0x28] sm:$0xff]  ;;  %v519_v61 = vld [vmem:[#allocation2 + $0x20] sm:$0xff] }
 0x11e   :  { %v372_v4 = vrot.slane %v354_v54, 4  ;;  %v373_v60 = vrot.slane %v353_v53, 4  ;;  %v560_v21 = vmul.f32 %v520_v56, %v94_v55  ;;  %v559_v17 = vmul.f32 %v519_v61, %v93_v3 }
 0x120   :  { %388 = vst [vmem:[#allocation2 + $0xa0] sm:$0xf0] %v372_v4  ;;  %389 = vst [vmem:[#allocation2 + $0xa8] sm:$0xf0] %v373_v60  ;;  %v3023_v7 = vpop.permute.xlu1 %437  ;;  %v436_v25 = vpop.permute.xlu0 %435 }
 0x121   :  { %v443_v12 = vsel %vm441_vm5, %v436_v25, %v3023_v7  ;;  %v444_v9 = vsel %vm441_vm5, %v2954_v29, %v436_v25  ;;  %v528_v15 = vld [vmem:[#allocation2 + $0x68] sm:$0xff]  ;;  %v527_v16 = vld [vmem:[#allocation2 + $0x60] sm:$0xff] }
 0x122   :  { %v462_v22 = vrot.slane %v444_v9, 4  ;;  %v463_v23 = vrot.slane %v443_v12, 4  ;;  %v568_v24 = vmul.f32 %v528_v15, %v102_v13  ;;  %v567_v26 = vmul.f32 %v527_v16, %v101_v5  ;;  %v126_v5 = vld [vmem:[#allocation6 + $0x128] sm:$0xf]  ;;  %v125_v15 = vld [vmem:[#allocation6 + $0x120] sm:$0xf] }
 0x124   :  { %478 = vst [vmem:[#allocation2 + $0xe0] sm:$0xf0] %v462_v22  ;;  %479 = vst [vmem:[#allocation2 + $0xe8] sm:$0xf0] %v463_v23  ;;  %v3031_v30 = vpop.permute.xlu1 %404  ;;  %v403_v28 = vpop.permute.xlu0 %402  ;;  %v2227_v31 = vpack.c.bf16 %v568_v24, %v560_v21  ;;  %v2229_v35 = vpack.c.bf16 %v567_v26, %v559_v17 }
 0x125   :  { %v410_v32 = vsel %vm408_vm6, %v403_v28, %v3031_v30  ;;  %v411_v29 = vsel %vm408_vm6, %v2962_v45, %v403_v28 }
 0x126   :  { %421 = vst [vmem:[#allocation2 + $0xe0] sm:$0xf] %v411_v29  ;;  %422 = vst [vmem:[#allocation2 + $0xe8] sm:$0xf] %v410_v32  ;;  %2228 = vmatprep.subr.bf16.mxu0 %v2227_v31 }
 0x127   :  { %2230 = vmatpush1.bf16.msra.mxu0 %v2229_v35  ;;  %v536_v41 = vld [vmem:[#allocation2 + $0xa8] sm:$0xff]  ;;  %v535_v44 = vld [vmem:[#allocation2 + $0xa0] sm:$0xff] }
 0x128   :  { %v3039_v36 = vpop.permute.xlu1 %494  ;;  %v493_v40 = vpop.permute.xlu0 %492  ;;  %v576_v50 = vmul.f32 %v536_v41, %v110_v37  ;;  %v575_v49 = vmul.f32 %v535_v44, %v109_v43  ;;  %v95_v37 = vld [vmem:[#allocation6 + $0x30] sm:$0xff] }
 0x129   :  { %v500_v38 = vsel %vm498_vm7, %v493_v40, %v3039_v36  ;;  %v501_v39 = vsel %vm498_vm7, %v2970_v14, %v493_v40  ;;  %v96_v40 = vld [vmem:[#allocation6 + $0x38] sm:$0xff] }
 0x12a   :  { %511 = vst [vmem:[#allocation2 + $0x120] sm:$0xf] %v501_v39  ;;  %512 = vst [vmem:[#allocation2 + $0x128] sm:$0xf] %v500_v38 }
 0x12c   :  { %v283_v45 = vpop.permute.xlu1 %282  ;;  %v193_v46 = vpop.permute.xlu0 %192 }
 0x12d   :  { %v287_v52 = vsel %vm286_vm0, %v283_v45, %v2824_v19  ;;  %v288_v53 = vsel %vm286_vm0, %v2986_v27, %v283_v45  ;;  %v197_v14 = vsel %vm196_vm1, %v193_v46, %v2826_v20  ;;  %v198_v54 = vsel %vm196_vm1, %v2978_v63, %v193_v46  ;;  %v544_v55 = vld [vmem:[#allocation2 + $0xe8] sm:$0xff]  ;;  %v543_v56 = vld [vmem:[#allocation2 + $0xe0] sm:$0xff] }
 0x12e   :  { %v309_v4 = vrot.slane %v288_v53, 4  ;;  %v310_v60 = vrot.slane %v287_v52, 4  ;;  %v219_v3 = vrot.slane %v198_v54, 4  ;;  %v220_v61 = vrot.slane %v197_v14, 4  ;;  %v112_v52 = vld [vmem:[#allocation6 + $0xb8] sm:$0xff]  ;;  %v119_v54 = vld [vmem:[#allocation6 + $0xf0] sm:$0xff] }
 0x12f   :  { %v584_v13 = vmul.f32 %v544_v55, %v118_v47  ;;  %v583_v19 = vmul.f32 %v543_v56, %v117_v51  ;;  %v120_v53 = vld [vmem:[#allocation6 + $0xf8] sm:$0xff] }
 0x130   :  { %325 = vst [vmem:[#allocation2 + $0x70] sm:$0xf0] %v309_v4  ;;  %326 = vst [vmem:[#allocation2 + $0x78] sm:$0xf0] %v310_v60  ;;  %v250_v27 = vpop.permute.xlu1 %249  ;;  %v158_v25 = vpop.permute.xlu0 %157 }
 0x131   :  { %235 = vst [vmem:[#allocation2 + $0x30] sm:$0xf0] %v219_v3  ;;  %236 = vst [vmem:[#allocation2 + $0x38] sm:$0xf0] %v220_v61  ;;  %v254_v20 = vsel %vm253_vm3, %v250_v27, %v2853_v33  ;;  %v255_v63 = vsel %vm253_vm3, %v3004_v48, %v250_v27  ;;  %v164_v21 = vsel %vm163_vm2, %v158_v25, %v2855_v34  ;;  %v552_v9 = vld [vmem:[#allocation2 + $0x128] sm:$0xf] }
 0x132   :  { %v165_v12 = vsel %vm163_vm2, %v2994_v42, %v158_v25  ;;  %v551_v16 = vld [vmem:[#allocation2 + $0x120] sm:$0xf]  ;;  %268 = vst [vmem:[#allocation2 + $0x70] sm:$0xf] %v255_v63  ;;  %269 = vst [vmem:[#allocation2 + $0x78] sm:$0xf] %v254_v20  ;;  %v2231_v33 = vpack.c.bf16 %v584_v13, %v576_v50  ;;  %v2233_v17 = vpack.c.bf16 %v583_v19, %v575_v49 }
 0x133   :  { %178 = vst [vmem:[#allocation2 + $0x30] sm:$0xf] %v165_v12  ;;  %179 = vst [vmem:[#allocation2 + $0x38] sm:$0xf] %v164_v21  ;;  %v592_v22 = vmul.f32 %v552_v9, %v126_v5  ;;  %v591_v24 = vmul.f32 %v551_v16, %v125_v15  ;;  %v128_v19 = vld [vmem:[#allocation6 + $0x138] sm:$0xf] }
 0x134   :  { %2232 = vmatprep.subr.bf16.mxu0 %v2231_v33  ;;  %v440_v48 = vpop.permute.xlu1 %439  ;;  %v350_v23 = vpop.permute.xlu0 %349  ;;  %v127_v20 = vld [vmem:[#allocation6 + $0x130] sm:$0xf] }
 0x135   :  { %2234 = vmatpush1.bf16.msra.mxu0 %v2233_v17  ;;  %v442_v34 = vsel %vm441_vm5, %v3023_v7, %v440_v48  ;;  %v449_v42 = vsel %vm441_vm5, %v440_v48, %v2875_v58  ;;  %v352_v26 = vsel %vm351_vm4, %v3015_v57, %v350_v23  ;;  %v359_v28 = vsel %vm351_vm4, %v350_v23, %v2877_v59  ;;  %v104_v7 = vld [vmem:[#allocation6 + $0x78] sm:$0xff]  ;;  %v103_v57 = vld [vmem:[#allocation6 + $0x70] sm:$0xff] }
 0x136   :  { %v464_v31 = vrot.slane %v442_v34, 4  ;;  %v465_v35 = vrot.slane %v449_v42, 4  ;;  %v374_v32 = vrot.slane %v352_v26, 4  ;;  %v375_v29 = vrot.slane %v359_v28, 4  ;;  %2193 = vmatprep.subr.msk.mxu0 %vm604_vm8, %v592_v22 }
 0x138   :  { %480 = vst [vmem:[#allocation2 + $0xf0] sm:$0xf0] %v464_v31  ;;  %481 = vst [vmem:[#allocation2 + $0xf8] sm:$0xf0] %v465_v35  ;;  %v497_v58 = vpop.permute.xlu1 %496  ;;  %v407_v38 = vpop.permute.xlu0 %406 }
 0x139   :  { %390 = vst [vmem:[#allocation2 + $0xb0] sm:$0xf0] %v374_v32  ;;  %391 = vst [vmem:[#allocation2 + $0xb8] sm:$0xf0] %v375_v29  ;;  %2194 = vmatpush1.msk.msra.mxu0 %vm604_vm8, %v591_v24  ;;  %v499_v59 = vsel %vm498_vm7, %v3039_v36, %v497_v58  ;;  %v506_v39 = vsel %vm498_vm7, %v497_v58, %v2897_v18  ;;  %v409_v41 = vsel %vm408_vm6, %v3031_v30, %v407_v38  ;;  %v530_v45 = vld [vmem:[#allocation2 + $0x78] sm:$0xff]  ;;  %v529_v47 = vld [vmem:[#allocation2 + $0x70] sm:$0xff] }
 0x13a   :  { %v416_v43 = vsel %vm408_vm6, %v407_v38, %v2891_v11  ;;  %v522_v44 = vld [vmem:[#allocation2 + $0x38] sm:$0xff]  ;;  %v521_v46 = vld [vmem:[#allocation2 + $0x30] sm:$0xff]  ;;  %513 = vst [vmem:[#allocation2 + $0x130] sm:$0xf] %v499_v59  ;;  %514 = vst [vmem:[#allocation2 + $0x138] sm:$0xf] %v506_v39  ;;  %2195 = vmatmul.mubr.msk.f32.vlgmr.msra.gmra.mrb[2].mxu0 %vm600_vm9, %v2926_v62  ;;  %v570_v18 = vmul.f32 %v530_v45, %v104_v7  ;;  %v569_v51 = vmul.f32 %v529_v47, %v103_v57 }
 0x13b   :  { %423 = vst [vmem:[#allocation2 + $0xf0] sm:$0xf] %v409_v41  ;;  %424 = vst [vmem:[#allocation2 + $0xf8] sm:$0xf] %v416_v43  ;;  %v562_v36 = vmul.f32 %v522_v44, %v96_v40  ;;  %v561_v50 = vmul.f32 %v521_v46, %v95_v37  ;;  %1700 = vmatprep.mubr.f32.mxu0 %v2568_v8  ;;  %v111_v11 = vld [vmem:[#allocation6 + $0xb0] sm:$0xff] }
 0x13d   :  { %v2235_v30 = vpack.c.bf16 %v570_v18, %v562_v36  ;;  %v2237_v49 = vpack.c.bf16 %v569_v51, %v561_v50 }
 0x13f   :  { %2236 = vmatprep.subr.bf16.mxu1 %v2235_v30 }
 0x140   :  { %2238 = vmatpush1.bf16.msra.mxu1 %v2237_v49  ;;  %v538_v14 = vld [vmem:[#allocation2 + $0xb8] sm:$0xff]  ;;  %v537_v55 = vld [vmem:[#allocation2 + $0xb0] sm:$0xff] }
 0x141   :  { %v577_v56 = vmul.f32 %v537_v55, %v111_v11  ;;  %v578_v3 = vmul.f32 %v538_v14, %v112_v52  ;;  %v554_v5 = vld [vmem:[#allocation2 + $0x138] sm:$0xf]  ;;  %v553_v63 = vld [vmem:[#allocation2 + $0x130] sm:$0xf] }
 0x142   :  { %v546_v4 = vld [vmem:[#allocation2 + $0xf8] sm:$0xff]  ;;  %v545_v60 = vld [vmem:[#allocation2 + $0xf0] sm:$0xff]  ;;  %v594_v21 = vmul.f32 %v554_v5, %v128_v19  ;;  %v593_v12 = vmul.f32 %v553_v63, %v127_v20 }
 0x143   :  { %v586_v61 = vmul.f32 %v546_v4, %v120_v53  ;;  %v585_v13 = vmul.f32 %v545_v60, %v119_v54 }
 0x145   :  { %v2239_v27 = vpack.c.bf16 %v586_v61, %v578_v3  ;;  %v2241_v25 = vpack.c.bf16 %v585_v13, %v577_v56 }
 0x147   :  { %2240 = vmatprep.subr.bf16.mxu1 %v2239_v27 }
 0x148   :  { %2242 = vmatpush1.bf16.msra.mxu1 %v2241_v25 }
 0x149   :  { %2196 = vmatprep.subr.msk.mxu1 %vm604_vm8, %v594_v21  ;;  %v3105_v9 = vpop.permute.xlu0 %597 }
 0x14c   :  { %2197 = vmatpush1.msk.msra.mxu1 %vm604_vm8, %v593_v12 }
 0x14d   :  { %2198 = vmatmul.mubr.msk.f32.vlgmr.msra.gmra.mrb[2].mxu1 %vm600_vm9, %v2926_v62 }
 0x14e   :  { %1771 = vmatprep.mubr.f32.mxu1 %v2568_v8 }
 0x1ca   :  { %v695_v15 = vpop.f32.mrb[0].mxu0 }
 0x1cb   :  { %v696_v16 = vadd.f32 %v695_v15, %v3105_v9  ;;  %v697_v33 = vpop.f32.mrb[1].mxu0 }
 0x1cc   :  { %v698_v17 = vadd.f32 %v697_v33, %v3105_v9 }
 0x1cd   :  { %v921_v22 = vmul.f32 0.70710677, %v696_v16  ;;  %v913_v34 = vmul.f32 0.5, %v696_v16 }
 0x1ce   :  { %v922_v48 = vmul.f32 0.70710677, %v698_v17  ;;  %v914_v26 = vmul.f32 0.5, %v698_v17 }
 0x1cf   :  { %2348 = verf.f32 %v921_v22 }
 0x1d0   :  { %2350 = verf.f32 %v922_v48 }
 0x1d9   :  { %v2349_v23 = vpop.eup %2348 }
 0x1da   :  { %v2351_v24 = vpop.eup %2350  ;;  %v937_v42 = vadd.f32 1.0, %v2349_v23 }
 0x1db   :  { %v938_v62 = vadd.f32 1.0, %v2351_v24 }
 0x1dc   :  { %v3109_v28 = vmul.f32 %v937_v42, %v913_v34 }
 0x1dd   :  { %v3111_v31 = vmul.f32 %v938_v62, %v914_v26 }
 0x1de   :  { %v961_v35 = vsel %vm604_vm8, %v3109_v28, 0.0  ;;  %v953_v32 = vmul.f32 %v3109_v28, %v3109_v28 }
 0x1df   :  { %v962_v29 = vsel %vm604_vm8, %v3111_v31, 0.0  ;;  %v954_v40 = vmul.f32 %v3111_v31, %v3111_v31 }
 0x1e0   :  { %v963_v7 = vadd.f32 %v962_v29, %v961_v35  ;;  %v973_v37 = vsel %vm604_vm8, %v953_v32, 0.0 }
 0x1e1   :  { %v974_v58 = vsel %vm604_vm8, %v954_v40, 0.0 }
 0x1e2   :  { %964 = vadd.xlane.f32.xlu1 %v963_v7  ;;  %v975_v38 = vadd.f32 %v974_v58, %v973_v37 }
 0x1e4   :  { %976 = vadd.xlane.f32.xlu0 %v975_v38 }
 0x1eb   :  { %v766_v57 = vpop.f32.mrb[0].mxu1 }
 0x1ec   :  { %v767_v59 = vadd.f32 %v766_v57, %v3105_v9  ;;  %v768_v39 = vpop.f32.mrb[1].mxu1 }
 0x1ed   :  { %v769_v41 = vadd.f32 %v768_v39, %v3105_v9 }
 0x1ee   :  { %v923_v43 = vmul.f32 0.70710677, %v767_v59  ;;  %v915_v36 = vmul.f32 0.5, %v767_v59 }
 0x1ef   :  { %v924_v44 = vmul.f32 0.70710677, %v769_v41  ;;  %v916_v47 = vmul.f32 0.5, %v769_v41 }
 0x1f0   :  { %2352 = verf.f32 %v923_v43 }
 0x1f1   :  { %2354 = verf.f32 %v924_v44 }
 0x1fa   :  { %v2353_v45 = vpop.eup %2352 }
 0x1fb   :  { %v2355_v46 = vpop.eup %2354  ;;  %v939_v18 = vadd.f32 1.0, %v2353_v45 }
 0x1fc   :  { %v940_v50 = vadd.f32 1.0, %v2355_v46 }
 0x1fd   :  { %v3125_v51 = vmul.f32 %v939_v18, %v915_v36 }
 0x1fe   :  { %v3127_v30 = vmul.f32 %v940_v50, %v916_v47 }
 0x1ff   :  { %v1010_v49 = vsel %vm604_vm8, %v3125_v51, 0.0  ;;  %v955_v11 = vmul.f32 %v3125_v51, %v3125_v51 }
 0x200   :  { %v1011_v52 = vsel %vm604_vm8, %v3127_v30, 0.0  ;;  %v956_v53 = vmul.f32 %v3127_v30, %v3127_v30 }
 0x201   :  { %v1012_v14 = vadd.f32 %v1011_v52, %v1010_v49  ;;  %v1022_v54 = vsel %vm604_vm8, %v955_v11, 0.0 }
 0x202   :  { %v1023_v55 = vsel %vm604_vm8, %v956_v53, 0.0 }
 0x203   :  { %1013 = vadd.xlane.f32.xlu1 %v1012_v14  ;;  %v1024_v56 = vadd.f32 %v1023_v55, %v1022_v54 }
 0x205   :  { %1025 = vadd.xlane.f32.xlu0 %v1024_v56 }
 0x20d   :  { %v837_v4 = vpop.f32.mrb[2].mxu0 }
 0x20e   :  { %v838_v60 = vadd.f32 %v837_v4, %v3105_v9  ;;  %v839_v3 = vpop.f32.mrb[3].mxu0 }
 0x20f   :  { %v840_v61 = vadd.f32 %v839_v3, %v3105_v9 }
 0x210   :  { %v925_v13 = vmul.f32 0.70710677, %v838_v60  ;;  %v917_v25 = vmul.f32 0.5, %v838_v60 }
 0x211   :  { %v926_v19 = vmul.f32 0.70710677, %v840_v61  ;;  %v918_v63 = vmul.f32 0.5, %v840_v61 }
 0x212   :  { %2356 = verf.f32 %v925_v13 }
 0x213   :  { %2358 = verf.f32 %v926_v19 }
 0x21c   :  { %v2357_v5 = vpop.eup %2356 }
 0x21d   :  { %v2359_v27 = vpop.eup %2358  ;;  %v941_v20 = vadd.f32 1.0, %v2357_v5 }
 0x21e   :  { %v942_v21 = vadd.f32 1.0, %v2359_v27 }
 0x21f   :  { %v3141_v12 = vmul.f32 %v941_v20, %v917_v25 }
 0x220   :  { %v908_v15 = vpop.f32.mrb[2].mxu1  ;;  %v3143_v16 = vmul.f32 %v942_v21, %v918_v63 }
 0x221   :  { %v909_v33 = vadd.f32 %v908_v15, %v3105_v9  ;;  %v910_v17 = vpop.f32.mrb[3].mxu1  ;;  %v1056_v48 = vsel %vm604_vm8, %v3141_v12, 0.0  ;;  %v957_v23 = vmul.f32 %v3141_v12, %v3141_v12 }
 0x222   :  { %v911_v22 = vadd.f32 %v910_v17, %v3105_v9  ;;  %v1057_v34 = vsel %vm604_vm8, %v3143_v16, 0.0  ;;  %v958_v42 = vmul.f32 %v3143_v16, %v3143_v16 }
 0x223   :  { %v927_v24 = vmul.f32 0.70710677, %v909_v33  ;;  %v1058_v62 = vadd.f32 %v1057_v34, %v1056_v48  ;;  %v1068_v35 = vsel %vm604_vm8, %v957_v23, 0.0  ;;  %v919_v7 = vmul.f32 0.5, %v909_v33 }
 0x224   :  { %v928_v26 = vmul.f32 0.70710677, %v911_v22  ;;  %v1069_v9 = vsel %vm604_vm8, %v958_v42, 0.0  ;;  %v920_v58 = vmul.f32 0.5, %v911_v22 }
 0x225   :  { %2360 = verf.f32 %v927_v24  ;;  %1059 = vadd.xlane.f32.xlu1 %v1058_v62  ;;  %v1070_v32 = vadd.f32 %v1069_v9, %v1068_v35 }
 0x226   :  { %2362 = verf.f32 %v928_v26  ;;  %v3174_v26 = vld [vmem:[%s3821_s4] sm:$0xff] }
 0x227   :  { %1071 = vadd.xlane.f32.xlu0 %v1070_v32 }
 0x22f   :  { %v2361_v29 = vpop.eup %2360 }
 0x230   :  { %v2363_v40 = vpop.eup %2362  ;;  %v943_v37 = vadd.f32 1.0, %v2361_v29  ;;  %v3180_v29 = vcombine.high %v3174_v26, %v3174_v26 }
 0x231   :  { %v944_v38 = vadd.f32 1.0, %v2363_v40 }
 0x232   :  { %v3157_v57 = vmul.f32 %v943_v37, %v919_v7 }
 0x233   :  { %v3159_v59 = vmul.f32 %v944_v38, %v920_v58 }
 0x234   :  { %v1102_v39 = vsel %vm604_vm8, %v3157_v57, 0.0  ;;  %v959_v41 = vmul.f32 %v3157_v57, %v3157_v57 }
 0x235   :  { %v1103_v43 = vsel %vm604_vm8, %v3159_v59, 0.0  ;;  %v960_v44 = vmul.f32 %v3159_v59, %v3159_v59 }
 0x236   :  { %v1104_v45 = vadd.f32 %v1103_v43, %v1102_v39  ;;  %v1114_v46 = vsel %vm604_vm8, %v959_v41, 0.0 }
 0x237   :  { %v1115_v36 = vsel %vm604_vm8, %v960_v44, 0.0  ;;  %v3191_v44 = vld [vmem:[%s3822_s5] sm:$0xff] }
 0x238   :  { %1105 = vadd.xlane.f32.xlu1 %v1104_v45  ;;  %v1116_v18 = vadd.f32 %v1115_v36, %v1114_v46 }
 0x23a   :  { %1117 = vadd.xlane.f32.xlu0 %v1116_v18 }
 0x26f   :  { %v965_v47 = vpop.xlane.xlu1 %964 }
 0x270   :  { %v966_v50 = vrot.slane %v965_v47, 4 }
 0x271   :  { %v977_v49 = vpop.xlane.xlu0 %976 }
 0x272   :  { %v967_v11 = vadd.f32 %v966_v50, %v965_v47  ;;  %v978_v52 = vrot.slane %v977_v49, 4 }
 0x274   :  { %v968_v53 = vrot.slane %v967_v11, 2  ;;  %v979_v14 = vadd.f32 %v978_v52, %v977_v49 }
 0x276   :  { %v980_v54 = vrot.slane %v979_v14, 2  ;;  %v969_v55 = vadd.f32 %v968_v53, %v967_v11 }
 0x278   :  { %v970_v56 = vrot.slane %v969_v55, 1  ;;  %v981_v4 = vadd.f32 %v980_v54, %v979_v14 }
 0x27a   :  { %v971_v60 = vadd.f32 %v970_v56, %v969_v55  ;;  %v982_v3 = vrot.slane %v981_v4, 1 }
 0x27c   :  { %2275 = vpush %v971_v60  ;;  %v983_v61 = vadd.f32 %v982_v3, %v981_v4 }
 0x27e   :  { %2277 = vpush %v983_v61 }
 0x290   :  { %v1014_v13 = vpop.xlane.xlu1 %1013 }
 0x291   :  { %v1015_v5 = vrot.slane %v1014_v13, 4 }
 0x292   :  { %v1026_v19 = vpop.xlane.xlu0 %1025 }
 0x293   :  { %v1027_v27 = vrot.slane %v1026_v19, 4  ;;  %v1016_v25 = vadd.f32 %v1015_v5, %v1014_v13 }
 0x295   :  { %v1028_v20 = vadd.f32 %v1027_v27, %v1026_v19  ;;  %v1017_v63 = vrot.slane %v1016_v25, 2 }
 0x297   :  { %v1029_v21 = vrot.slane %v1028_v20, 2  ;;  %v1018_v33 = vadd.f32 %v1017_v63, %v1016_v25 }
 0x299   :  { %v1030_v17 = vadd.f32 %v1029_v21, %v1028_v20  ;;  %v1019_v22 = vrot.slane %v1018_v33, 1 }
 0x29b   :  { %v1031_v48 = vrot.slane %v1030_v17, 1  ;;  %v1020_v24 = vadd.f32 %v1019_v22, %v1018_v33 }
 0x29d   :  { %v1032_v34 = vadd.f32 %v1031_v48, %v1030_v17 }
 0x2ad   :  { %s2276_s3 = spop %2275 }
 0x2ae   :  { %s985_s0 = smul.f32 0.0009765625, %s2276_s3 }
 0x2af   :  { %s2278_s28 = spop %2277 }
 0x2b0   :  { %s987_s29 = smul.f32 %s985_s0, %s985_s0  ;;  %v993_v42 = vstv %s985_s0 }
 0x2b1   :  { %s986_s11 = smul.f32 0.0009765625, %s2278_s28  ;;  %v994_v9 = vsub.f32 %v3109_v28, %v993_v42  ;;  %v995_v32 = vsub.f32 %v3111_v31, %v993_v42 }
 0x2b2   :  { %v1060_v62 = vpop.xlane.xlu1 %1059 }
 0x2b3   :  { %s988_s12 = ssub.f32 %s986_s11, %s987_s29  ;;  %v1061_v40 = vrot.slane %v1060_v62, 4 }
 0x2b4   :  { %v1072_v35 = vpop.xlane.xlu0 %1071 }
 0x2b5   :  { %s989_s13 = sadd.f32 1e-05, %s988_s12  ;;  %v1073_v37 = vrot.slane %v1072_v35, 4  ;;  %v1062_v31 = vadd.f32 %v1061_v40, %v1060_v62 }
 0x2b7   :  { %v990_v15 = vstv %s989_s13  ;;  %v1074_v41 = vadd.f32 %v1073_v37, %v1072_v35  ;;  %v1063_v46 = vrot.slane %v1062_v31, 2 }
 0x2b8   :  { %2364 = vrsqrt.f32 %v990_v15 }
 0x2b9   :  { %v1075_v36 = vrot.slane %v1074_v41, 2 }
 0x2bb   :  { %v1076_v49 = vadd.f32 %v1075_v36, %v1074_v41 }
 0x2bd   :  { %v1077_v52 = vrot.slane %v1076_v49, 1 }
 0x2bf   :  { %v1078_v54 = vadd.f32 %v1077_v52, %v1076_v49 }
 0x2c2   :  { %v2365_v23 = vpop.eup %2364 }
 0x2c3   :  { %2279 = vpush %v2365_v23 }
 0x2c4   :  { %2281 = vpush %v1020_v24 }
 0x2c5   :  { %2283 = vpush %v1032_v34  ;;  %v1106_v56 = vpop.xlane.xlu1 %1105 }
 0x2c6   :  { %v1107_v61 = vrot.slane %v1106_v56, 4 }
 0x2c7   :  { %v1118_v4 = vpop.xlane.xlu0 %1117 }
 0x2c8   :  { %v1119_v19 = vrot.slane %v1118_v4, 4 }
 0x2ca   :  { %v1120_v63 = vadd.f32 %v1119_v19, %v1118_v4 }
 0x2cc   :  { %v1121_v33 = vrot.slane %v1120_v63, 2 }
 0x2ce   :  { %v1122_v24 = vadd.f32 %v1121_v33, %v1120_v63 }
 0x2d0   :  { %v1123_v34 = vrot.slane %v1122_v24, 1 }
 0x2d2   :  { %v1124_v35 = vadd.f32 %v1123_v34, %v1122_v24 }
 0x2f4   :  { %s2280_s17 = spop %2279 }
 0x2f5   :  { %v996_v7 = vstv %s2280_s17  ;;  %s2282_s18 = spop %2281 }
 0x2f6   :  { %v997_v58 = vmul.f32 %v996_v7, %v994_v9  ;;  %v998_v38 = vmul.f32 %v996_v7, %v995_v32  ;;  %s3182_s1 = smul.f32 0.0009765625, %s2282_s18  ;;  %s2284_s4 = spop %2283 }
 0x2f7   :  { %s1035_s14 = smul.f32 0.0009765625, %s2284_s4 }
 0x2f8   :  { %v1002_v39 = vmul.f32 %v997_v58, %v3174_v26  ;;  %v1003_v28 = vmul.f32 %v3180_v29, %v998_v38  ;;  %s1036_s2 = smul.f32 %s3182_s1, %s3182_s1  ;;  %v1042_v55 = vstv %s3182_s1 }
 0x2f9   :  { %v1043_v60 = vsub.f32 %v3125_v51, %v1042_v55  ;;  %v1044_v3 = vsub.f32 %v3127_v30, %v1042_v55  ;;  %v1108_v51 = vadd.f32 %v1107_v61, %v1106_v56 }
 0x2fa   :  { %v1006_v43 = vcombine.low %v1002_v39, %v1003_v28  ;;  %s1037_s30 = ssub.f32 %s1035_s14, %s1036_s2 }
 0x2fb   :  { %v1109_v15 = vrot.slane %v1108_v51, 2 }
 0x2fc   :  { %v1008_v45 = vadd.f32 %v1006_v43, %v2674_v0  ;;  %s1038_s3 = sadd.f32 1e-05, %s1037_s30  ;;  %v1064_v0 = vadd.f32 %v1063_v46, %v1062_v31 }
 0x2fd   :  { %v1110_v23 = vadd.f32 %v1109_v15, %v1108_v51  ;;  %v2396_v51 = vld [vmem:[#allocation6 + $0x8] sm:$0xff] }
 0x2fe   :  { %v3195_v18 = vadd.f32 %v1008_v45, %v3191_v44  ;;  %v1039_v47 = vstv %s1038_s3  ;;  %v1065_v11 = vrot.slane %v1064_v0, 1 }
 0x2ff   :  { %2366 = vrsqrt.f32 %v1039_v47 }
 0x300   :  { %1340 = vst [vmem:[#allocation2 + $0x80] sm:$0xf] %v3195_v18  ;;  %1164 = vrot.lane.b32.xlu0 %v3195_v18, %s2562_s6  ;;  %1196 = vrot.lane.b32.xlu1 %v3195_v18, %s2561_s20  ;;  %v3204_v50 = vcombine.high %v3195_v18, %v3195_v18  ;;  %v1066_v14 = vadd.f32 %v1065_v11, %v1064_v0 }
 0x302   :  { %1341 = vst [vmem:[#allocation2 + $0x88] sm:$0xf] %v3204_v50 }
 0x304   :  { %1252 = vrot.lane.b32.xlu0 %v3195_v18, %s2563_s21  ;;  %1284 = vrot.lane.b32.xlu1 %v3195_v18, %s2560_s19 }
 0x308   :  { %1348 = vrot.lane.b32.xlu0 %v3195_v18, %s2564_s22  ;;  %1436 = vrot.lane.b32.xlu1 %v3195_v18, %s2565_s23 }
 0x309   :  { %v2367_v53 = vpop.eup %2366 }
 0x30a   :  { %2285 = vpush %v2367_v53 }
 0x30b   :  { %2287 = vpush %v1066_v14 }
 0x30c   :  { %2289 = vpush %v1078_v54  ;;  %1286 = vrot.lane.b32.xlu1 %v3204_v50, %s2560_s19  ;;  %1198 = vrot.lane.b32.xlu0 %v3204_v50, %s2561_s20 }
 0x310   :  { %1166 = vrot.lane.b32.xlu1 %v3204_v50, %s2562_s6  ;;  %1350 = vrot.lane.b32.xlu0 %v3204_v50, %s2564_s22 }
 0x314   :  { %1254 = vrot.lane.b32.xlu1 %v3204_v50, %s2563_s21  ;;  %1438 = vrot.lane.b32.xlu0 %v3204_v50, %s2565_s23 }
 0x318   :  { %1406 = vrot.lane.b32.xlu0 %v3204_v50, %s2566_s24 }
 0x33b   :  { %s2286_s5 = spop %2285 }
 0x33c   :  { %v1045_v13 = vstv %s2286_s5  ;;  %s2288_s0 = spop %2287 }
 0x33d   :  { %v1046_v5 = vmul.f32 %v1045_v13, %v1043_v60  ;;  %v1047_v27 = vmul.f32 %v1045_v13, %v1044_v3  ;;  %s3232_s28 = smul.f32 0.0009765625, %s2288_s0  ;;  %s2290_s29 = spop %2289 }
 0x33e   :  { %s1081_s11 = smul.f32 0.0009765625, %s2290_s29 }
 0x33f   :  { %v1048_v25 = vmul.f32 %v1046_v5, %v3174_v26  ;;  %v1049_v20 = vmul.f32 %v1047_v27, %v3180_v29  ;;  %s1082_s12 = smul.f32 %s3232_s28, %s3232_s28  ;;  %v1088_v28 = vstv %s3232_s28 }
 0x340   :  { %v1089_v46 = vsub.f32 %v3141_v12, %v1088_v28  ;;  %v1090_v36 = vsub.f32 %v3143_v16, %v1088_v28 }
 0x341   :  { %v1052_v30 = vcombine.low %v1048_v25, %v1049_v20  ;;  %s1083_s13 = ssub.f32 %s1081_s11, %s1082_s12 }
 0x343   :  { %v1054_v21 = vadd.f32 %v1052_v30, %v2678_v2  ;;  %s1084_s15 = sadd.f32 1e-05, %s1083_s13  ;;  %v1111_v2 = vrot.slane %v1110_v23, 1  ;;  %v2397_v30 = vld [vmem:[#allocation6 + $0x48] sm:$0xff] }
 0x345   :  { %v3240_v17 = vadd.f32 %v1054_v21, %v3191_v44  ;;  %v1085_v22 = vstv %s1084_s15  ;;  %v1112_v62 = vadd.f32 %v1111_v2, %v1110_v23 }
 0x346   :  { %2368 = vrsqrt.f32 %v1085_v22 }
 0x347   :  { %1342 = vst [vmem:[#allocation2 + $0x90] sm:$0xf] %v3240_v17  ;;  %1352 = vrot.lane.b32.xlu1 %v3240_v17, %s2564_s22  ;;  %v3247_v48 = vcombine.high %v3240_v17, %v3240_v17 }
 0x349   :  { %1343 = vst [vmem:[#allocation2 + $0x98] sm:$0xf] %v3247_v48 }
 0x34b   :  { %1440 = vrot.lane.b32.xlu1 %v3240_v17, %s2565_s23 }
 0x350   :  { %v2369_v42 = vpop.eup %2368 }
 0x351   :  { %2291 = vpush %v2369_v42 }
 0x352   :  { %2293 = vpush %v1112_v62 }
 0x353   :  { %2295 = vpush %v1124_v35 }
 0x372   :  { %v3252_v9 = vpop.permute.xlu1 %1196  ;;  %v3254_v32 = vpop.permute.xlu0 %1164 }
 0x376   :  { %v3256_v40 = vpop.permute.xlu1 %1284  ;;  %v3258_v7 = vpop.permute.xlu0 %1252 }
 0x37a   :  { %v3260_v37 = vpop.permute.xlu1 %1436  ;;  %v3262_v58 = vpop.permute.xlu0 %1348 }
 0x37e   :  { %v3264_v38 = vpop.permute.xlu1 %1286  ;;  %v3266_v39 = vpop.permute.xlu0 %1198 }
 0x37f   :  { %v1306_v31 = vsel %vm286_vm0, %v3256_v40, %v3264_v38  ;;  %v1218_v41 = vsel %vm196_vm1, %v3252_v9, %v3266_v39 }
 0x380   :  { %v1317_v43 = vrot.slane %v1306_v31, 4  ;;  %v1229_v45 = vrot.slane %v1218_v41, 4 }
 0x382   :  { %1333 = vst [vmem:[#allocation2 + $0x48] sm:$0xf0] %v1317_v43  ;;  %1245 = vst [vmem:[#allocation2 + $0x8] sm:$0xf0] %v1229_v45  ;;  %s2292_s16 = spop %2291  ;;  %v3279_v47 = vpop.permute.xlu1 %1166  ;;  %v1351_v0 = vpop.permute.xlu0 %1350 }
 0x383   :  { %v1091_v49 = vstv %s2292_s16  ;;  %s2294_s17 = spop %2293  ;;  %v1186_v11 = vsel %vm163_vm2, %v3254_v32, %v3279_v47  ;;  %v1370_v52 = vsel %vm351_vm4, %v3262_v58, %v1351_v0 }
 0x384   :  { %v1092_v53 = vmul.f32 %v1091_v49, %v1089_v46  ;;  %v1093_v14 = vmul.f32 %v1091_v49, %v1090_v36  ;;  %s3288_s18 = smul.f32 0.0009765625, %s2294_s17  ;;  %s2296_s1 = spop %2295  ;;  %1189 = vst [vmem:[#allocation2 + $0x8] sm:$0xf] %v1186_v11  ;;  %v1380_v12 = vrot.slane %v1370_v52, 4 }
 0x385   :  { %s1127_s4 = smul.f32 0.0009765625, %s2296_s1 }
 0x386   :  { %v1094_v16 = vmul.f32 %v1092_v53, %v3174_v26  ;;  %v1095_v54 = vmul.f32 %v1093_v14, %v3180_v29  ;;  %s1128_s14 = smul.f32 %s3288_s18, %s3288_s18  ;;  %1396 = vst [vmem:[#allocation2 + $0x80] sm:$0xf0] %v1380_v12  ;;  %v3294_v55 = vpop.permute.xlu1 %1254  ;;  %v1439_v56 = vpop.permute.xlu0 %1438  ;;  %v1134_v42 = vstv %s3288_s18 }
 0x387   :  { %v1274_v4 = vsel %vm253_vm3, %v3258_v7, %v3294_v55  ;;  %v1458_v60 = vsel %vm441_vm5, %v3260_v37, %v1439_v56  ;;  %v1135_v62 = vsub.f32 %v3157_v57, %v1134_v42  ;;  %v1136_v35 = vsub.f32 %v3159_v59, %v1134_v42 }
 0x388   :  { %v1098_v3 = vcombine.low %v1094_v16, %v1095_v54  ;;  %s1129_s2 = ssub.f32 %s1127_s4, %s1128_s14  ;;  %1277 = vst [vmem:[#allocation2 + $0x48] sm:$0xf] %v1274_v4  ;;  %v1468_v61 = vrot.slane %v1458_v60, 4 }
 0x38a   :  { %v1100_v13 = vadd.f32 %v1098_v3, %v2695_v6  ;;  %s1130_s30 = sadd.f32 1e-05, %s1129_s2  ;;  %1484 = vst [vmem:[#allocation2 + $0xc0] sm:$0xf0] %v1468_v61  ;;  %v1407_v59 = vpop.permute.xlu0 %1406  ;;  %v2398_v61 = vld [vmem:[#allocation6] sm:$0xff] }
 0x38b   :  { %v1525_v27 = vld [vmem:[#allocation2 + $0x8] sm:$0xff] }
 0x38c   :  { %v3305_v19 = vadd.f32 %v1100_v13, %v3191_v44  ;;  %v1131_v5 = vstv %s1130_s30  ;;  %v1565_v63 = vmul.f32 %v2396_v51, %v1525_v27 }
 0x38d   :  { %2370 = vrsqrt.f32 %v1131_v5  ;;  %v2399_v5 = vld [vmem:[#allocation6 + $0x40] sm:$0xff] }
 0x38e   :  { %1344 = vst [vmem:[#allocation2 + $0xa0] sm:$0xf] %v3305_v19  ;;  %v3310_v25 = vcombine.high %v3305_v19, %v3305_v19 }
 0x38f   :  { %v1533_v20 = vld [vmem:[#allocation2 + $0x48] sm:$0xff] }
 0x390   :  { %v1573_v6 = vmul.f32 %v2397_v30, %v1533_v20  ;;  %1345 = vst [vmem:[#allocation2 + $0xa8] sm:$0xf] %v3310_v25  ;;  %v1540_v20 = vld [vmem:[#allocation2 + $0x80] sm:$0xff] }
 0x392   :  { %v2243_v21 = vpack.c.bf16 %v1573_v6, %v1565_v63 }
 0x394   :  { %2244 = vmatprep.subr.bf16.mxu0 %v2243_v21 }
 0x397   :  { %v2371_v15 = vpop.eup %2370 }
 0x398   :  { %2297 = vpush %v2371_v15 }
 0x3b9   :  { %v3313_v33 = vpop.permute.xlu1 %1352 }
 0x3ba   :  { %v1369_v22 = vsel %vm351_vm4, %v1351_v0, %v3313_v33 }
 0x3bb   :  { %v1381_v23 = vrot.slane %v1369_v22, 4 }
 0x3bd   :  { %1397 = vst [vmem:[#allocation2 + $0x88] sm:$0xf0] %v1381_v23  ;;  %v3318_v24 = vpop.permute.xlu1 %1440 }
 0x3be   :  { %v1457_v2 = vsel %vm441_vm5, %v1439_v56, %v3318_v24 }
 0x3bf   :  { %v1469_v34 = vrot.slane %v1457_v2, 4  ;;  %v2400_v2 = vld [vmem:[#allocation6 + $0x80] sm:$0xff] }
 0x3c1   :  { %1485 = vst [vmem:[#allocation2 + $0xc8] sm:$0xf0] %v1469_v34  ;;  %v1580_v34 = vmul.f32 %v2400_v2, %v1540_v20 }
 0x3c4   :  { %v1541_v51 = vld [vmem:[#allocation2 + $0x88] sm:$0xff] }
 0x3c9   :  { %s2298_s26 = spop %2297 }
 0x3ca   :  { %v1137_v28 = vstv %s2298_s26 }
 0x3cb   :  { %v1138_v31 = vmul.f32 %v1137_v28, %v1135_v62  ;;  %v1139_v41 = vmul.f32 %v1137_v28, %v1136_v35  ;;  %v2401_v62 = vld [vmem:[#allocation6 + $0x88] sm:$0xff] }
 0x3cc   :  { %v1581_v35 = vmul.f32 %v2401_v62, %v1541_v51  ;;  %v2402_v28 = vld [vmem:[#allocation6 + $0xc8] sm:$0xff] }
 0x3cd   :  { %v1140_v43 = vmul.f32 %v1138_v31, %v3174_v26  ;;  %v1141_v45 = vmul.f32 %v1139_v41, %v3180_v29  ;;  %v2403_v41 = vld [vmem:[#allocation6 + $0xc0] sm:$0xff] }
 0x3cf   :  { %v1144_v46 = vcombine.low %v1140_v43, %v1141_v45 }
 0x3d1   :  { %v1146_v36 = vadd.f32 %v1144_v46, %v2676_v1  ;;  %v1161_v1 = vld [vmem:[%s3824_s7] sm:$0xf] }
 0x3d3   :  { %v3330_v0 = vadd.f32 %v1146_v36, %v3191_v44 }
 0x3d5   :  { %1346 = vst [vmem:[#allocation2 + $0xb0] sm:$0xf] %v3330_v0  ;;  %v3335_v57 = vcombine.high %v3330_v0, %v3330_v0 }
 0x3d7   :  { %1298 = vrot.lane.b32.xlu1 %v3335_v57, %s2560_s19  ;;  %1347 = vst [vmem:[#allocation2 + $0xb8] sm:$0xf] %v3335_v57  ;;  %1210 = vrot.lane.b32.xlu0 %v3335_v57, %s2561_s20 }
 0x3db   :  { %1266 = vrot.lane.b32.xlu1 %v3335_v57, %s2563_s21  ;;  %1178 = vrot.lane.b32.xlu0 %v3335_v57, %s2562_s6 }
 0x3df   :  { %1408 = vrot.lane.b32.xlu1 %v3240_v17, %s2566_s24  ;;  %1404 = vrot.lane.b32.xlu0 %v3195_v18, %s2566_s24 }
 0x3e3   :  { %1494 = vrot.lane.b32.xlu1 %v3204_v50, %s2567_s25  ;;  %1496 = vrot.lane.b32.xlu0 %v3240_v17, %s2567_s25 }
 0x3e7   :  { %1492 = vrot.lane.b32.xlu1 %v3195_v18, %s2567_s25  ;;  %1200 = vrot.lane.b32.xlu0 %v3240_v17, %s2561_s20 }
 0x3eb   :  { %1202 = vrot.lane.b32.xlu1 %v3247_v48, %s2561_s20  ;;  %1288 = vrot.lane.b32.xlu0 %v3240_v17, %s2560_s19 }
 0x3ef   :  { %1290 = vrot.lane.b32.xlu1 %v3247_v48, %s2560_s19  ;;  %1168 = vrot.lane.b32.xlu0 %v3240_v17, %s2562_s6 }
 0x3f3   :  { %1170 = vrot.lane.b32.xlu1 %v3247_v48, %s2562_s6  ;;  %1256 = vrot.lane.b32.xlu0 %v3240_v17, %s2563_s21 }
 0x3f7   :  { %1258 = vrot.lane.b32.xlu1 %v3247_v48, %s2563_s21  ;;  %1354 = vrot.lane.b32.xlu0 %v3247_v48, %s2564_s22 }
 0x3fb   :  { %1356 = vrot.lane.b32.xlu1 %v3305_v19, %s2564_s22  ;;  %1442 = vrot.lane.b32.xlu0 %v3247_v48, %s2565_s23 }
 0x3ff   :  { %1444 = vrot.lane.b32.xlu1 %v3305_v19, %s2565_s23  ;;  %1410 = vrot.lane.b32.xlu0 %v3247_v48, %s2566_s24 }
 0x403   :  { %1412 = vrot.lane.b32.xlu1 %v3305_v19, %s2566_s24  ;;  %1498 = vrot.lane.b32.xlu0 %v3247_v48, %s2567_s25 }
 0x407   :  { %1500 = vrot.lane.b32.xlu1 %v3305_v19, %s2567_s25  ;;  %1204 = vrot.lane.b32.xlu0 %v3305_v19, %s2561_s20 }
 0x40b   :  { %1206 = vrot.lane.b32.xlu1 %v3310_v25, %s2561_s20  ;;  %1292 = vrot.lane.b32.xlu0 %v3305_v19, %s2560_s19 }
 0x40f   :  { %1294 = vrot.lane.b32.xlu1 %v3310_v25, %s2560_s19  ;;  %1172 = vrot.lane.b32.xlu0 %v3305_v19, %s2562_s6 }
 0x413   :  { %1174 = vrot.lane.b32.xlu1 %v3310_v25, %s2562_s6  ;;  %1260 = vrot.lane.b32.xlu0 %v3305_v19, %s2563_s21 }
 0x417   :  { %1262 = vrot.lane.b32.xlu1 %v3310_v25, %s2563_s21  ;;  %1358 = vrot.lane.b32.xlu0 %v3310_v25, %s2564_s22 }
 0x41b   :  { %1360 = vrot.lane.b32.xlu1 %v3330_v0, %s2564_s22  ;;  %1446 = vrot.lane.b32.xlu0 %v3310_v25, %s2565_s23 }
 0x41f   :  { %1448 = vrot.lane.b32.xlu1 %v3330_v0, %s2565_s23  ;;  %1414 = vrot.lane.b32.xlu0 %v3310_v25, %s2566_s24 }
 0x423   :  { %1416 = vrot.lane.b32.xlu1 %v3330_v0, %s2566_s24  ;;  %1502 = vrot.lane.b32.xlu0 %v3310_v25, %s2567_s25 }
 0x427   :  { %1504 = vrot.lane.b32.xlu1 %v3330_v0, %s2567_s25  ;;  %1208 = vrot.lane.b32.xlu0 %v3330_v0, %s2561_s20 }
 0x42b   :  { %1296 = vrot.lane.b32.xlu1 %v3330_v0, %s2560_s19  ;;  %1176 = vrot.lane.b32.xlu0 %v3330_v0, %s2562_s6 }
 0x42f   :  { %1264 = vrot.lane.b32.xlu1 %v3330_v0, %s2563_s21  ;;  %1362 = vrot.lane.b32.xlu0 %v3335_v57, %s2564_s22 }
 0x433   :  { %1450 = vrot.lane.b32.xlu1 %v3335_v57, %s2565_s23  ;;  %1418 = vrot.lane.b32.xlu0 %v3335_v57, %s2566_s24 }
 0x437   :  { %1506 = vrot.lane.b32.xlu1 %v3335_v57, %s2567_s25  ;;  %1606 = vperm.xlu0 %2340, %v1161_v1  }
 0x449   :  { %v3439_v26 = vpop.permute.xlu1 %1298  ;;  %v3441_v29 = vpop.permute.xlu0 %1210 }
 0x44a   :  { %v1307_v44 = vsel %vm286_vm0, %v3439_v26, %v3256_v40  ;;  %v1219_v49 = vsel %vm196_vm1, %v3441_v29, %v3252_v9 }
 0x44b   :  { %v1316_v11 = vrot.slane %v1307_v44, 4  ;;  %v1228_v52 = vrot.slane %v1219_v49, 4 }
 0x44d   :  { %1332 = vst [vmem:[#allocation2 + $0x40] sm:$0xf0] %v1316_v11  ;;  %1244 = vst [vmem:[#allocation2] sm:$0xf0] %v1228_v52  ;;  %v3451_v53 = vpop.permute.xlu1 %1266  ;;  %v3453_v14 = vpop.permute.xlu0 %1178  ;;  %v2404_v52 = vld [vmem:[#allocation6 + $0x108] sm:$0xf] }
 0x44e   :  { %v1275_v12 = vsel %vm253_vm3, %v3451_v53, %v3258_v7  ;;  %v1187_v40 = vsel %vm163_vm2, %v3453_v14, %v3254_v32 }
 0x44f   :  { %1276 = vst [vmem:[#allocation2 + $0x40] sm:$0xf] %v1275_v12  ;;  %1188 = vst [vmem:[#allocation2] sm:$0xf] %v1187_v40 }
 0x451   :  { %v3463_v9 = vpop.permute.xlu1 %1408  ;;  %v3465_v16 = vpop.permute.xlu0 %1404 }
 0x452   :  { %v1425_v54 = vsel %vm408_vm6, %v1407_v59, %v3463_v9  ;;  %v1426_v56 = vsel %vm408_vm6, %v3465_v16, %v1407_v59 }
 0x453   :  { %1429 = vst [vmem:[#allocation2 + $0xc8] sm:$0xf] %v1425_v54  ;;  %1428 = vst [vmem:[#allocation2 + $0xc0] sm:$0xf] %v1426_v56 }
 0x455   :  { %v1495_v7 = vpop.permute.xlu1 %1494  ;;  %v3473_v4 = vpop.permute.xlu0 %1496 }
 0x456   :  { %v1513_v32 = vsel %vm498_vm7, %v1495_v7, %v3473_v4  ;;  %v1524_v60 = vld [vmem:[#allocation2] sm:$0xff] }
 0x457   :  { %v1532_v3 = vld [vmem:[#allocation2 + $0x40] sm:$0xff]  ;;  %1517 = vst [vmem:[#allocation2 + $0x108] sm:$0xf] %v1513_v32  ;;  %v1564_v13 = vmul.f32 %v2398_v61, %v1524_v60 }
 0x458   :  { %v1572_v27 = vmul.f32 %v2399_v5, %v1532_v3  ;;  %v2405_v60 = vld [vmem:[#allocation6 + $0x100] sm:$0xf]  ;;  %v3503_v61 = vld [vmem:[#allocation9] sm:$0xf] }
 0x459   :  { %v3478_v63 = vpop.permute.xlu1 %1492  ;;  %v1201_v30 = vpop.permute.xlu0 %1200 }
 0x45a   :  { %v2245_v6 = vpack.c.bf16 %v1572_v27, %v1564_v13  ;;  %v1514_v21 = vsel %vm498_vm7, %v3478_v63, %v1495_v7  ;;  %v1217_v15 = vsel %vm196_vm1, %v3266_v39, %v1201_v30  ;;  %v1549_v22 = vld [vmem:[#allocation2 + $0xc8] sm:$0xff]  ;;  %v1548_v23 = vld [vmem:[#allocation2 + $0xc0] sm:$0xff] }
 0x45b   :  { %1516 = vst [vmem:[#allocation2 + $0x100] sm:$0xf] %v1514_v21  ;;  %v1230_v42 = vrot.slane %v1217_v15, 4  ;;  %v1589_v31 = vmul.f32 %v2402_v28, %v1549_v22  ;;  %v1588_v43 = vmul.f32 %v2403_v41, %v1548_v23 }
 0x45c   :  { %2246 = vmatpush1.bf16.msra.mxu0 %v2245_v6 }
 0x45d   :  { %1246 = vst [vmem:[#allocation2 + $0x10] sm:$0xf0] %v1230_v42  ;;  %v3486_v45 = vpop.permute.xlu1 %1202  ;;  %v1289_v46 = vpop.permute.xlu0 %1288  ;;  %v2247_v36 = vpack.c.bf16 %v1589_v31, %v1581_v35  ;;  %v2249_v1 = vpack.c.bf16 %v1588_v43, %v1580_v34 }
 0x45e   :  { %v1216_v39 = vsel %vm196_vm1, %v1201_v30, %v3486_v45  ;;  %v1305_v59 = vsel %vm286_vm0, %v3264_v38, %v1289_v46  ;;  %v1557_v44 = vld [vmem:[#allocation2 + $0x108] sm:$0xf] }
 0x45f   :  { %v1231_v49 = vrot.slane %v1216_v39, 4  ;;  %v1318_v11 = vrot.slane %v1305_v59, 4  ;;  %2248 = vmatprep.subr.bf16.mxu0 %v2247_v36  ;;  %v1597_v12 = vmul.f32 %v2404_v52, %v1557_v44  ;;  %v2408_v59 = vld [vmem:[#allocation6 + $0x58] sm:$0xff] }
 0x460   :  { %2250 = vmatpush1.bf16.msra.mxu0 %v2249_v1  ;;  %v2407_v1 = vld [vmem:[#allocation6 + $0x18] sm:$0xff] }
 0x461   :  { %1247 = vst [vmem:[#allocation2 + $0x18] sm:$0xf0] %v1231_v49  ;;  %1334 = vst [vmem:[#allocation2 + $0x50] sm:$0xf0] %v1318_v11  ;;  %v3494_v40 = vpop.permute.xlu1 %1290  ;;  %2199 = vmatprep.subr.msk.mxu0 %vm604_vm8, %v1597_v12  ;;  %v1169_v54 = vpop.permute.xlu0 %1168  ;;  %v2409_v49 = vld [vmem:[#allocation6 + $0x10] sm:$0xff] }
 0x462   :  { %v1304_v56 = vsel %vm286_vm0, %v1289_v46, %v3494_v40  ;;  %v1185_v38 = vsel %vm163_vm2, %v3279_v47, %v1169_v54  ;;  %v1556_v7 = vld [vmem:[#allocation2 + $0x100] sm:$0xf] }
 0x463   :  { %v1319_v32 = vrot.slane %v1304_v56, 4  ;;  %1190 = vst [vmem:[#allocation2 + $0x10] sm:$0xf] %v1185_v38  ;;  %v1596_v3 = vmul.f32 %v2405_v60, %v1556_v7 }
 0x465   :  { %1335 = vst [vmem:[#allocation2 + $0x58] sm:$0xf0] %v1319_v32  ;;  %v3505_v13 = vpop.permute.xlu1 %1170  ;;  %2200 = vmatpush1.msk.msra.mxu0 %vm604_vm8, %v1596_v3  ;;  %v1257_v5 = vpop.permute.xlu0 %1256 }
 0x466   :  { %v1184_v27 = vsel %vm163_vm2, %v1169_v54, %v3505_v13  ;;  %v1273_v47 = vsel %vm253_vm3, %v3294_v55, %v1257_v5  ;;  %2201 = vmatmul.mubr.msk.f32.vlgmr.msra.gmra.mrb[4].mxu0 %vm600_vm9, %v3503_v61 }
 0x467   :  { %1191 = vst [vmem:[#allocation2 + $0x18] sm:$0xf] %v1184_v27  ;;  %1278 = vst [vmem:[#allocation2 + $0x50] sm:$0xf] %v1273_v47  ;;  %1842 = vmatprep.mubr.f32.mxu0 %v2568_v8 }
 0x469   :  { %v3517_v20 = vpop.permute.xlu1 %1258  ;;  %v1355_v51 = vpop.permute.xlu0 %1354 }
 0x46a   :  { %v1272_v30 = vsel %vm253_vm3, %v1257_v5, %v3517_v20  ;;  %v1368_v6 = vsel %vm351_vm4, %v3313_v33, %v1355_v51  ;;  %v1526_v28 = vld [vmem:[#allocation2 + $0x10] sm:$0xff] }
 0x46b   :  { %1279 = vst [vmem:[#allocation2 + $0x58] sm:$0xf] %v1272_v30  ;;  %v1382_v55 = vrot.slane %v1368_v6, 4  ;;  %v1566_v11 = vmul.f32 %v2409_v49, %v1526_v28  ;;  %v2413_v28 = vld [vmem:[#allocation6 + $0x90] sm:$0xff] }
 0x46d   :  { %1398 = vst [vmem:[#allocation2 + $0x90] sm:$0xf0] %v1382_v55  ;;  %v3525_v21 = vpop.permute.xlu1 %1356  ;;  %v1443_v15 = vpop.permute.xlu0 %1442 }
 0x46e   :  { %v1367_v22 = vsel %vm351_vm4, %v1355_v51, %v3525_v21  ;;  %v1456_v23 = vsel %vm441_vm5, %v3318_v24, %v1443_v15  ;;  %v1534_v42 = vld [vmem:[#allocation2 + $0x50] sm:$0xff]  ;;  %v1527_v62 = vld [vmem:[#allocation2 + $0x18] sm:$0xff] }
 0x46f   :  { %v1383_v2 = vrot.slane %v1367_v22, 4  ;;  %v1470_v34 = vrot.slane %v1456_v23, 4  ;;  %v2406_v24 = vld [vmem:[#allocation6 + $0x50] sm:$0xff]  ;;  %v1567_v39 = vmul.f32 %v2407_v1, %v1527_v62  ;;  %v2412_v62 = vld [vmem:[#allocation6 + $0xd8] sm:$0xff] }
 0x470   :  { %v1574_v46 = vmul.f32 %v2406_v24, %v1534_v42  ;;  %v2410_v22 = vld [vmem:[#allocation6 + $0xd0] sm:$0xff] }
 0x471   :  { %1399 = vst [vmem:[#allocation2 + $0x98] sm:$0xf0] %v1383_v2  ;;  %1486 = vst [vmem:[#allocation2 + $0xd0] sm:$0xf0] %v1470_v34  ;;  %v3533_v33 = vpop.permute.xlu1 %1444  ;;  %v1411_v35 = vpop.permute.xlu0 %1410  ;;  %v2411_v34 = vld [vmem:[#allocation6 + $0x98] sm:$0xff] }
 0x472   :  { %v1455_v31 = vsel %vm441_vm5, %v1443_v15, %v3533_v33  ;;  %v1424_v41 = vsel %vm408_vm6, %v3463_v9, %v1411_v35  ;;  %v1535_v43 = vld [vmem:[#allocation2 + $0x58] sm:$0xff]  ;;  %v2253_v38 = vpack.c.bf16 %v1574_v46, %v1566_v11 }
 0x473   :  { %v1471_v36 = vrot.slane %v1455_v31, 4  ;;  %1430 = vst [vmem:[#allocation2 + $0xd0] sm:$0xf] %v1424_v41  ;;  %v1575_v44 = vmul.f32 %v2408_v59, %v1535_v43  ;;  %v2414_v59 = vld [vmem:[#allocation6 + $0x118] sm:$0xf] }
 0x474   :  { %v1542_v30 = vld [vmem:[#allocation2 + $0x90] sm:$0xff] }
 0x475   :  { %1487 = vst [vmem:[#allocation2 + $0xd8] sm:$0xf0] %v1471_v36  ;;  %v3541_v52 = vpop.permute.xlu1 %1412  ;;  %v1499_v12 = vpop.permute.xlu0 %1498  ;;  %v2251_v54 = vpack.c.bf16 %v1575_v44, %v1567_v39  ;;  %v1582_v31 = vmul.f32 %v2413_v28, %v1542_v30  ;;  %v2418_v28 = vld [vmem:[#allocation6 + $0x68] sm:$0xff] }
 0x476   :  { %v1423_v9 = vsel %vm408_vm6, %v1411_v35, %v3541_v52  ;;  %v1512_v56 = vsel %vm498_vm7, %v3473_v4, %v1499_v12 }
 0x477   :  { %1431 = vst [vmem:[#allocation2 + $0xd8] sm:$0xf] %v1423_v9  ;;  %1518 = vst [vmem:[#allocation2 + $0x110] sm:$0xf] %v1512_v56  ;;  %2252 = vmatprep.subr.bf16.mxu1 %v2251_v54  ;;  %v2415_v9 = vld [vmem:[#allocation6 + $0x110] sm:$0xf] }
 0x478   :  { %2254 = vmatpush1.bf16.msra.mxu1 %v2253_v38  ;;  %v1543_v4 = vld [vmem:[#allocation2 + $0x98] sm:$0xff] }
 0x479   :  { %v3549_v7 = vpop.permute.xlu1 %1500  ;;  %v1205_v32 = vpop.permute.xlu0 %1204  ;;  %v1583_v42 = vmul.f32 %v2411_v34, %v1543_v4 }
 0x47a   :  { %v1511_v60 = vsel %vm498_vm7, %v1499_v12, %v3549_v7  ;;  %v1215_v3 = vsel %vm196_vm1, %v3486_v45, %v1205_v32  ;;  %v1550_v27 = vld [vmem:[#allocation2 + $0xd0] sm:$0xff] }
 0x47b   :  { %1519 = vst [vmem:[#allocation2 + $0x118] sm:$0xf] %v1511_v60  ;;  %v1232_v5 = vrot.slane %v1215_v3, 4  ;;  %v1590_v45 = vmul.f32 %v2410_v22, %v1550_v27 }
 0x47d   :  { %1248 = vst [vmem:[#allocation2 + $0x20] sm:$0xf0] %v1232_v5  ;;  %v3557_v47 = vpop.permute.xlu1 %1206  ;;  %v1293_v51 = vpop.permute.xlu0 %1292  ;;  %v2257_v36 = vpack.c.bf16 %v1590_v45, %v1582_v31 }
 0x47e   :  { %v1214_v6 = vsel %vm196_vm1, %v1205_v32, %v3557_v47  ;;  %v1303_v55 = vsel %vm286_vm0, %v3494_v40, %v1293_v51  ;;  %v1551_v15 = vld [vmem:[#allocation2 + $0xd8] sm:$0xff]  ;;  %v1558_v49 = vld [vmem:[#allocation2 + $0x110] sm:$0xf] }
 0x47f   :  { %v1233_v23 = vrot.slane %v1214_v6, 4  ;;  %v1320_v2 = vrot.slane %v1303_v55, 4  ;;  %v1591_v35 = vmul.f32 %v2412_v62, %v1551_v15  ;;  %v1598_v56 = vmul.f32 %v2415_v9, %v1558_v49  ;;  %v2417_v62 = vld [vmem:[#allocation6 + $0x28] sm:$0xff] }
 0x481   :  { %1249 = vst [vmem:[#allocation2 + $0x28] sm:$0xf0] %v1233_v23  ;;  %1336 = vst [vmem:[#allocation2 + $0x60] sm:$0xf0] %v1320_v2  ;;  %v3565_v41 = vpop.permute.xlu1 %1294  ;;  %v1173_v43 = vpop.permute.xlu0 %1172  ;;  %v2255_v24 = vpack.c.bf16 %v1591_v35, %v1583_v42 }
 0x482   :  { %v1302_v40 = vsel %vm286_vm0, %v1293_v51, %v3565_v41  ;;  %v1183_v46 = vsel %vm163_vm2, %v3505_v13, %v1173_v43  ;;  %v1559_v1 = vld [vmem:[#allocation2 + $0x118] sm:$0xf] }
 0x483   :  { %v1321_v39 = vrot.slane %v1302_v40, 4  ;;  %1192 = vst [vmem:[#allocation2 + $0x20] sm:$0xf] %v1183_v46  ;;  %2256 = vmatprep.subr.bf16.mxu1 %v2255_v24  ;;  %v1599_v44 = vmul.f32 %v2414_v59, %v1559_v1 }
 0x484   :  { %2258 = vmatpush1.bf16.msra.mxu1 %v2257_v36 }
 0x485   :  { %1337 = vst [vmem:[#allocation2 + $0x68] sm:$0xf0] %v1321_v39  ;;  %v3573_v11 = vpop.permute.xlu1 %1174  ;;  %2202 = vmatprep.subr.msk.mxu1 %vm604_vm8, %v1599_v44  ;;  %v1261_v12 = vpop.permute.xlu0 %1260 }
 0x486   :  { %v1182_v54 = vsel %vm163_vm2, %v1173_v43, %v3573_v11  ;;  %v1271_v13 = vsel %vm253_vm3, %v3517_v20, %v1261_v12  ;;  %v2419_v43 = vld [vmem:[#allocation6 + $0x20] sm:$0xff] }
 0x487   :  { %1193 = vst [vmem:[#allocation2 + $0x28] sm:$0xf] %v1182_v54  ;;  %1280 = vst [vmem:[#allocation2 + $0x60] sm:$0xf] %v1271_v13 }
 0x488   :  { %2203 = vmatpush1.msk.msra.mxu1 %vm604_vm8, %v1598_v56 }
 0x489   :  { %v3583_v38 = vpop.permute.xlu1 %1262  ;;  %2204 = vmatmul.mubr.msk.f32.vlgmr.msra.gmra.mrb[4].mxu1 %vm600_vm9, %v3503_v61  ;;  %v1359_v32 = vpop.permute.xlu0 %1358 }
 0x48a   :  { %v1270_v60 = vsel %vm253_vm3, %v1261_v12, %v3583_v38  ;;  %v1366_v20 = vsel %vm351_vm4, %v3525_v21, %v1359_v32  ;;  %1913 = vmatprep.mubr.f32.mxu1 %v2568_v8  ;;  %v1528_v22 = vld [vmem:[#allocation2 + $0x20] sm:$0xff] }
 0x48b   :  { %1281 = vst [vmem:[#allocation2 + $0x68] sm:$0xf] %v1270_v60  ;;  %v1384_v3 = vrot.slane %v1366_v20, 4  ;;  %v1568_v24 = vmul.f32 %v2419_v43, %v1528_v22  ;;  %v2422_v22 = vld [vmem:[#allocation6 + $0xa8] sm:$0xff] }
 0x48d   :  { %1400 = vst [vmem:[#allocation2 + $0xa0] sm:$0xf0] %v1384_v3  ;;  %v3594_v5 = vpop.permute.xlu1 %1360  ;;  %v1447_v27 = vpop.permute.xlu0 %1446  ;;  %v2420_v3 = vld [vmem:[#allocation6 + $0xa0] sm:$0xff] }
 0x48e   :  { %v1365_v4 = vsel %vm351_vm4, %v1359_v32, %v3594_v5  ;;  %v1454_v51 = vsel %vm441_vm5, %v3533_v33, %v1447_v27  ;;  %v1536_v55 = vld [vmem:[#allocation2 + $0x60] sm:$0xff]  ;;  %v1529_v21 = vld [vmem:[#allocation2 + $0x28] sm:$0xff] }
 0x48f   :  { %v1385_v30 = vrot.slane %v1365_v4, 4  ;;  %v1472_v6 = vrot.slane %v1454_v51, 4  ;;  %v2416_v33 = vld [vmem:[#allocation6 + $0x60] sm:$0xff]  ;;  %v1569_v35 = vmul.f32 %v2417_v62, %v1529_v21 }
 0x490   :  { %v1576_v34 = vmul.f32 %v2416_v33, %v1536_v55  ;;  %v2421_v4 = vld [vmem:[#allocation6 + $0xe0] sm:$0xff] }
 0x491   :  { %1401 = vst [vmem:[#allocation2 + $0xa8] sm:$0xf0] %v1385_v30  ;;  %1488 = vst [vmem:[#allocation2 + $0xe0] sm:$0xf0] %v1472_v6  ;;  %v3602_v8 = vpop.permute.xlu1 %1448  ;;  %v1415_v15 = vpop.permute.xlu0 %1414 }
 0x492   :  { %v1453_v45 = vsel %vm441_vm5, %v1447_v27, %v3602_v8  ;;  %v1422_v23 = vsel %vm408_vm6, %v3541_v52, %v1415_v15  ;;  %v1537_v2 = vld [vmem:[#allocation2 + $0x68] sm:$0xff]  ;;  %v2261_v39 = vpack.c.bf16 %v1576_v34, %v1568_v24 }
 0x493   :  { %v1473_v42 = vrot.slane %v1453_v45, 4  ;;  %1432 = vst [vmem:[#allocation2 + $0xe0] sm:$0xf] %v1422_v23  ;;  %v1577_v31 = vmul.f32 %v2418_v28, %v1537_v2 }
 0x494   :  { %v1544_v54 = vld [vmem:[#allocation2 + $0xa0] sm:$0xff] }
 0x495   :  { %1489 = vst [vmem:[#allocation2 + $0xe8] sm:$0xf0] %v1473_v42  ;;  %v3610_v40 = vpop.permute.xlu1 %1416  ;;  %v1503_v46 = vpop.permute.xlu0 %1502  ;;  %v2259_v36 = vpack.c.bf16 %v1577_v31, %v1569_v35  ;;  %v1584_v27 = vmul.f32 %v2420_v3, %v1544_v54  ;;  %v2429_v3 = vld [vmem:[#allocation6 + $0x70] sm:$0xff] }
 0x496   :  { %v1421_v52 = vsel %vm408_vm6, %v1415_v15, %v3610_v40  ;;  %v1510_v1 = vsel %vm498_vm7, %v3549_v7, %v1503_v46 }
 0x497   :  { %1433 = vst [vmem:[#allocation2 + $0xe8] sm:$0xf] %v1421_v52  ;;  %1520 = vst [vmem:[#allocation2 + $0x120] sm:$0xf] %v1510_v1  ;;  %2260 = vmatprep.subr.bf16.mxu0 %v2259_v36 }
 0x498   :  { %2262 = vmatpush1.bf16.msra.mxu0 %v2261_v39  ;;  %v1545_v32 = vld [vmem:[#allocation2 + $0xa8] sm:$0xff] }
 0x499   :  { %v3618_v59 = vpop.permute.xlu1 %1504  ;;  %v1209_v44 = vpop.permute.xlu0 %1208  ;;  %v1585_v45 = vmul.f32 %v2422_v22, %v1545_v32  ;;  %v2433_v22 = vld [vmem:[#allocation6 + $0xf0] sm:$0xff] }
 0x49a   :  { %v1509_v49 = vsel %vm498_vm7, %v1503_v46, %v3618_v59  ;;  %v1212_v12 = vsel %vm196_vm1, %v1209_v44, %v3441_v29  ;;  %v1213_v7 = vsel %vm196_vm1, %v3557_v47, %v1209_v44  ;;  %v1552_v13 = vld [vmem:[#allocation2 + $0xe0] sm:$0xff] }
 0x49b   :  { %1521 = vst [vmem:[#allocation2 + $0x128] sm:$0xf] %v1509_v49  ;;  %v1234_v9 = vrot.slane %v1213_v7, 4  ;;  %v1235_v56 = vrot.slane %v1212_v12, 4  ;;  %v1592_v51 = vmul.f32 %v2421_v4, %v1552_v13  ;;  %v2425_v46 = vld [vmem:[#allocation6 + $0x120] sm:$0xf] }
 0x49c   :  { %v2426_v13 = vld [vmem:[#allocation6 + $0x38] sm:$0xff] }
 0x49d   :  { %1250 = vst [vmem:[#allocation2 + $0x30] sm:$0xf0] %v1234_v9  ;;  %1251 = vst [vmem:[#allocation2 + $0x38] sm:$0xf0] %v1235_v56  ;;  %v1297_v60 = vpop.permute.xlu1 %1296  ;;  %v1177_v20 = vpop.permute.xlu0 %1176  ;;  %v2265_v34 = vpack.c.bf16 %v1592_v51, %v1584_v27  ;;  %v2427_v56 = vld [vmem:[#allocation6 + $0x78] sm:$0xff] }
 0x49e   :  { %v1300_v29 = vsel %vm286_vm0, %v1297_v60, %v3439_v26  ;;  %v1301_v47 = vsel %vm286_vm0, %v3565_v41, %v1297_v60  ;;  %v1180_v30 = vsel %vm163_vm2, %v1177_v20, %v3453_v14  ;;  %v1181_v6 = vsel %vm163_vm2, %v3573_v11, %v1177_v20  ;;  %v1553_v55 = vld [vmem:[#allocation2 + $0xe8] sm:$0xff]  ;;  %v1560_v28 = vld [vmem:[#allocation2 + $0x120] sm:$0xf]  ;;  %v2428_v60 = vld [vmem:[#allocation6 + $0x30] sm:$0xff] }
 0x49f   :  { %v1322_v21 = vrot.slane %v1301_v47, 4  ;;  %v1323_v15 = vrot.slane %v1300_v29, 4  ;;  %1194 = vst [vmem:[#allocation2 + $0x30] sm:$0xf] %v1181_v6  ;;  %1195 = vst [vmem:[#allocation2 + $0x38] sm:$0xf] %v1180_v30  ;;  %v1600_v36 = vmul.f32 %v2425_v46, %v1560_v28 }
 0x4a0   :  { %v2423_v26 = vld [vmem:[#allocation6 + $0xe8] sm:$0xff]  ;;  %v2430_v47 = vld [vmem:[#allocation6 + $0xb8] sm:$0xff] }
 0x4a1   :  { %v1593_v23 = vmul.f32 %v2423_v26, %v1553_v55  ;;  %1338 = vst [vmem:[#allocation2 + $0x70] sm:$0xf0] %v1322_v21  ;;  %1339 = vst [vmem:[#allocation2 + $0x78] sm:$0xf0] %v1323_v15  ;;  %v1265_v41 = vpop.permute.xlu1 %1264  ;;  %v1363_v2 = vpop.permute.xlu0 %1362  ;;  %v2431_v6 = vld [vmem:[#allocation6 + $0xf8] sm:$0xff]  ;;  %v2432_v21 = vld [vmem:[#allocation6 + $0xb0] sm:$0xff] }
 0x4a2   :  { %v1268_v14 = vsel %vm253_vm3, %v1265_v41, %v3451_v53  ;;  %v1269_v11 = vsel %vm253_vm3, %v3583_v38, %v1265_v41  ;;  %v1364_v42 = vsel %vm351_vm4, %v3594_v5, %v1363_v2  ;;  %v1371_v62 = vsel %vm351_vm4, %v1363_v2, %v3262_v58  ;;  %v1561_v35 = vld [vmem:[#allocation2 + $0x128] sm:$0xf]  ;;  %v2434_v2 = vld [vmem:[#allocation6 + $0x138] sm:$0xf] }
 0x4a3   :  { %v2263_v33 = vpack.c.bf16 %v1593_v23, %v1585_v45  ;;  %1282 = vst [vmem:[#allocation2 + $0x70] sm:$0xf] %v1269_v11  ;;  %1283 = vst [vmem:[#allocation2 + $0x78] sm:$0xf] %v1268_v14  ;;  %v1386_v31 = vrot.slane %v1364_v42, 4  ;;  %v1387_v43 = vrot.slane %v1371_v62, 4 }
 0x4a4   :  { %v2424_v53 = vld [vmem:[#allocation6 + $0x128] sm:$0xf]  ;;  %v2435_v14 = vld [vmem:[#allocation6 + $0x130] sm:$0xf] }
 0x4a5   :  { %2264 = vmatprep.subr.bf16.mxu0 %v2263_v33  ;;  %v1601_v24 = vmul.f32 %v2424_v53, %v1561_v35  ;;  %1402 = vst [vmem:[#allocation2 + $0xb0] sm:$0xf0] %v1386_v31  ;;  %1403 = vst [vmem:[#allocation2 + $0xb8] sm:$0xf0] %v1387_v43  ;;  %v1451_v38 = vpop.permute.xlu1 %1450  ;;  %v1419_v5 = vpop.permute.xlu0 %1418 }
 0x4a6   :  { %2266 = vmatpush1.bf16.msra.mxu0 %v2265_v34  ;;  %v1452_v58 = vsel %vm441_vm5, %v3602_v8, %v1451_v38  ;;  %v1459_v52 = vsel %vm441_vm5, %v1451_v38, %v3260_v37  ;;  %v1420_v1 = vsel %vm408_vm6, %v3610_v40, %v1419_v5  ;;  %v1427_v39 = vsel %vm408_vm6, %v1419_v5, %v3465_v16  ;;  %v1531_v12 = vld [vmem:[#allocation2 + $0x38] sm:$0xff]  ;;  %v1530_v8 = vld [vmem:[#allocation2 + $0x30] sm:$0xff] }
 0x4a7   :  { %2205 = vmatprep.subr.msk.mxu0 %vm604_vm8, %v1601_v24  ;;  %v1474_v44 = vrot.slane %v1452_v58, 4  ;;  %v1475_v49 = vrot.slane %v1459_v52, 4  ;;  %1434 = vst [vmem:[#allocation2 + $0xf0] sm:$0xf] %v1420_v1  ;;  %1435 = vst [vmem:[#allocation2 + $0xf8] sm:$0xf] %v1427_v39  ;;  %v1571_v9 = vmul.f32 %v2426_v13, %v1531_v12  ;;  %v1570_v20 = vmul.f32 %v2428_v60, %v1530_v8 }
 0x4a9   :  { %1490 = vst [vmem:[#allocation2 + $0xf0] sm:$0xf0] %v1474_v44  ;;  %1491 = vst [vmem:[#allocation2 + $0xf8] sm:$0xf0] %v1475_v49  ;;  %v1507_v7 = vpop.permute.xlu1 %1506 }
 0x4aa   :  { %2206 = vmatpush1.msk.msra.mxu0 %vm604_vm8, %v1600_v36  ;;  %v1508_v37 = vsel %vm498_vm7, %v3618_v59, %v1507_v7  ;;  %v1515_v16 = vsel %vm498_vm7, %v1507_v7, %v3478_v63  ;;  %v1539_v40 = vld [vmem:[#allocation2 + $0x78] sm:$0xff]  ;;  %v1538_v54 = vld [vmem:[#allocation2 + $0x70] sm:$0xff] }
 0x4ab   :  { %2207 = vmatmul.mubr.msk.f32.vlgmr.msra.gmra.mrb[6].mxu0 %vm600_vm9, %v3503_v61  ;;  %1522 = vst [vmem:[#allocation2 + $0x130] sm:$0xf] %v1508_v37  ;;  %1523 = vst [vmem:[#allocation2 + $0x138] sm:$0xf] %v1515_v16  ;;  %v1579_v32 = vmul.f32 %v2427_v56, %v1539_v40  ;;  %v1578_v27 = vmul.f32 %v2429_v3, %v1538_v54 }
 0x4ac   :  { %v1547_v29 = vld [vmem:[#allocation2 + $0xb8] sm:$0xff]  ;;  %v1546_v59 = vld [vmem:[#allocation2 + $0xb0] sm:$0xff] }
 0x4ad   :  { %v2267_v4 = vpack.c.bf16 %v1579_v32, %v1571_v9  ;;  %v2269_v51 = vpack.c.bf16 %v1578_v27, %v1570_v20  ;;  %v1587_v30 = vmul.f32 %v2430_v47, %v1547_v29  ;;  %v1586_v15 = vmul.f32 %v2432_v21, %v1546_v59 }
 0x4af   :  { %2268 = vmatprep.subr.bf16.mxu1 %v2267_v4 }
 0x4b0   :  { %2270 = vmatpush1.bf16.msra.mxu1 %v2269_v51  ;;  %v1555_v10 = vld [vmem:[#allocation2 + $0xf8] sm:$0xff]  ;;  %v1554_v63 = vld [vmem:[#allocation2 + $0xf0] sm:$0xff] }
 0x4b1   :  { %v1595_v55 = vmul.f32 %v2431_v6, %v1555_v10  ;;  %v1594_v45 = vmul.f32 %v2433_v22, %v1554_v63 }
 0x4b2   :  { %v1563_v26 = vld [vmem:[#allocation2 + $0x138] sm:$0xf]  ;;  %v1562_v34 = vld [vmem:[#allocation2 + $0x130] sm:$0xf] }
 0x4b3   :  { %v2271_v23 = vpack.c.bf16 %v1595_v55, %v1587_v30  ;;  %v2273_v41 = vpack.c.bf16 %v1594_v45, %v1586_v15  ;;  %v1603_v33 = vmul.f32 %v2434_v2, %v1563_v26  ;;  %v1602_v11 = vmul.f32 %v2435_v14, %v1562_v34 }
 0x4b5   :  { %2272 = vmatprep.subr.bf16.mxu1 %v2271_v23 }
 0x4b6   :  { %2274 = vmatpush1.bf16.msra.mxu1 %v2273_v41  ;;  %v3679_v42 = vpop.permute.xlu0 %1606 }
 0x4b7   :  { %2208 = vmatprep.subr.msk.mxu1 %vm604_vm8, %v1603_v33 }
 0x4ba   :  { %2209 = vmatpush1.msk.msra.mxu1 %vm604_vm8, %v1602_v11 }
 0x4bb   :  { %2210 = vmatmul.mubr.msk.f32.vlgmr.msra.gmra.mrb[6].mxu1 %vm600_vm9, %v3503_v61 }
 0x539   :  { %v1702_v62 = vpop.f32.mrb[4].mxu0 }
 0x53a   :  { %v1703_v35 = vadd.f32 %v1702_v62, %v3679_v42  ;;  %v1704_v28 = vpop.f32.mrb[5].mxu0 }
 0x53b   :  { %v1705_v31 = vadd.f32 %v1704_v28, %v3679_v42 }
 0x53c   :  { %v1928_v43 = vmul.f32 0.70710677, %v1703_v35  ;;  %v1920_v5 = vmul.f32 0.5, %v1703_v35 }
 0x53d   :  { %v1929_v53 = vmul.f32 0.70710677, %v1705_v31  ;;  %v1921_v36 = vmul.f32 0.5, %v1705_v31 }
 0x53e   :  { %2372 = verf.f32 %v1928_v43 }
 0x53f   :  { %2374 = verf.f32 %v1929_v53 }
 0x548   :  { %v2373_v24 = vpop.eup %2372 }
 0x549   :  { %v2375_v38 = vpop.eup %2374  ;;  %v1944_v46 = vadd.f32 1.0, %v2373_v24 }
 0x54a   :  { %v1945_v58 = vadd.f32 1.0, %v2375_v38 }
 0x54b   :  { %v3683_v52 = vmul.f32 %v1944_v46, %v1920_v5 }
 0x54c   :  { %v3685_v61 = vmul.f32 %v1945_v58, %v1921_v36 }
 0x54d   :  { %v1968_v1 = vsel %vm604_vm8, %v3683_v52, 0.0  ;;  %v1960_v39 = vmul.f32 %v3683_v52, %v3683_v52 }
 0x54e   :  { %v1969_v44 = vsel %vm604_vm8, %v3685_v61, 0.0  ;;  %v1961_v49 = vmul.f32 %v3685_v61, %v3685_v61 }
 0x54f   :  { %v1970_v12 = vadd.f32 %v1969_v44, %v1968_v1  ;;  %v1980_v8 = vsel %vm604_vm8, %v1960_v39, 0.0 }
 0x550   :  { %v1981_v7 = vsel %vm604_vm8, %v1961_v49, 0.0 }
 0x551   :  { %1971 = vadd.xlane.f32.xlu1 %v1970_v12  ;;  %v1982_v37 = vadd.f32 %v1981_v7, %v1980_v8 }
 0x553   :  { %1983 = vadd.xlane.f32.xlu0 %v1982_v37 }
 0x55c   :  { %v1773_v16 = vpop.f32.mrb[4].mxu1 }
 0x55d   :  { %v1774_v40 = vadd.f32 %v1773_v16, %v3679_v42  ;;  %v1775_v54 = vpop.f32.mrb[5].mxu1 }
 0x55e   :  { %v1776_v13 = vadd.f32 %v1775_v54, %v3679_v42 }
 0x55f   :  { %v1930_v9 = vmul.f32 0.70710677, %v1774_v40  ;;  %v1922_v20 = vmul.f32 0.5, %v1774_v40 }
 0x560   :  { %v1931_v56 = vmul.f32 0.70710677, %v1776_v13  ;;  %v1923_v27 = vmul.f32 0.5, %v1776_v13 }
 0x561   :  { %2376 = verf.f32 %v1930_v9 }
 0x562   :  { %2378 = verf.f32 %v1931_v56 }
 0x56b   :  { %v2377_v32 = vpop.eup %2376 }
 0x56c   :  { %v2379_v60 = vpop.eup %2378  ;;  %v1946_v3 = vadd.f32 1.0, %v2377_v32 }
 0x56d   :  { %v1947_v4 = vadd.f32 1.0, %v2379_v60 }
 0x56e   :  { %v3699_v51 = vmul.f32 %v1946_v3, %v1922_v20 }
 0x56f   :  { %v3701_v29 = vmul.f32 %v1947_v4, %v1923_v27 }
 0x570   :  { %v2018_v59 = vsel %vm604_vm8, %v3699_v51, 0.0  ;;  %v1962_v10 = vmul.f32 %v3699_v51, %v3699_v51 }
 0x571   :  { %v2019_v63 = vsel %vm604_vm8, %v3701_v29, 0.0  ;;  %v1963_v47 = vmul.f32 %v3701_v29, %v3701_v29 }
 0x572   :  { %v2020_v30 = vadd.f32 %v2019_v63, %v2018_v59  ;;  %v2030_v6 = vsel %vm604_vm8, %v1962_v10, 0.0 }
 0x573   :  { %v2031_v55 = vsel %vm604_vm8, %v1963_v47, 0.0 }
 0x574   :  { %2021 = vadd.xlane.f32.xlu0 %v2020_v30  ;;  %v2032_v21 = vadd.f32 %v2031_v55, %v2030_v6 }
 0x576   :  { %2033 = vadd.xlane.f32.xlu1 %v2032_v21 }
 0x57e   :  { %v1844_v15 = vpop.f32.mrb[6].mxu0 }
 0x57f   :  { %v1845_v22 = vadd.f32 %v1844_v15, %v3679_v42  ;;  %v1846_v45 = vpop.f32.mrb[7].mxu0 }
 0x580   :  { %v1847_v26 = vadd.f32 %v1846_v45, %v3679_v42 }
 0x581   :  { %v1932_v23 = vmul.f32 0.70710677, %v1845_v22  ;;  %v1924_v34 = vmul.f32 0.5, %v1845_v22 }
 0x582   :  { %v1933_v41 = vmul.f32 0.70710677, %v1847_v26  ;;  %v1925_v11 = vmul.f32 0.5, %v1847_v26 }
 0x583   :  { %2380 = verf.f32 %v1932_v23 }
 0x584   :  { %2382 = verf.f32 %v1933_v41 }
 0x58d   :  { %v2381_v2 = vpop.eup %2380 }
 0x58e   :  { %v2383_v33 = vpop.eup %2382  ;;  %v1948_v14 = vadd.f32 1.0, %v2381_v2  ;;  %v1915_v28 = vpop.f32.mrb[6].mxu1 }
 0x58f   :  { %v1949_v62 = vadd.f32 1.0, %v2383_v33  ;;  %v1916_v43 = vadd.f32 %v1915_v28, %v3679_v42  ;;  %v1917_v53 = vpop.f32.mrb[7].mxu1 }
 0x590   :  { %v3715_v35 = vmul.f32 %v1948_v14, %v1924_v34  ;;  %v1918_v24 = vadd.f32 %v1917_v53, %v3679_v42 }
 0x591   :  { %v3717_v31 = vmul.f32 %v1949_v62, %v1925_v11  ;;  %v1934_v46 = vmul.f32 0.70710677, %v1916_v43  ;;  %v1926_v7 = vmul.f32 0.5, %v1916_v43 }
 0x592   :  { %v2062_v38 = vsel %vm604_vm8, %v3715_v35, 0.0  ;;  %v1964_v5 = vmul.f32 %v3715_v35, %v3715_v35  ;;  %v1935_v1 = vmul.f32 0.70710677, %v1918_v24  ;;  %v1927_v16 = vmul.f32 0.5, %v1918_v24 }
 0x593   :  { %v2063_v36 = vsel %vm604_vm8, %v3717_v31, 0.0  ;;  %v1965_v58 = vmul.f32 %v3717_v31, %v3717_v31  ;;  %2384 = verf.f32 %v1934_v46 }
 0x594   :  { %v2064_v39 = vadd.f32 %v2063_v36, %v2062_v38  ;;  %v2074_v44 = vsel %vm604_vm8, %v1964_v5, 0.0  ;;  %2386 = verf.f32 %v1935_v1 }
 0x595   :  { %v2075_v42 = vsel %vm604_vm8, %v1965_v58, 0.0 }
 0x596   :  { %2065 = vadd.xlane.f32.xlu0 %v2064_v39  ;;  %v2076_v49 = vadd.f32 %v2075_v42, %v2074_v44  ;;  %v3748_v44 = vld [vmem:[%s3825_s8] sm:$0xff] }
 0x598   :  { %2077 = vadd.xlane.f32.xlu1 %v2076_v49 }
 0x59d   :  { %v2385_v12 = vpop.eup %2384 }
 0x59e   :  { %v2387_v8 = vpop.eup %2386  ;;  %v1950_v37 = vadd.f32 1.0, %v2385_v12 }
 0x59f   :  { %v1951_v40 = vadd.f32 1.0, %v2387_v8 }
 0x5a0   :  { %v3731_v54 = vmul.f32 %v1950_v37, %v1926_v7  ;;  %v3754_v7 = vcombine.high %v3748_v44, %v3748_v44 }
 0x5a1   :  { %v3733_v13 = vmul.f32 %v1951_v40, %v1927_v16  ;;  %v3759_v16 = vld [vmem:[%s3826_s9] sm:$0xff] }
 0x5a2   :  { %v2106_v9 = vsel %vm604_vm8, %v3731_v54, 0.0  ;;  %v1966_v56 = vmul.f32 %v3731_v54, %v3731_v54 }
 0x5a3   :  { %v2107_v32 = vsel %vm604_vm8, %v3733_v13, 0.0  ;;  %v1967_v60 = vmul.f32 %v3733_v13, %v3733_v13 }
 0x5a4   :  { %v2108_v20 = vadd.f32 %v2107_v32, %v2106_v9  ;;  %v2118_v3 = vsel %vm604_vm8, %v1966_v56, 0.0 }
 0x5a5   :  { %v2119_v27 = vsel %vm604_vm8, %v1967_v60, 0.0  ;;  %v3767_v60 = vcombine.high %v3759_v16, %v3759_v16 }
 0x5a6   :  { %2109 = vadd.xlane.f32.xlu0 %v2108_v20  ;;  %v2120_v4 = vadd.f32 %v2119_v27, %v2118_v3 }
 0x5a8   :  { %2121 = vadd.xlane.f32.xlu1 %v2120_v4 }
 0x5de   :  { %v1972_v59 = vpop.xlane.xlu1 %1971 }
 0x5df   :  { %v1973_v10 = vrot.slane %v1972_v59, 4 }
 0x5e0   :  { %v1984_v63 = vpop.xlane.xlu0 %1983 }
 0x5e1   :  { %v1974_v47 = vadd.f32 %v1973_v10, %v1972_v59  ;;  %v1985_v30 = vrot.slane %v1984_v63, 4 }
 0x5e3   :  { %v1975_v6 = vrot.slane %v1974_v47, 2  ;;  %v1986_v55 = vadd.f32 %v1985_v30, %v1984_v63 }
 0x5e5   :  { %v1987_v21 = vrot.slane %v1986_v55, 2  ;;  %v1976_v15 = vadd.f32 %v1975_v6, %v1974_v47 }
 0x5e7   :  { %v1977_v22 = vrot.slane %v1976_v15, 1  ;;  %v1988_v45 = vadd.f32 %v1987_v21, %v1986_v55 }
 0x5e9   :  { %v1978_v26 = vadd.f32 %v1977_v22, %v1976_v15  ;;  %v1989_v23 = vrot.slane %v1988_v45, 1 }
 0x5eb   :  { %2299 = vpush %v1978_v26  ;;  %v1990_v41 = vadd.f32 %v1989_v23, %v1988_v45 }
 0x5ed   :  { %2301 = vpush %v1990_v41 }
 0x601   :  { %v2022_v2 = vpop.xlane.xlu0 %2021 }
 0x602   :  { %v2023_v34 = vrot.slane %v2022_v2, 4 }
 0x603   :  { %v2034_v33 = vpop.xlane.xlu1 %2033 }
 0x604   :  { %v2035_v14 = vrot.slane %v2034_v33, 4  ;;  %v2024_v11 = vadd.f32 %v2023_v34, %v2022_v2 }
 0x606   :  { %v2036_v62 = vadd.f32 %v2035_v14, %v2034_v33  ;;  %v2025_v28 = vrot.slane %v2024_v11, 2 }
 0x608   :  { %v2037_v43 = vrot.slane %v2036_v62, 2  ;;  %v2026_v24 = vadd.f32 %v2025_v28, %v2024_v11 }
 0x60a   :  { %v2038_v38 = vadd.f32 %v2037_v43, %v2036_v62  ;;  %v2027_v5 = vrot.slane %v2026_v24, 1 }
 0x60c   :  { %v2039_v46 = vrot.slane %v2038_v38, 1  ;;  %v2028_v58 = vadd.f32 %v2027_v5, %v2026_v24 }
 0x60e   :  { %v2040_v1 = vadd.f32 %v2039_v46, %v2038_v38 }
 0x61c   :  { %s2300_s7 = spop %2299 }
 0x61d   :  { %s1992_s19 = smul.f32 0.0009765625, %s2300_s7 }
 0x61e   :  { %s2302_s6 = spop %2301 }
 0x61f   :  { %s1994_s21 = smul.f32 %s1992_s19, %s1992_s19  ;;  %v2000_v39 = vstv %s1992_s19 }
 0x620   :  { %s1993_s22 = smul.f32 0.0009765625, %s2302_s6  ;;  %v2001_v12 = vsub.f32 %v3683_v52, %v2000_v39  ;;  %v2002_v8 = vsub.f32 %v3685_v61, %v2000_v39 }
 0x622   :  { %s1995_s23 = ssub.f32 %s1993_s22, %s1994_s21 }
 0x623   :  { %v2066_v42 = vpop.xlane.xlu0 %2065 }
 0x624   :  { %s1996_s24 = sadd.f32 1e-05, %s1995_s23  ;;  %v2067_v37 = vrot.slane %v2066_v42, 4 }
 0x625   :  { %v2078_v49 = vpop.xlane.xlu1 %2077 }
 0x626   :  { %v1997_v53 = vstv %s1996_s24  ;;  %v2079_v9 = vrot.slane %v2078_v49, 4  ;;  %v2068_v20 = vadd.f32 %v2067_v37, %v2066_v42  ;;  %s2570_s24 = smov [#allocation11]  }
 0x627   :  { %2388 = vrsqrt.f32 %v1997_v53  ;;  %s2176_s25 = sshll.u32 %s2570_s24, 4  ;;  %s2177_s25 = int_to_ptr.vmem [resolvable:$true] %s2176_s25 }
 0x628   :  { %v2080_v3 = vadd.f32 %v2079_v9, %v2078_v49  ;;  %v2069_v63 = vrot.slane %v2068_v20, 2  ;;  %s2524_s3 = scalar_lea.vmem %s2177_s25, 512  ;;  %p2529_p5 = scmp.lt.s32.totalorder %s2177_s25, %s2177_s25 }
 0x629   :  { %p2525_p4 = scmp.ne.s32.totalorder %s2177_s25, %s2524_s3  ;;  %p2530_p6 = scmp.lt.s32.totalorder %s2524_s3, %s2524_s3 }
 0x62a   :  { %v2081_v47 = vrot.slane %v2080_v3, 2  ;;  %v2070_v55 = vadd.f32 %v2069_v63, %v2068_v20 }
 0x62b   :  { %p2531_p7 = por %p2530_p6, %p2529_p5 }
 0x62c   :  { %v2082_v21 = vadd.f32 %v2081_v47, %v2080_v3  ;;  %v2071_v15 = vrot.slane %v2070_v55, 1 }
 0x62d   :  { %p2532_p8 = pnand %p2531_p7, %p2525_p4 }
 0x62e   :  { %v2083_v22 = vrot.slane %v2082_v21, 1  ;;  %v2072_v45 = vadd.f32 %v2071_v15, %v2070_v55 }
 0x631   :  { %v2389_v36 = vpop.eup %2388 }
 0x632   :  { %2303 = vpush %v2389_v36 }
 0x633   :  { %2305 = vpush %v2028_v58  ;;  %v2110_v23 = vpop.xlane.xlu0 %2109 }
 0x634   :  { %2307 = vpush %v2040_v1  ;;  %v2111_v34 = vrot.slane %v2110_v23, 4 }
 0x635   :  { %v2122_v41 = vpop.xlane.xlu1 %2121 }
 0x636   :  { %v2123_v11 = vrot.slane %v2122_v41, 4 }
 0x638   :  { %v2124_v24 = vadd.f32 %v2123_v11, %v2122_v41 }
 0x63a   :  { %v2125_v58 = vrot.slane %v2124_v24, 2 }
 0x63c   :  { %v2126_v49 = vadd.f32 %v2125_v58, %v2124_v24 }
 0x663   :  { %s2304_s5 = spop %2303 }
 0x664   :  { %v2003_v40 = vstv %s2304_s5  ;;  %s2306_s8 = spop %2305 }
 0x665   :  { %v2004_v56 = vmul.f32 %v2003_v40, %v2001_v12  ;;  %v2005_v32 = vmul.f32 %v2003_v40, %v2002_v8  ;;  %s3761_s29 = smul.f32 0.0009765625, %s2306_s8  ;;  %s2308_s11 = spop %2307  ;;  %v2127_v8 = vrot.slane %v2126_v49, 1 }
 0x666   :  { %s2043_s12 = smul.f32 0.0009765625, %s2308_s11 }
 0x667   :  { %v2009_v52 = vmul.f32 %v2004_v56, %v3748_v44  ;;  %v2010_v61 = vmul.f32 %v3754_v7, %v2005_v32  ;;  %s2044_s9 = smul.f32 %s3761_s29, %s3761_s29  ;;  %v2050_v26 = vstv %s3761_s29 }
 0x668   :  { %v2051_v2 = vsub.f32 %v3699_v51, %v2050_v26  ;;  %v2052_v33 = vsub.f32 %v3701_v29, %v2050_v26  ;;  %v2112_v51 = vadd.f32 %v2111_v34, %v2110_v23 }
 0x669   :  { %v2011_v27 = vadd.f32 %v2009_v52, %v3195_v18  ;;  %v2012_v4 = vadd.f32 %v2010_v61, %v3204_v50  ;;  %s2045_s13 = ssub.f32 %s2043_s12, %s2044_s9  ;;  %v2084_v50 = vadd.f32 %v2083_v22, %v2082_v21 }
 0x66a   :  { %v2113_v36 = vrot.slane %v2112_v51, 2 }
 0x66b   :  { %v2016_v59 = vadd.f32 %v2011_v27, %v3759_v16  ;;  %v2017_v10 = vadd.f32 %v3767_v60, %v2012_v4  ;;  %s2046_s15 = sadd.f32 1e-05, %s2045_s13 }
 0x66c   :  { %v2114_v42 = vadd.f32 %v2113_v36, %v2112_v51 }
 0x66d   :  { %v2158_v30 = vcombine.low %v2016_v59, %v2017_v10  ;;  %v2047_v6 = vstv %s2046_s15 }
 0x66e   :  { %2390 = vrsqrt.f32 %v2047_v6  ;;  %v2115_v12 = vrot.slane %v2114_v42, 1 }
 0x66f   :  { %2166 = vst [vmem:[#allocation11] sm:$0xff] %v2158_v30 }
 0x670   :  { %v2116_v37 = vadd.f32 %v2115_v12, %v2114_v42 }
 0x678   :  { %v2391_v18 = vpop.eup %2390 }
 0x679   :  { %2309 = vpush %v2391_v18 }
 0x67a   :  { %2311 = vpush %v2072_v45 }
 0x67b   :  { %2313 = vpush %v2084_v50 }
 0x6aa   :  { %s2310_s16 = spop %2309 }
 0x6ab   :  { %v2053_v14 = vstv %s2310_s16  ;;  %s2312_s17 = spop %2311 }
 0x6ac   :  { %v2054_v62 = vmul.f32 %v2053_v14, %v2051_v2  ;;  %v2055_v28 = vmul.f32 %v2053_v14, %v2052_v33  ;;  %s3778_s18 = smul.f32 0.0009765625, %s2312_s17  ;;  %s2314_s1 = spop %2313 }
 0x6ad   :  { %s2087_s4 = smul.f32 0.0009765625, %s2314_s1 }
 0x6ae   :  { %v2056_v43 = vmul.f32 %v2054_v62, %v3748_v44  ;;  %v2057_v53 = vmul.f32 %v2055_v28, %v3754_v7  ;;  %s2088_s14 = smul.f32 %s3778_s18, %s3778_s18  ;;  %v2094_v40 = vstv %s3778_s18 }
 0x6af   :  { %v2095_v9 = vsub.f32 %v3715_v35, %v2094_v40  ;;  %v2096_v56 = vsub.f32 %v3717_v31, %v2094_v40 }
 0x6b0   :  { %v2058_v29 = vadd.f32 %v2056_v43, %v3240_v17  ;;  %v2059_v38 = vadd.f32 %v2057_v53, %v3247_v48  ;;  %s2089_s2 = ssub.f32 %s2087_s4, %s2088_s14  ;;  %v2128_v48 = vadd.f32 %v2127_v8, %v2126_v49 }
 0x6b2   :  { %v2060_v5 = vadd.f32 %v2058_v29, %v3759_v16  ;;  %v2061_v46 = vadd.f32 %v2059_v38, %v3767_v60  ;;  %s2090_s30 = sadd.f32 1e-05, %s2089_s2 }
 0x6b4   :  { %v2159_v1 = vcombine.low %v2060_v5, %v2061_v46  ;;  %v2091_v39 = vstv %s2090_s30 }
 0x6b5   :  { %2392 = vrsqrt.f32 %v2091_v39 }
 0x6b6   :  { %2167 = vst [vmem:[#allocation11 + $0x8] sm:$0xff] %v2159_v1 }
 0x6bf   :  { %v2393_v17 = vpop.eup %2392 }
 0x6c0   :  { %2315 = vpush %v2393_v17 }
 0x6c1   :  { %2317 = vpush %v2116_v37 }
 0x6c2   :  { %2319 = vpush %v2128_v48 }
 0x6f1   :  { %s2316_s26 = spop %2315 }
 0x6f2   :  { %v2097_v32 = vstv %s2316_s26  ;;  %s2318_s27 = spop %2317 }
 0x6f3   :  { %v2098_v52 = vmul.f32 %v2097_v32, %v2095_v9  ;;  %v2099_v61 = vmul.f32 %v2097_v32, %v2096_v56  ;;  %s2130_s20 = smul.f32 0.0009765625, %s2318_s27  ;;  %s2320_s7 = spop %2319 }
 0x6f4   :  { %s2131_s19 = smul.f32 0.0009765625, %s2320_s7 }
 0x6f5   :  { %v2100_v20 = vmul.f32 %v2098_v52, %v3748_v44  ;;  %v2101_v3 = vmul.f32 %v2099_v61, %v3754_v7  ;;  %s2132_s6 = smul.f32 %s2130_s20, %s2130_s20  ;;  %v2138_v47 = vstv %s2130_s20 }
 0x6f6   :  { %v2139_v30 = vsub.f32 %v3731_v54, %v2138_v47 }
 0x6f7   :  { %v2102_v27 = vadd.f32 %v2100_v20, %v3305_v19  ;;  %v2103_v4 = vadd.f32 %v2101_v3, %v3310_v25  ;;  %s2133_s21 = ssub.f32 %s2131_s19, %s2132_s6  ;;  %v2140_v19 = vsub.f32 %v3733_v13, %v2138_v47 }
 0x6f9   :  { %v2104_v35 = vadd.f32 %v2102_v27, %v3759_v16  ;;  %v2105_v31 = vadd.f32 %v2103_v4, %v3767_v60  ;;  %s2134_s22 = sadd.f32 1e-05, %s2133_s21 }
 0x6fb   :  { %v2160_v59 = vcombine.low %v2104_v35, %v2105_v31  ;;  %v2135_v10 = vstv %s2134_s22 }
 0x6fc   :  { %2394 = vrsqrt.f32 %v2135_v10 }
 0x6fd   :  { %2168 = vst [vmem:[#allocation11 + $0x10] sm:$0xff] %v2160_v59 }
 0x706   :  { %v2395_v63 = vpop.eup %2394 }
 0x707   :  { %2321 = vpush %v2395_v63 }
 0x738   :  { %s2322_s23 = spop %2321 }
 0x739   :  { %v2141_v6 = vstv %s2322_s23 }
 0x73a   :  { %v2142_v25 = vmul.f32 %v2141_v6, %v2139_v30  ;;  %v2143_v55 = vmul.f32 %v2141_v6, %v2140_v19 }
 0x73c   :  { %v2144_v21 = vmul.f32 %v2142_v25, %v3748_v44  ;;  %v2145_v15 = vmul.f32 %v2143_v55, %v3754_v7 }
 0x73e   :  { %v2146_v22 = vadd.f32 %v2144_v21, %v3330_v0  ;;  %v2147_v18 = vadd.f32 %v2145_v15, %v3335_v57 }
 0x740   :  { %v2148_v45 = vadd.f32 %v2146_v22, %v3759_v16  ;;  %v2149_v50 = vadd.f32 %v2147_v18, %v3767_v60 }
 0x742   :  { %v2161_v54 = vcombine.low %v2148_v45, %v2149_v50 }
 0x744   :  { %2169 = vst [vmem:[#allocation11 + $0x18] sm:$0xff] %v2161_v54 }
 0x745   :  { %2535 = shalt.err (!%p2532_p8)
}
 0x746   :  { %s2536_s28 = scalar_lea.hbm %s3827_s10, 512 }
 0x747   :  { %p2537_p9 = scmp.ne.s32.totalorder %s3827_s10, %s2536_s28  ;;  %p2540_p10 = scmp.lt.u32.totalorder %s2536_s28, %s3827_s10 }
 0x749   :  { %p2542_p11 = pnand %p2540_p10, %p2537_p9 }
 0x74b   :  { %2545 = shalt.err (!%p2542_p11)
}
 0x74c   :  { %2179 = dma.vmem_to_hbm [thread:$0]  %s2177_s25, 512, %s3827_s10, [#allocation5]  }
 0x74d   :  { %2552 = dma.done.wait [#allocation5], 512  }
 0x74e   :  { %2553 = vsyncadd [#allocation5], 4294966784 }
 0x74f   :  { %2183 = vsyncpa [#allocation4], 1 }
 0x750   :  { %2184 = vsyncpa [#allocation7], 1 }
 0x751   :  { %2185 = vsyncpa [#allocation10], 1 }
 0x752   :  { %2186 = vsyncpa [#allocation5], 1 }

</bundles_post_ra>
